<compile_context>
chip_gen: v7x
topology: tpu7x:2x2x1
jax: 0.10.0
libtpu: 0.0.40
codegen_flags: <defaults>
</compile_context>

<pallas_src>
import functools
import numpy as np
import jax
import jax.numpy as jnp
from jax import lax
from jax.experimental import pallas as pl
from jax.experimental.pallas import tpu as pltpu

CARDINALITY = 32  # BottleneckX.cardinality


# --------------------------------------------------------------------------------------
# helpers
# --------------------------------------------------------------------------------------

def _round_up(v, m):
    return ((v + m - 1) // m) * m


def _pick_th(H, W, target_rows=1024):
    """Largest row-tile that divides H, keeps th*W modest, and leaves >=2 h-tiles."""
    cap = H // 2 if H >= 16 else H
    best = 1
    for t in range(1, cap + 1):
        if H % t == 0 and t * W <= target_rows:
            best = t
    return best


def _const_spec(arr):
    shp = tuple(arr.shape)
    return pl.BlockSpec(shp, lambda n, i, _s=shp: (0,) * len(_s))


# --------------------------------------------------------------------------------------
# fused branch kernel: 1x1+bn+relu -> 3x3 (block-diag grouped, im2col) +bn+relu -> 1x1
# --------------------------------------------------------------------------------------

def _branch_compute(x_ref, w1_ref, s1_ref, b1_ref, w2_ref, s2_ref, b2_ref,
                    w3_ref, y1_scr, *, H, W, d, th):
    """Returns y3: (th*W, Cout) f32 for output rows [i*th, i*th+th)."""
    i = pl.program_id(1)
    row0 = i * th
    thb = th + 2 * d
    Wp = x_ref.shape[2]
    Cin = x_ref.shape[3]
    half = w1_ref.shape[1]

    # ---- 1x1 conv + folded BN + ReLU on the row window (incl. conv2 halo) ----
    xwin = x_ref[0, pl.ds(row0, thb), :, :]                       # (thb, Wp, Cin) bf16
    y1 = jnp.dot(xwin.reshape(thb * Wp, Cin), w1_ref[...],
                 preferred_element_type=jnp.float32)              # f32 acc
    y1 = jnp.maximum(y1 * s1_ref[...] + b1_ref[...], 0.0)
    y1 = y1.reshape(thb, Wp, half)

    # conv2's zero padding applies to y1 (the conv2 input), not to x -> mask it.
    rows = lax.broadcasted_iota(jnp.int32, (thb, Wp, 1), 0) + row0
    cols = lax.broadcasted_iota(jnp.int32, (thb, Wp, 1), 1)
    valid = (rows >= d) & (rows < H + d) & (cols >= d) & (cols < W + d)
    y1_scr[...] = jnp.where(valid, y1, 0.0)                       # f32 VMEM scratch

    # ---- 3x3 conv as ONE deep-K matmul (im2col slab, K = 9*half) ----
    wins = []
    for ky in range(3):
        for kx in range(3):
            win = y1_scr[ky * d:ky * d + th, kx * d:kx * d + W, :]  # (th, W, half)
            wins.append(win.reshape(th * W, half))
    slab = jnp.concatenate(wins, axis=-1)                         # (th*W, 9*half)
    y2 = jnp.dot(slab.astype(w2_ref.dtype), w2_ref[...],
                 preferred_element_type=jnp.float32)
    y2 = jnp.maximum(y2 * s2_ref[...] + b2_ref[...], 0.0)

    # ---- final 1x1 conv (no BN / ReLU here) ----
    y3 = jnp.dot(y2.astype(w3_ref.dtype), w3_ref[...],
                 preferred_element_type=jnp.float32)              # (th*W, Cout)
    return y3


def _elastic_kernel(x_ref, w1_ref, s1_ref, b1_ref, w2_ref, s2_ref, b2_ref,
                    w3_ref, o_ref, y1_scr, *, H, W, d, th):
    y3 = _branch_compute(x_ref, w1_ref, s1_ref, b1_ref, w2_ref, s2_ref, b2_ref,
                         w3_ref, y1_scr, H=H, W=W, d=d, th=th)
    cout = o_ref.shape[3]
    o_ref[0] = y3.reshape(th, W, cout).astype(o_ref.dtype)


def _main_kernel(x_ref, ydup_ref, w1_ref, s1_ref, b1_ref, w2_ref, s2_ref, b2_ref,
                 w3_ref, s3_ref, b3_ref, o_ref, y1_scr, *, H, W, d, th):
    y3 = _branch_compute(x_ref, w1_ref, s1_ref, b1_ref, w2_ref, s2_ref, b2_ref,
                         w3_ref, y1_scr, H=H, W=W, d=d, th=th)
    i = pl.program_id(1)
    row0 = i * th
    cout = o_ref.shape[3]
    # fused epilogue: bn3(main + out_d) + residual, relu    (residual sliced from x_ref)
    ydup = ydup_ref[0].astype(jnp.float32).reshape(th * W, cout)
    res = x_ref[0, pl.ds(row0 + d, th), pl.ds(d, W), :].astype(jnp.float32)
    res = res.reshape(th * W, cout)
    v = (y3 + ydup) * s3_ref[...] + b3_ref[...] + res
    o_ref[0] = jnp.maximum(v, 0.0).reshape(th, W, cout).astype(o_ref.dtype)


def fused_bottleneck_branch(x_pad, w1, s1, b1, w2k, s2, b2, w3, *, H, W, d, th, out_dtype):
    """Elastic branch: conv1_d/bn1_d/relu -> conv2_d/bn2_d/relu -> conv3_d."""
    assert W % 8 == 0, "TODO(synk): W must be a multiple of 8 for free in-kernel reshapes"
    N = x_pad.shape[0]
    Wp = x_pad.shape[2]
    half = w1.shape[1]
    planes = w3.shape[1]
    kern = functools.partial(_elastic_kernel, H=H, W=W, d=d, th=th)
    return pl.pallas_call(
        kern,
        out_shape=jax.ShapeDtypeStruct((N, H, W, planes), out_dtype),
        grid=(N, H // th),
        in_specs=[pl.BlockSpec((1,) + tuple(x_pad.shape[1:]), lambda n, i: (n, 0, 0, 0)),
                  _const_spec(w1), _const_spec(s1), _const_spec(b1),
                  _const_spec(w2k), _const_spec(s2), _const_spec(b2), _const_spec(w3)],
        out_specs=pl.BlockSpec((1, th, W, planes), lambda n, i: (n, i, 0, 0)),
        scratch_shapes=[pltpu.VMEM((th + 2 * d, Wp, half), jnp.float32)],
        compiler_params=pltpu.CompilerParams(
            dimension_semantics=("parallel", "parallel"),
            vmem_limit_bytes=64 << 20),
    )(x_pad, w1, s1, b1, w2k, s2, b2, w3)


def fused_bottleneck_main(x_pad, ydup, w1, s1, b1, w2k, s2, b2, w3, s3, b3,
                          *, H, W, d, th, out_dtype):
    """Main branch + fused epilogue: relu(bn3(conv3(...) + out_d) + residual)."""
    assert W % 8 == 0, "TODO(synk): W must be a multiple of 8 for free in-kernel reshapes"
    N = x_pad.shape[0]
    Wp = x_pad.shape[2]
    half = w1.shape[1]
    planes = w3.shape[1]
    kern = functools.partial(_main_kernel, H=H, W=W, d=d, th=th)
    return pl.pallas_call(
        kern,
        out_shape=jax.ShapeDtypeStruct((N, H, W, planes), out_dtype),
        grid=(N, H // th),
        in_specs=[pl.BlockSpec((1,) + tuple(x_pad.shape[1:]), lambda n, i: (n, 0, 0, 0)),
                  pl.BlockSpec((1, th, W, planes), lambda n, i: (n, i, 0, 0)),
                  _const_spec(w1), _const_spec(s1), _const_spec(b1),
                  _const_spec(w2k), _const_spec(s2), _const_spec(b2), _const_spec(w3),
                  _const_spec(s3), _const_spec(b3)],
        out_specs=pl.BlockSpec((1, th, W, planes), lambda n, i: (n, i, 0, 0)),
        scratch_shapes=[pltpu.VMEM((th + 2 * d, Wp, half), jnp.float32)],
        compiler_params=pltpu.CompilerParams(
            dimension_semantics=("parallel", "parallel"),
            vmem_limit_bytes=64 << 20),
    )(x_pad, ydup, w1, s1, b1, w2k, s2, b2, w3, s3, b3)


# --------------------------------------------------------------------------------------
# AvgPool2d(2,2) and bilinear x2 upsample as 2-tap VPU stencils (no kron, no MXU)
# --------------------------------------------------------------------------------------

def _avgpool_kernel(x_ref, o_ref):
    c = o_ref.shape[3]
    v = x_ref[0].astype(jnp.float32)                 # (thd, 2, Wd, 2C)  (packed cols)
    s = v[:, 0] + v[:, 1]                            # pool rows
    o_ref[0] = (0.25 * (s[:, :, :c] + s[:, :, c:])).astype(o_ref.dtype)   # pool cols


def avgpool2x2(x_nhwc, *, out_dtype):
    N, He, We, C = x_nhwc.shape
    Hd, Wd = He // 2, We // 2
    # pack the 2x2 window into (rows: explicit dim, cols: channel dim) -- free reshape.
    xpk = x_nhwc.reshape(N, Hd, 2, Wd, 2 * C)
    thd = _pick_th(Hd, Wd)
    return pl.pallas_call(
        _avgpool_kernel,
        out_shape=jax.ShapeDtypeStruct((N, Hd, Wd, C), out_dtype),
        grid=(N, Hd // thd),
        in_specs=[pl.BlockSpec((1, thd, 2, Wd, 2 * C), lambda n, i: (n, i, 0, 0, 0))],
        out_specs=pl.BlockSpec((1, thd, Wd, C), lambda n, i: (n, i, 0, 0)),
        compiler_params=pltpu.CompilerParams(
            dimension_semantics=("parallel", "parallel")),
    )(xpk)


def _upsample2x_kernel(x_ref, o_ref, *, thd, Wd):
    # bilinear x2, align_corners=False == fixed (0.25, 0.75) stencil on a replicate-
    # padded input.  Output is column-packed: (2*thd, Wd, 2*C) so the store is lane dense.
    q0 = pl.program_id(1) * thd
    c = x_ref.shape[3]
    blk = x_ref[0, pl.ds(q0, thd + 2), :, :].astype(jnp.float32)   # (thd+2, Wd+2, C)
    top, mid, bot = blk[0:thd], blk[1:thd + 1], blk[2:thd + 2]
    r_even = 0.25 * top + 0.75 * mid
    r_odd = 0.75 * mid + 0.25 * bot

    def col_mix(v):
        l, m, r = v[:, 0:Wd, :], v[:, 1:Wd + 1, :], v[:, 2:Wd + 2, :]
        return jnp.concatenate([0.25 * l + 0.75 * m, 0.75 * m + 0.25 * r], axis=-1)

    out = jnp.stack([col_mix(r_even), col_mix(r_odd)], axis=1)     # (thd, 2, Wd, 2C)
    o_ref[0] = out.reshape(2 * thd, Wd, 2 * c).astype(o_ref.dtype)


def upsample2x_bilinear(yd, *, out_dtype):
    """nn.Upsample(scale_factor=2, mode='bilinear', align_corners=False)."""
    N, Hd, Wd, C = yd.shape
    ydp = jnp.pad(yd, ((0, 0), (1, 1), (1, 1), (0, 0)), mode='edge')
    thd = _pick_th(Hd, Wd)
    kern = functools.partial(_upsample2x_kernel, thd=thd, Wd=Wd)
    packed = pl.pallas_call(
        kern,
        out_shape=jax.ShapeDtypeStruct((N, 2 * Hd, Wd, 2 * C), out_dtype),
        grid=(N, Hd // thd),
        in_specs=[pl.BlockSpec((1, Hd + 2, Wd + 2, C), lambda n, i: (n, 0, 0, 0))],
        out_specs=pl.BlockSpec((1, 2 * thd, Wd, 2 * C), lambda n, i: (n, i, 0, 0)),
        compiler_params=pltpu.CompilerParams(
            dimension_semantics=("parallel", "parallel")),
    )(ydp)
    # column unpack: row-major (N, 2Hd, Wd, 2, C) == (N, 2Hd, 2Wd, C) -> free XLA reshape.
    return packed.reshape(N, 2 * Hd, 2 * Wd, C)


# --------------------------------------------------------------------------------------
# weight layout conversion & parameter init (BN folded, inference mode)
# --------------------------------------------------------------------------------------

def grouped_to_dense_k(w_g, groups):
    """torch grouped weight (Cout, Cin/g, 3, 3) -> dense block-diagonal (9*Cin, Cout)."""
    wg = np.asarray(w_g).astype(np.float32)
    cout, cpg, kh, kw = wg.shape
    cin = cpg * groups
    og = cout // groups
    w = np.zeros((kh * kw, cin, cout), np.float32)
    for g in range(groups):
        blk = wg[g * og:(g + 1) * og].transpose(2, 3, 1, 0).reshape(kh * kw, cpg, og)
        w[:, g * cpg:(g + 1) * cpg, g * og:(g + 1) * og] = blk
    return jnp.asarray(w.reshape(kh * kw * cin, cout))


def make_params(key, inplanes, planes):
    bottle = planes * CARDINALITY // 32
    half = bottle // 2
    groups = CARDINALITY // 2

    def conv_w(k, cout, cin_pg, ksz):
        bound = 1.0 / np.sqrt(cin_pg * ksz * ksz)
        return jax.random.uniform(k, (cout, cin_pg, ksz, ksz), jnp.float32, -bound, bound)

    def bn_fold(k, c):
        k1, k2, k3, k4 = jax.random.split(k, 4)
        gamma = 1.0 + 0.1 * jax.random.normal(k1, (c,), jnp.float32)
        beta = 0.1 * jax.random.normal(k2, (c,), jnp.float32)
        mean = 0.1 * jax.random.normal(k3, (c,), jnp.float32)
        var = 0.5 + jax.random.uniform(k4, (c,), jnp.float32)
        scale = gamma / jnp.sqrt(var + 1e-5)
        bias = beta - mean * scale
        return scale.reshape(1, c), bias.reshape(1, c)

    bf = lambda a: jnp.asarray(a, jnp.bfloat16)
    ks = jax.random.split(key, 11)
    p = {}
    # elastic (down-sampled) branch
    p['w1d'] = bf(conv_w(ks[0], half, inplanes, 1)[:, :, 0, 0].T)
    p['s1d'], p['b1d'] = bn_fold(ks[1], half)
    p['w2d_g'] = bf(conv_w(ks[2], half, half // groups, 3))
    p['w2d'] = bf(grouped_to_dense_k(p['w2d_g'], groups))
    p['s2d'], p['b2d'] = bn_fold(ks[3], half)
    p['w3d'] = bf(conv_w(ks[4], planes, half, 1)[:, :, 0, 0].T)
    # main branch
    p['w1'] = bf(conv_w(ks[5], half, inplanes, 1)[:, :, 0, 0].T)
    p['s1'], p['b1'] = bn_fold(ks[6], half)
    p['w2_g'] = bf(conv_w(ks[7], half, half // groups, 3))
    p['w2'] = bf(grouped_to_dense_k(p['w2_g'], groups))
    p['s2'], p['b2'] = bn_fold(ks[8], half)
    p['w3'] = bf(conv_w(ks[9], planes, half, 1)[:, :, 0, 0].T)
    p['s3'], p['b3'] = bn_fold(ks[10], planes)
    return p


# --------------------------------------------------------------------------------------
# forward pass (Pallas) and plain-JAX reference
# --------------------------------------------------------------------------------------

def bottleneckx_elastic_forward_nhwc(x, p, *, planes, stride=1, dilation=1):
    assert stride == 1, "TODO(synk): only the stride=1 configuration is implemented"
    d = int(dilation)
    N, H, W, Cin = x.shape
    planes_ = p['w3'].shape[1]
    assert Cin == planes_, "identity residual requires inplanes == planes"
    assert W % 8 == 0
    elastic = (stride == 1 and planes_ < 1024)

    xb = x.astype(jnp.bfloat16)

    # ---------------- elastic (low-resolution) branch ----------------
    if elastic:
        xe = xb
        if (H % 2) or (W % 2):  # matches F.pad(..., mode='replicate') before AvgPool2d
            xe = jnp.pad(xe, ((0, 0), (0, H % 2), (0, W % 2), (0, 0)), mode='edge')
        xd = avgpool2x2(xe, out_dtype=jnp.bfloat16)
    else:
        xd = xb
    _, Hd, Wd, _ = xd.shape
    Wdp = _round_up(Wd + 2 * d, 16)
    xd_pad = jnp.pad(xd, ((0, 0), (d, d), (d, Wdp - Wd - d), (0, 0)))
    thd = _pick_th(Hd, Wd)
    yd = fused_bottleneck_branch(
        xd_pad, p['w1d'], p['s1d'], p['b1d'], p['w2d'], p['s2d'], p['b2d'], p['w3d'],
        H=Hd, W=Wd, d=d, th=thd, out_dtype=jnp.bfloat16)
    if elastic:
        yd_up = upsample2x_bilinear(yd, out_dtype=jnp.bfloat16)[:, :H, :W, :]
    else:
        yd_up = yd

    # ------------- main (full-resolution) branch + fused epilogue -------------
    Wp = _round_up(W + 2 * d, 16)
    x_pad = jnp.pad(xb, ((0, 0), (d, d), (d, Wp - W - d), (0, 0)))
    th = _pick_th(H, W)
    out = fused_bottleneck_main(
        x_pad, yd_up, p['w1'], p['s1'], p['b1'], p['w2'], p['s2'], p['b2'], p['w3'],
        p['s3'], p['b3'], H=H, W=W, d=d, th=th, out_dtype=jnp.float32)
    return out


def bottleneckx_elastic_forward(x_nchw, p, *, planes, stride=1, dilation=1):
    x = jnp.transpose(x_nchw, (0, 2, 3, 1))
    out = bottleneckx_elastic_forward_nhwc(x, p, planes=planes, stride=stride,
                                           dilation=dilation)
    return jnp.transpose(out, (0, 3, 1, 2))


def _upsample2_matrix(n_in):
    n_out = 2 * n_in
    m = np.zeros((n_out, n_in), np.float32)
    for o in range(n_out):
        src = max((o + 0.5) * 0.5 - 0.5, 0.0)
        i0 = min(int(np.floor(src)), n_in - 1)
        i1 = min(i0 + 1, n_in - 1)
        frac = src - i0
        m[o, i0] += 1.0 - frac
        m[o, i1] += frac
    return m


def reference_forward(x_nchw, p, *, dilation=1):
    """Pure-JAX (XLA) reference using the same bf16 weights / input, f32 math."""
    groups = CARDINALITY // 2
    d = dilation
    f32 = lambda a: jnp.asarray(a, jnp.float32)
    x = jnp.transpose(x_nchw, (0, 2, 3, 1)).astype(jnp.bfloat16).astype(jnp.float32)
    N, H, W, C = x.shape
    residual = x

    pw = lambda y, w: jnp.einsum('nhwi,io->nhwo', y, f32(w))

    def gconv(y, w_g):
        w_hwio = jnp.transpose(f32(w_g), (2, 3, 1, 0))
        return lax.conv_general_dilated(
            y, w_hwio, (1, 1), ((d, d), (d, d)), rhs_dilation=(d, d),
            dimension_numbers=('NHWC', 'HWIO', 'NHWC'), feature_group_count=groups)

    # elastic branch
    xd = x.reshape(N, H // 2, 2, W // 2, 2, C).mean(axis=(2, 4))
    yd = jax.nn.relu(pw(xd, p['w1d']) * f32(p['s1d']) + f32(p['b1d']))
    yd = jax.nn.relu(gconv(yd, p['w2d_g']) * f32(p['s2d']) + f32(p['b2d']))
    yd = pw(yd, p['w3d'])
    uy = jnp.asarray(_upsample2_matrix(H // 2))
    ux = jnp.asarray(_upsample2_matrix(W // 2))
    yd = jnp.einsum('oh,nhwc->nowc', uy, yd)
    yd = jnp.einsum('pw,nowc->nopc', ux, yd)

    # main branch
    y = jax.nn.relu(pw(x, p['w1']) * f32(p['s1']) + f32(p['b1']))
    y = jax.nn.relu(gconv(y, p['w2_g']) * f32(p['s2']) + f32(p['b2']))
    y = pw(y, p['w3'])

    out = (y + yd) * f32(p['s3']) + f32(p['b3']) + residual
    return jnp.transpose(jax.nn.relu(out), (0, 3, 1, 2))


# --------------------------------------------------------------------------------------

if __name__ == "__main__":
    # inplanes == planes so the identity residual is defined; planes=64 -> half=32,
    # groups=16 (2 channels / group), matching the PyTorch module at this size.
    N, inplanes, planes, H, W = 2, 64, 64, 16, 16

    key = jax.random.PRNGKey(0)
    kx, kp = jax.random.split(key)
    x = jax.random.normal(kx, (N, inplanes, H, W), jnp.float32)
    params = make_params(kp, inplanes, planes)

    fwd = jax.jit(functools.partial(bottleneckx_elastic_forward,
                                    planes=planes, stride=1, dilation=1))
    out = jax.block_until_ready(fwd(x, params))
    assert out.shape == (N, planes, H, W), out.shape

    ref = jax.block_until_ready(reference_forward(x, params, dilation=1))
    out_np = np.asarray(out, np.float32)
    ref_np = np.asarray(ref, np.float32)
    scale = float(np.max(np.abs(ref_np))) + 1e-6
    err = float(np.max(np.abs(out_np - ref_np)))
    # bf16 activations/weights with f32 accumulation: allow 2% of the output scale.
    if err > 2e-2 * scale:
        raise AssertionError(
            f"Pallas output mismatch vs JAX reference: max abs err={err:.4e}, scale={scale:.3e}")
    print("KERNEL_OK")
</pallas_src>

<mosaic_0001>
module attributes {stable_mosaic.version = 11 : i64} {
  func.func @_elastic_kernel(%arg0: i32, %arg1: i32, %arg2: memref<1x10x16x64xbf16, #tpu.memory_space<vmem>>, %arg3: memref<64x32xbf16, #tpu.memory_space<vmem>>, %arg4: memref<1x32xf32, #tpu.memory_space<vmem>>, %arg5: memref<1x32xf32, #tpu.memory_space<vmem>>, %arg6: memref<288x32xbf16, #tpu.memory_space<vmem>>, %arg7: memref<1x32xf32, #tpu.memory_space<vmem>>, %arg8: memref<1x32xf32, #tpu.memory_space<vmem>>, %arg9: memref<32x64xbf16, #tpu.memory_space<vmem>>, %arg10: memref<1x8x8x64xbf16, #tpu.memory_space<vmem>>, %arg11: memref<10x16x32xf32, #tpu.memory_space<vmem>>) attributes {dimension_semantics = [#tpu.dimension_semantics<parallel>, #tpu.dimension_semantics<parallel>], iteration_bounds = array<i64: 2, 1>, scalar_prefetch = 0 : i64, scratch_operands = 1 : i64, tpu.core_type = #tpu.core_type<tc>, window_params = [{transform_indices = @transform_0, window_bounds = array<i64: 1, 10, 16, 64>}, {pipeline_mode = #tpu.pipeline_mode<synchronous>, transform_indices = @transform_1, window_bounds = array<i64: 64, 32>}, {pipeline_mode = #tpu.pipeline_mode<synchronous>, transform_indices = @transform_2, window_bounds = array<i64: 1, 32>}, {pipeline_mode = #tpu.pipeline_mode<synchronous>, transform_indices = @transform_3, window_bounds = array<i64: 1, 32>}, {pipeline_mode = #tpu.pipeline_mode<synchronous>, transform_indices = @transform_4, window_bounds = array<i64: 288, 32>}, {pipeline_mode = #tpu.pipeline_mode<synchronous>, transform_indices = @transform_5, window_bounds = array<i64: 1, 32>}, {pipeline_mode = #tpu.pipeline_mode<synchronous>, transform_indices = @transform_6, window_bounds = array<i64: 1, 32>}, {pipeline_mode = #tpu.pipeline_mode<synchronous>, transform_indices = @transform_7, window_bounds = array<i64: 32, 64>}, {transform_indices = @transform_8, window_bounds = array<i64: 1, 8, 8, 64>}]} {
    %c8_i32 = arith.constant 8 : i32
    %0 = arith.muli %arg1, %c8_i32 : i32
    %c0 = arith.constant 0 : index
    %1 = arith.index_cast %0 : i32 to index
    %c0_0 = arith.constant 0 : index
    %c0_1 = arith.constant 0 : index
    %2 = vector.load %arg2[%c0, %1, %c0_0, %c0_1] : memref<1x10x16x64xbf16, #tpu.memory_space<vmem>>, vector<1x10x16x64xbf16>
    %3 = vector.shape_cast %2 : vector<1x10x16x64xbf16> to vector<10x16x64xbf16>
    %4 = vector.shape_cast %3 : vector<10x16x64xbf16> to vector<160x64xbf16>
    %c0_2 = arith.constant 0 : index
    %c0_3 = arith.constant 0 : index
    %5 = vector.load %arg3[%c0_2, %c0_3] : memref<64x32xbf16, #tpu.memory_space<vmem>>, vector<64x32xbf16>
    %cst = arith.constant dense<0.000000e+00> : vector<160x32xf32>
    %6 = tpu.matmul %4, %5, %cst {dimension_numbers = #tpu.dot_dimension_numbers<[1], [0], [0], [1], [0, 0, 1, 1], [], []>} : vector<160x64xbf16>, vector<64x32xbf16>, vector<160x32xf32> -> vector<160x32xf32>
    %c0_4 = arith.constant 0 : index
    %c0_5 = arith.constant 0 : index
    %7 = vector.load %arg4[%c0_4, %c0_5] : memref<1x32xf32, #tpu.memory_space<vmem>>, vector<1x32xf32>
    %8 = vector.broadcast %7 : vector<1x32xf32> to vector<160x32xf32>
    %9 = arith.mulf %6, %8 : vector<160x32xf32>
    %c0_6 = arith.constant 0 : index
    %c0_7 = arith.constant 0 : index
    %10 = vector.load %arg5[%c0_6, %c0_7] : memref<1x32xf32, #tpu.memory_space<vmem>>, vector<1x32xf32>
    %11 = vector.broadcast %10 : vector<1x32xf32> to vector<160x32xf32>
    %12 = arith.addf %9, %11 : vector<160x32xf32>
    %cst_8 = arith.constant 0.000000e+00 : f32
    %13 = vector.broadcast %cst_8 : f32 to vector<160x32xf32>
    %14 = arith.maximumf %12, %13 : vector<160x32xf32>
    %15 = vector.shape_cast %14 : vector<160x32xf32> to vector<10x16x32xf32>
    %16 = tpu.iota {dimensions = array<i32: 0>} : vector<10x16x1xi32>
    %17 = vector.broadcast %0 : i32 to vector<10x16x1xi32>
    %18 = arith.addi %16, %17 : vector<10x16x1xi32>
    %19 = tpu.iota {dimensions = array<i32: 1>} : vector<10x16x1xi32>
    %c1_i32 = arith.constant 1 : i32
    %20 = vector.broadcast %c1_i32 : i32 to vector<10x16x1xi32>
    %21 = arith.cmpi sge, %18, %20 : vector<10x16x1xi32>
    %c9_i32 = arith.constant 9 : i32
    %22 = vector.broadcast %c9_i32 : i32 to vector<10x16x1xi32>
    %23 = arith.cmpi slt, %18, %22 : vector<10x16x1xi32>
    %24 = arith.andi %21, %23 : vector<10x16x1xi1>
    %c1_i32_9 = arith.constant 1 : i32
    %25 = vector.broadcast %c1_i32_9 : i32 to vector<10x16x1xi32>
    %26 = arith.cmpi sge, %19, %25 : vector<10x16x1xi32>
    %27 = arith.andi %24, %26 : vector<10x16x1xi1>
    %c9_i32_10 = arith.constant 9 : i32
    %28 = vector.broadcast %c9_i32_10 : i32 to vector<10x16x1xi32>
    %29 = arith.cmpi slt, %19, %28 : vector<10x16x1xi32>
    %30 = arith.andi %27, %29 : vector<10x16x1xi1>
    %cst_11 = arith.constant 0.000000e+00 : f32
    %31 = vector.shape_cast %30 : vector<10x16x1xi1> to vector<10x16x1xi1>
    %32 = vector.broadcast %31 : vector<10x16x1xi1> to vector<10x16x32xi1>
    %33 = vector.broadcast %cst_11 : f32 to vector<10x16x32xf32>
    %34 = arith.select %32, %15, %33 : vector<10x16x32xi1>, vector<10x16x32xf32>
    %c0_12 = arith.constant 0 : index
    %c0_13 = arith.constant 0 : index
    %c0_14 = arith.constant 0 : index
    %35 = vector.load %arg11[%c0_12, %c0_13, %c0_14] : memref<10x16x32xf32, #tpu.memory_space<vmem>>, vector<10x16x32xf32>
    tpu.vector_store %arg11[%c0_12, %c0_13, %c0_14], %34 {strides = array<i32>} : memref<10x16x32xf32, #tpu.memory_space<vmem>>, vector<10x16x32xf32>,
    %c0_15 = arith.constant 0 : index
    %c0_16 = arith.constant 0 : index
    %c0_17 = arith.constant 0 : index
    %36 = vector.load %arg11[%c0_15, %c0_16, %c0_17] : memref<10x16x32xf32, #tpu.memory_space<vmem>>, vector<8x8x32xf32>
    %37 = vector.shape_cast %36 : vector<8x8x32xf32> to vector<64x32xf32>
    %c0_18 = arith.constant 0 : index
    %c1 = arith.constant 1 : index
    %c0_19 = arith.constant 0 : index
    %38 = vector.load %arg11[%c0_18, %c1, %c0_19] : memref<10x16x32xf32, #tpu.memory_space<vmem>>, vector<8x8x32xf32>
    %39 = vector.shape_cast %38 : vector<8x8x32xf32> to vector<64x32xf32>
    %c0_20 = arith.constant 0 : index
    %c2 = arith.constant 2 : index
    %c0_21 = arith.constant 0 : index
    %40 = vector.load %arg11[%c0_20, %c2, %c0_21] : memref<10x16x32xf32, #tpu.memory_space<vmem>>, vector<8x8x32xf32>
    %41 = vector.shape_cast %40 : vector<8x8x32xf32> to vector<64x32xf32>
    %c1_22 = arith.constant 1 : index
    %c0_23 = arith.constant 0 : index
    %c0_24 = arith.constant 0 : index
    %42 = vector.load %arg11[%c1_22, %c0_23, %c0_24] : memref<10x16x32xf32, #tpu.memory_space<vmem>>, vector<8x8x32xf32>
    %43 = vector.shape_cast %42 : vector<8x8x32xf32> to vector<64x32xf32>
    %c1_25 = arith.constant 1 : index
    %c1_26 = arith.constant 1 : index
    %c0_27 = arith.constant 0 : index
    %44 = vector.load %arg11[%c1_25, %c1_26, %c0_27] : memref<10x16x32xf32, #tpu.memory_space<vmem>>, vector<8x8x32xf32>
    %45 = vector.shape_cast %44 : vector<8x8x32xf32> to vector<64x32xf32>
    %c1_28 = arith.constant 1 : index
    %c2_29 = arith.constant 2 : index
    %c0_30 = arith.constant 0 : index
    %46 = vector.load %arg11[%c1_28, %c2_29, %c0_30] : memref<10x16x32xf32, #tpu.memory_space<vmem>>, vector<8x8x32xf32>
    %47 = vector.shape_cast %46 : vector<8x8x32xf32> to vector<64x32xf32>
    %c2_31 = arith.constant 2 : index
    %c0_32 = arith.constant 0 : index
    %c0_33 = arith.constant 0 : index
    %48 = vector.load %arg11[%c2_31, %c0_32, %c0_33] : memref<10x16x32xf32, #tpu.memory_space<vmem>>, vector<8x8x32xf32>
    %49 = vector.shape_cast %48 : vector<8x8x32xf32> to vector<64x32xf32>
    %c2_34 = arith.constant 2 : index
    %c1_35 = arith.constant 1 : index
    %c0_36 = arith.constant 0 : index
    %50 = vector.load %arg11[%c2_34, %c1_35, %c0_36] : memref<10x16x32xf32, #tpu.memory_space<vmem>>, vector<8x8x32xf32>
    %51 = vector.shape_cast %50 : vector<8x8x32xf32> to vector<64x32xf32>
    %c2_37 = arith.constant 2 : index
    %c2_38 = arith.constant 2 : index
    %c0_39 = arith.constant 0 : index
    %52 = vector.load %arg11[%c2_37, %c2_38, %c0_39] : memref<10x16x32xf32, #tpu.memory_space<vmem>>, vector<8x8x32xf32>
    %53 = vector.shape_cast %52 : vector<8x8x32xf32> to vector<64x32xf32>
    %54 = tpu.concatenate %37, %39, %41, %43, %45, %47, %49, %51, %53 in 1 : vector<64x32xf32>, vector<64x32xf32>, vector<64x32xf32>, vector<64x32xf32>, vector<64x32xf32>, vector<64x32xf32>, vector<64x32xf32>, vector<64x32xf32>, vector<64x32xf32> -> vector<64x288xf32>
    %55 = arith.truncf %54 : vector<64x288xf32> to vector<64x288xbf16>
    %c0_40 = arith.constant 0 : index
    %c0_41 = arith.constant 0 : index
    %56 = vector.load %arg6[%c0_40, %c0_41] : memref<288x32xbf16, #tpu.memory_space<vmem>>, vector<288x32xbf16>
    %cst_42 = arith.constant dense<0.000000e+00> : vector<64x32xf32>
    %57 = tpu.matmul %55, %56, %cst_42 {dimension_numbers = #tpu.dot_dimension_numbers<[1], [0], [0], [1], [0, 0, 1, 1], [], []>} : vector<64x288xbf16>, vector<288x32xbf16>, vector<64x32xf32> -> vector<64x32xf32>
    %c0_43 = arith.constant 0 : index
    %c0_44 = arith.constant 0 : index
    %58 = vector.load %arg7[%c0_43, %c0_44] : memref<1x32xf32, #tpu.memory_space<vmem>>, vector<1x32xf32>
    %59 = vector.broadcast %58 : vector<1x32xf32> to vector<64x32xf32>
    %60 = arith.mulf %57, %59 : vector<64x32xf32>
    %c0_45 = arith.constant 0 : index
    %c0_46 = arith.constant 0 : index
    %61 = vector.load %arg8[%c0_45, %c0_46] : memref<1x32xf32, #tpu.memory_space<vmem>>, vector<1x32xf32>
    %62 = vector.broadcast %61 : vector<1x32xf32> to vector<64x32xf32>
    %63 = arith.addf %60, %62 : vector<64x32xf32>
    %cst_47 = arith.constant 0.000000e+00 : f32
    %64 = vector.broadcast %cst_47 : f32 to vector<64x32xf32>
    %65 = arith.maximumf %63, %64 : vector<64x32xf32>
    %66 = arith.truncf %65 : vector<64x32xf32> to vector<64x32xbf16>
    %c0_48 = arith.constant 0 : index
    %c0_49 = arith.constant 0 : index
    %67 = vector.load %arg9[%c0_48, %c0_49] : memref<32x64xbf16, #tpu.memory_space<vmem>>, vector<32x64xbf16>
    %cst_50 = arith.constant dense<0.000000e+00> : vector<64x64xf32>
    %68 = tpu.matmul %66, %67, %cst_50 {dimension_numbers = #tpu.dot_dimension_numbers<[1], [0], [0], [1], [0, 0, 1, 1], [], []>} : vector<64x32xbf16>, vector<32x64xbf16>, vector<64x64xf32> -> vector<64x64xf32>
    %69 = vector.shape_cast %68 : vector<64x64xf32> to vector<8x8x64xf32>
    %70 = arith.truncf %69 : vector<8x8x64xf32> to vector<8x8x64xbf16>
    %c0_51 = arith.constant 0 : index
    %c0_52 = arith.constant 0 : index
    %c0_53 = arith.constant 0 : index
    %c0_54 = arith.constant 0 : index
    %71 = vector.load %arg10[%c0_51, %c0_52, %c0_53, %c0_54] : memref<1x8x8x64xbf16, #tpu.memory_space<vmem>>, vector<1x8x8x64xbf16>
    %72 = vector.shape_cast %71 : vector<1x8x8x64xbf16> to vector<8x8x64xbf16>
    %73 = vector.shape_cast %70 : vector<8x8x64xbf16> to vector<1x8x8x64xbf16>
    tpu.vector_store %arg10[%c0_51, %c0_52, %c0_53, %c0_54], %73 {strides = array<i32>} : memref<1x8x8x64xbf16, #tpu.memory_space<vmem>>, vector<1x8x8x64xbf16>,
    return
  }
  func.func @transform_0(%arg0: i32, %arg1: i32) -> (i32, i32, i32, i32) {
    %c0_i32 = arith.constant 0 : i32
    %c0_i32_0 = arith.constant 0 : i32
    %c0_i32_1 = arith.constant 0 : i32
    %c0_i32_2 = arith.constant 0 : i32
    return %arg0, %c0_i32, %c0_i32_0, %c0_i32_1 : i32, i32, i32, i32
  }
  func.func @transform_1(%arg0: i32, %arg1: i32) -> (i32, i32) {
    %c0_i32 = arith.constant 0 : i32
    %c0_i32_0 = arith.constant 0 : i32
    %c0_i32_1 = arith.constant 0 : i32
    return %c0_i32, %c0_i32_0 : i32, i32
  }
  func.func @transform_2(%arg0: i32, %arg1: i32) -> (i32, i32) {
    %c0_i32 = arith.constant 0 : i32
    %c0_i32_0 = arith.constant 0 : i32
    %c0_i32_1 = arith.constant 0 : i32
    return %c0_i32, %c0_i32_0 : i32, i32
  }
  func.func @transform_3(%arg0: i32, %arg1: i32) -> (i32, i32) {
    %c0_i32 = arith.constant 0 : i32
    %c0_i32_0 = arith.constant 0 : i32
    %c0_i32_1 = arith.constant 0 : i32
    return %c0_i32, %c0_i32_0 : i32, i32
  }
  func.func @transform_4(%arg0: i32, %arg1: i32) -> (i32, i32) {
    %c0_i32 = arith.constant 0 : i32
    %c0_i32_0 = arith.constant 0 : i32
    %c0_i32_1 = arith.constant 0 : i32
    return %c0_i32, %c0_i32_0 : i32, i32
  }
  func.func @transform_5(%arg0: i32, %arg1: i32) -> (i32, i32) {
    %c0_i32 = arith.constant 0 : i32
    %c0_i32_0 = arith.constant 0 : i32
    %c0_i32_1 = arith.constant 0 : i32
    return %c0_i32, %c0_i32_0 : i32, i32
  }
  func.func @transform_6(%arg0: i32, %arg1: i32) -> (i32, i32) {
    %c0_i32 = arith.constant 0 : i32
    %c0_i32_0 = arith.constant 0 : i32
    %c0_i32_1 = arith.constant 0 : i32
    return %c0_i32, %c0_i32_0 : i32, i32
  }
  func.func @transform_7(%arg0: i32, %arg1: i32) -> (i32, i32) {
    %c0_i32 = arith.constant 0 : i32
    %c0_i32_0 = arith.constant 0 : i32
    %c0_i32_1 = arith.constant 0 : i32
    return %c0_i32, %c0_i32_0 : i32, i32
  }
  func.func @transform_8(%arg0: i32, %arg1: i32) -> (i32, i32, i32, i32) {
    %c0_i32 = arith.constant 0 : i32
    %c0_i32_0 = arith.constant 0 : i32
    %c0_i32_1 = arith.constant 0 : i32
    return %arg0, %arg1, %c0_i32, %c0_i32_0 : i32, i32, i32, i32
  }
}

module attributes {stable_mosaic.version = 11 : i64} {
  func.func @_avgpool_kernel(%arg0: i32, %arg1: i32, %arg2: memref<1x8x2x8x128xbf16, #tpu.memory_space<vmem>>, %arg3: memref<1x8x8x64xbf16, #tpu.memory_space<vmem>>) attributes {dimension_semantics = [#tpu.dimension_semantics<parallel>, #tpu.dimension_semantics<parallel>], iteration_bounds = array<i64: 2, 1>, scalar_prefetch = 0 : i64, scratch_operands = 0 : i64, tpu.core_type = #tpu.core_type<tc>, window_params = [{transform_indices = @transform_0, window_bounds = array<i64: 1, 8, 2, 8, 128>}, {transform_indices = @transform_1, window_bounds = array<i64: 1, 8, 8, 64>}]} {
    %c0 = arith.constant 0 : index
    %c0_0 = arith.constant 0 : index
    %c0_1 = arith.constant 0 : index
    %c0_2 = arith.constant 0 : index
    %c0_3 = arith.constant 0 : index
    %0 = vector.load %arg2[%c0, %c0_0, %c0_1, %c0_2, %c0_3] : memref<1x8x2x8x128xbf16, #tpu.memory_space<vmem>>, vector<1x8x2x8x128xbf16>
    %1 = vector.shape_cast %0 : vector<1x8x2x8x128xbf16> to vector<8x2x8x128xbf16>
    %2 = arith.extf %1 : vector<8x2x8x128xbf16> to vector<8x2x8x128xf32>
    %3 = vector.extract_strided_slice %2 {offsets = [0, 0, 0, 0], sizes = [8, 1, 8, 128], strides = [1, 1, 1, 1]} : vector<8x2x8x128xf32> to vector<8x1x8x128xf32>
    %4 = vector.shape_cast %3 : vector<8x1x8x128xf32> to vector<8x8x128xf32>
    %5 = vector.extract_strided_slice %2 {offsets = [0, 1, 0, 0], sizes = [8, 1, 8, 128], strides = [1, 1, 1, 1]} : vector<8x2x8x128xf32> to vector<8x1x8x128xf32>
    %6 = vector.shape_cast %5 : vector<8x1x8x128xf32> to vector<8x8x128xf32>
    %7 = arith.addf %4, %6 : vector<8x8x128xf32>
    %8 = vector.extract_strided_slice %7 {offsets = [0, 0, 0], sizes = [8, 8, 64], strides = [1, 1, 1]} : vector<8x8x128xf32> to vector<8x8x64xf32>
    %9 = vector.extract_strided_slice %7 {offsets = [0, 0, 64], sizes = [8, 8, 64], strides = [1, 1, 1]} : vector<8x8x128xf32> to vector<8x8x64xf32>
    %10 = arith.addf %8, %9 : vector<8x8x64xf32>
    %cst = arith.constant 2.500000e-01 : f32
    %11 = vector.broadcast %cst : f32 to vector<8x8x64xf32>
    %12 = arith.mulf %11, %10 : vector<8x8x64xf32>
    %13 = arith.truncf %12 : vector<8x8x64xf32> to vector<8x8x64xbf16>
    %c0_4 = arith.constant 0 : index
    %c0_5 = arith.constant 0 : index
    %c0_6 = arith.constant 0 : index
    %c0_7 = arith.constant 0 : index
    %14 = vector.load %arg3[%c0_4, %c0_5, %c0_6, %c0_7] : memref<1x8x8x64xbf16, #tpu.memory_space<vmem>>, vector<1x8x8x64xbf16>
    %15 = vector.shape_cast %14 : vector<1x8x8x64xbf16> to vector<8x8x64xbf16>
    %16 = vector.shape_cast %13 : vector<8x8x64xbf16> to vector<1x8x8x64xbf16>
    tpu.vector_store %arg3[%c0_4, %c0_5, %c0_6, %c0_7], %16 {strides = array<i32>} : memref<1x8x8x64xbf16, #tpu.memory_space<vmem>>, vector<1x8x8x64xbf16>,
    return
  }
  func.func @transform_0(%arg0: i32, %arg1: i32) -> (i32, i32, i32, i32, i32) {
    %c0_i32 = arith.constant 0 : i32
    %c0_i32_0 = arith.constant 0 : i32
    %c0_i32_1 = arith.constant 0 : i32
    %c0_i32_2 = arith.constant 0 : i32
    return %arg0, %arg1, %c0_i32, %c0_i32_0, %c0_i32_1 : i32, i32, i32, i32, i32
  }
  func.func @transform_1(%arg0: i32, %arg1: i32) -> (i32, i32, i32, i32) {
    %c0_i32 = arith.constant 0 : i32
    %c0_i32_0 = arith.constant 0 : i32
    %c0_i32_1 = arith.constant 0 : i32
    return %arg0, %arg1, %c0_i32, %c0_i32_0 : i32, i32, i32, i32
  }
}

module attributes {stable_mosaic.version = 11 : i64} {
  func.func @_upsample2x_kernel(%arg0: i32, %arg1: i32, %arg2: memref<1x10x10x64xbf16, #tpu.memory_space<vmem>>, %arg3: memref<1x16x8x128xbf16, #tpu.memory_space<vmem>>) attributes {dimension_semantics = [#tpu.dimension_semantics<parallel>, #tpu.dimension_semantics<parallel>], iteration_bounds = array<i64: 2, 1>, scalar_prefetch = 0 : i64, scratch_operands = 0 : i64, tpu.core_type = #tpu.core_type<tc>, window_params = [{transform_indices = @transform_0, window_bounds = array<i64: 1, 10, 10, 64>}, {transform_indices = @transform_1, window_bounds = array<i64: 1, 16, 8, 128>}]} {
    %c8_i32 = arith.constant 8 : i32
    %0 = arith.muli %arg1, %c8_i32 : i32
    %c0 = arith.constant 0 : index
    %1 = arith.index_cast %0 : i32 to index
    %c0_0 = arith.constant 0 : index
    %c0_1 = arith.constant 0 : index
    %2 = vector.load %arg2[%c0, %1, %c0_0, %c0_1] : memref<1x10x10x64xbf16, #tpu.memory_space<vmem>>, vector<1x10x10x64xbf16>
    %3 = vector.shape_cast %2 : vector<1x10x10x64xbf16> to vector<10x10x64xbf16>
    %4 = arith.extf %3 : vector<10x10x64xbf16> to vector<10x10x64xf32>
    %5 = vector.extract_strided_slice %4 {offsets = [0, 0, 0], sizes = [8, 10, 64], strides = [1, 1, 1]} : vector<10x10x64xf32> to vector<8x10x64xf32>
    %6 = vector.extract_strided_slice %4 {offsets = [1, 0, 0], sizes = [8, 10, 64], strides = [1, 1, 1]} : vector<10x10x64xf32> to vector<8x10x64xf32>
    %7 = vector.extract_strided_slice %4 {offsets = [2, 0, 0], sizes = [8, 10, 64], strides = [1, 1, 1]} : vector<10x10x64xf32> to vector<8x10x64xf32>
    %cst = arith.constant 2.500000e-01 : f32
    %8 = vector.broadcast %cst : f32 to vector<8x10x64xf32>
    %9 = arith.mulf %8, %5 : vector<8x10x64xf32>
    %cst_2 = arith.constant 7.500000e-01 : f32
    %10 = vector.broadcast %cst_2 : f32 to vector<8x10x64xf32>
    %11 = arith.mulf %10, %6 : vector<8x10x64xf32>
    %12 = arith.addf %9, %11 : vector<8x10x64xf32>
    %cst_3 = arith.constant 7.500000e-01 : f32
    %13 = vector.broadcast %cst_3 : f32 to vector<8x10x64xf32>
    %14 = arith.mulf %13, %6 : vector<8x10x64xf32>
    %cst_4 = arith.constant 2.500000e-01 : f32
    %15 = vector.broadcast %cst_4 : f32 to vector<8x10x64xf32>
    %16 = arith.mulf %15, %7 : vector<8x10x64xf32>
    %17 = arith.addf %14, %16 : vector<8x10x64xf32>
    %18 = vector.extract_strided_slice %12 {offsets = [0, 0, 0], sizes = [8, 8, 64], strides = [1, 1, 1]} : vector<8x10x64xf32> to vector<8x8x64xf32>
    %19 = vector.extract_strided_slice %12 {offsets = [0, 1, 0], sizes = [8, 8, 64], strides = [1, 1, 1]} : vector<8x10x64xf32> to vector<8x8x64xf32>
    %20 = vector.extract_strided_slice %12 {offsets = [0, 2, 0], sizes = [8, 8, 64], strides = [1, 1, 1]} : vector<8x10x64xf32> to vector<8x8x64xf32>
    %cst_5 = arith.constant 2.500000e-01 : f32
    %21 = vector.broadcast %cst_5 : f32 to vector<8x8x64xf32>
    %22 = arith.mulf %21, %18 : vector<8x8x64xf32>
    %cst_6 = arith.constant 7.500000e-01 : f32
    %23 = vector.broadcast %cst_6 : f32 to vector<8x8x64xf32>
    %24 = arith.mulf %23, %19 : vector<8x8x64xf32>
    %25 = arith.addf %22, %24 : vector<8x8x64xf32>
    %cst_7 = arith.constant 7.500000e-01 : f32
    %26 = vector.broadcast %cst_7 : f32 to vector<8x8x64xf32>
    %27 = arith.mulf %26, %19 : vector<8x8x64xf32>
    %cst_8 = arith.constant 2.500000e-01 : f32
    %28 = vector.broadcast %cst_8 : f32 to vector<8x8x64xf32>
    %29 = arith.mulf %28, %20 : vector<8x8x64xf32>
    %30 = arith.addf %27, %29 : vector<8x8x64xf32>
    %31 = tpu.concatenate %25, %30 in 2 : vector<8x8x64xf32>, vector<8x8x64xf32> -> vector<8x8x128xf32>
    %32 = vector.extract_strided_slice %17 {offsets = [0, 0, 0], sizes = [8, 8, 64], strides = [1, 1, 1]} : vector<8x10x64xf32> to vector<8x8x64xf32>
    %33 = vector.extract_strided_slice %17 {offsets = [0, 1, 0], sizes = [8, 8, 64], strides = [1, 1, 1]} : vector<8x10x64xf32> to vector<8x8x64xf32>
    %34 = vector.extract_strided_slice %17 {offsets = [0, 2, 0], sizes = [8, 8, 64], strides = [1, 1, 1]} : vector<8x10x64xf32> to vector<8x8x64xf32>
    %cst_9 = arith.constant 2.500000e-01 : f32
    %35 = vector.broadcast %cst_9 : f32 to vector<8x8x64xf32>
    %36 = arith.mulf %35, %32 : vector<8x8x64xf32>
    %cst_10 = arith.constant 7.500000e-01 : f32
    %37 = vector.broadcast %cst_10 : f32 to vector<8x8x64xf32>
    %38 = arith.mulf %37, %33 : vector<8x8x64xf32>
    %39 = arith.addf %36, %38 : vector<8x8x64xf32>
    %cst_11 = arith.constant 7.500000e-01 : f32
    %40 = vector.broadcast %cst_11 : f32 to vector<8x8x64xf32>
    %41 = arith.mulf %40, %33 : vector<8x8x64xf32>
    %cst_12 = arith.constant 2.500000e-01 : f32
    %42 = vector.broadcast %cst_12 : f32 to vector<8x8x64xf32>
    %43 = arith.mulf %42, %34 : vector<8x8x64xf32>
    %44 = arith.addf %41, %43 : vector<8x8x64xf32>
    %45 = tpu.concatenate %39, %44 in 2 : vector<8x8x64xf32>, vector<8x8x64xf32> -> vector<8x8x128xf32>
    %46 = vector.shape_cast %31 : vector<8x8x128xf32> to vector<8x1x8x128xf32>
    %47 = vector.shape_cast %45 : vector<8x8x128xf32> to vector<8x1x8x128xf32>
    %48 = tpu.concatenate %46, %47 in 1 : vector<8x1x8x128xf32>, vector<8x1x8x128xf32> -> vector<8x2x8x128xf32>
    %49 = vector.shape_cast %48 : vector<8x2x8x128xf32> to vector<16x8x128xf32>
    %50 = arith.truncf %49 : vector<16x8x128xf32> to vector<16x8x128xbf16>
    %c0_13 = arith.constant 0 : index
    %c0_14 = arith.constant 0 : index
    %c0_15 = arith.constant 0 : index
    %c0_16 = arith.constant 0 : index
    %51 = vector.load %arg3[%c0_13, %c0_14, %c0_15, %c0_16] : memref<1x16x8x128xbf16, #tpu.memory_space<vmem>>, vector<1x16x8x128xbf16>
    %52 = vector.shape_cast %51 : vector<1x16x8x128xbf16> to vector<16x8x128xbf16>
    %53 = vector.shape_cast %50 : vector<16x8x128xbf16> to vector<1x16x8x128xbf16>
    tpu.vector_store %arg3[%c0_13, %c0_14, %c0_15, %c0_16], %53 {strides = array<i32>} : memref<1x16x8x128xbf16, #tpu.memory_space<vmem>>, vector<1x16x8x128xbf16>,
    return
  }
  func.func @transform_0(%arg0: i32, %arg1: i32) -> (i32, i32, i32, i32) {
    %c0_i32 = arith.constant 0 : i32
    %c0_i32_0 = arith.constant 0 : i32
    %c0_i32_1 = arith.constant 0 : i32
    %c0_i32_2 = arith.constant 0 : i32
    return %arg0, %c0_i32, %c0_i32_0, %c0_i32_1 : i32, i32, i32, i32
  }
  func.func @transform_1(%arg0: i32, %arg1: i32) -> (i32, i32, i32, i32) {
    %c0_i32 = arith.constant 0 : i32
    %c0_i32_0 = arith.constant 0 : i32
    %c0_i32_1 = arith.constant 0 : i32
    return %arg0, %arg1, %c0_i32, %c0_i32_0 : i32, i32, i32, i32
  }
}

module attributes {stable_mosaic.version = 11 : i64} {
  func.func @_main_kernel(%arg0: i32, %arg1: i32, %arg2: memref<1x18x32x64xbf16, #tpu.memory_space<vmem>>, %arg3: memref<1x8x16x64xbf16, #tpu.memory_space<vmem>>, %arg4: memref<64x32xbf16, #tpu.memory_space<vmem>>, %arg5: memref<1x32xf32, #tpu.memory_space<vmem>>, %arg6: memref<1x32xf32, #tpu.memory_space<vmem>>, %arg7: memref<288x32xbf16, #tpu.memory_space<vmem>>, %arg8: memref<1x32xf32, #tpu.memory_space<vmem>>, %arg9: memref<1x32xf32, #tpu.memory_space<vmem>>, %arg10: memref<32x64xbf16, #tpu.memory_space<vmem>>, %arg11: memref<1x64xf32, #tpu.memory_space<vmem>>, %arg12: memref<1x64xf32, #tpu.memory_space<vmem>>, %arg13: memref<1x8x16x64xf32, #tpu.memory_space<vmem>>, %arg14: memref<10x32x32xf32, #tpu.memory_space<vmem>>) attributes {dimension_semantics = [#tpu.dimension_semantics<parallel>, #tpu.dimension_semantics<parallel>], iteration_bounds = array<i64: 2, 2>, scalar_prefetch = 0 : i64, scratch_operands = 1 : i64, tpu.core_type = #tpu.core_type<tc>, window_params = [{transform_indices = @transform_0, window_bounds = array<i64: 1, 18, 32, 64>}, {transform_indices = @transform_1, window_bounds = array<i64: 1, 8, 16, 64>}, {pipeline_mode = #tpu.pipeline_mode<synchronous>, transform_indices = @transform_2, window_bounds = array<i64: 64, 32>}, {pipeline_mode = #tpu.pipeline_mode<synchronous>, transform_indices = @transform_3, window_bounds = array<i64: 1, 32>}, {pipeline_mode = #tpu.pipeline_mode<synchronous>, transform_indices = @transform_4, window_bounds = array<i64: 1, 32>}, {pipeline_mode = #tpu.pipeline_mode<synchronous>, transform_indices = @transform_5, window_bounds = array<i64: 288, 32>}, {pipeline_mode = #tpu.pipeline_mode<synchronous>, transform_indices = @transform_6, window_bounds = array<i64: 1, 32>}, {pipeline_mode = #tpu.pipeline_mode<synchronous>, transform_indices = @transform_7, window_bounds = array<i64: 1, 32>}, {pipeline_mode = #tpu.pipeline_mode<synchronous>, transform_indices = @transform_8, window_bounds = array<i64: 32, 64>}, {pipeline_mode = #tpu.pipeline_mode<synchronous>, transform_indices = @transform_9, window_bounds = array<i64: 1, 64>}, {pipeline_mode = #tpu.pipeline_mode<synchronous>, transform_indices = @transform_10, window_bounds = array<i64: 1, 64>}, {transform_indices = @transform_11, window_bounds = array<i64: 1, 8, 16, 64>}]} {
    %c8_i32 = arith.constant 8 : i32
    %0 = arith.muli %arg1, %c8_i32 : i32
    %c0 = arith.constant 0 : index
    %1 = arith.index_cast %0 : i32 to index
    %c0_0 = arith.constant 0 : index
    %c0_1 = arith.constant 0 : index
    %2 = vector.load %arg2[%c0, %1, %c0_0, %c0_1] : memref<1x18x32x64xbf16, #tpu.memory_space<vmem>>, vector<1x10x32x64xbf16>
    %3 = vector.shape_cast %2 : vector<1x10x32x64xbf16> to vector<10x32x64xbf16>
    %4 = vector.shape_cast %3 : vector<10x32x64xbf16> to vector<320x64xbf16>
    %c0_2 = arith.constant 0 : index
    %c0_3 = arith.constant 0 : index
    %5 = vector.load %arg4[%c0_2, %c0_3] : memref<64x32xbf16, #tpu.memory_space<vmem>>, vector<64x32xbf16>
    %cst = arith.constant dense<0.000000e+00> : vector<320x32xf32>
    %6 = tpu.matmul %4, %5, %cst {dimension_numbers = #tpu.dot_dimension_numbers<[1], [0], [0], [1], [0, 0, 1, 1], [], []>} : vector<320x64xbf16>, vector<64x32xbf16>, vector<320x32xf32> -> vector<320x32xf32>
    %c0_4 = arith.constant 0 : index
    %c0_5 = arith.constant 0 : index
    %7 = vector.load %arg5[%c0_4, %c0_5] : memref<1x32xf32, #tpu.memory_space<vmem>>, vector<1x32xf32>
    %8 = vector.broadcast %7 : vector<1x32xf32> to vector<320x32xf32>
    %9 = arith.mulf %6, %8 : vector<320x32xf32>
    %c0_6 = arith.constant 0 : index
    %c0_7 = arith.constant 0 : index
    %10 = vector.load %arg6[%c0_6, %c0_7] : memref<1x32xf32, #tpu.memory_space<vmem>>, vector<1x32xf32>
    %11 = vector.broadcast %10 : vector<1x32xf32> to vector<320x32xf32>
    %12 = arith.addf %9, %11 : vector<320x32xf32>
    %cst_8 = arith.constant 0.000000e+00 : f32
    %13 = vector.broadcast %cst_8 : f32 to vector<320x32xf32>
    %14 = arith.maximumf %12, %13 : vector<320x32xf32>
    %15 = vector.shape_cast %14 : vector<320x32xf32> to vector<10x32x32xf32>
    %16 = tpu.iota {dimensions = array<i32: 0>} : vector<10x32x1xi32>
    %17 = vector.broadcast %0 : i32 to vector<10x32x1xi32>
    %18 = arith.addi %16, %17 : vector<10x32x1xi32>
    %19 = tpu.iota {dimensions = array<i32: 1>} : vector<10x32x1xi32>
    %c1_i32 = arith.constant 1 : i32
    %20 = vector.broadcast %c1_i32 : i32 to vector<10x32x1xi32>
    %21 = arith.cmpi sge, %18, %20 : vector<10x32x1xi32>
    %c17_i32 = arith.constant 17 : i32
    %22 = vector.broadcast %c17_i32 : i32 to vector<10x32x1xi32>
    %23 = arith.cmpi slt, %18, %22 : vector<10x32x1xi32>
    %24 = arith.andi %21, %23 : vector<10x32x1xi1>
    %c1_i32_9 = arith.constant 1 : i32
    %25 = vector.broadcast %c1_i32_9 : i32 to vector<10x32x1xi32>
    %26 = arith.cmpi sge, %19, %25 : vector<10x32x1xi32>
    %27 = arith.andi %24, %26 : vector<10x32x1xi1>
    %c17_i32_10 = arith.constant 17 : i32
    %28 = vector.broadcast %c17_i32_10 : i32 to vector<10x32x1xi32>
    %29 = arith.cmpi slt, %19, %28 : vector<10x32x1xi32>
    %30 = arith.andi %27, %29 : vector<10x32x1xi1>
    %cst_11 = arith.constant 0.000000e+00 : f32
    %31 = vector.shape_cast %30 : vector<10x32x1xi1> to vector<10x32x1xi1>
    %32 = vector.broadcast %31 : vector<10x32x1xi1> to vector<10x32x32xi1>
    %33 = vector.broadcast %cst_11 : f32 to vector<10x32x32xf32>
    %34 = arith.select %32, %15, %33 : vector<10x32x32xi1>, vector<10x32x32xf32>
    %c0_12 = arith.constant 0 : index
    %c0_13 = arith.constant 0 : index
    %c0_14 = arith.constant 0 : index
    %35 = vector.load %arg14[%c0_12, %c0_13, %c0_14] : memref<10x32x32xf32, #tpu.memory_space<vmem>>, vector<10x32x32xf32>
    tpu.vector_store %arg14[%c0_12, %c0_13, %c0_14], %34 {strides = array<i32>} : memref<10x32x32xf32, #tpu.memory_space<vmem>>, vector<10x32x32xf32>,
    %c0_15 = arith.constant 0 : index
    %c0_16 = arith.constant 0 : index
    %c0_17 = arith.constant 0 : index
    %36 = vector.load %arg14[%c0_15, %c0_16, %c0_17] : memref<10x32x32xf32, #tpu.memory_space<vmem>>, vector<8x16x32xf32>
    %37 = vector.shape_cast %36 : vector<8x16x32xf32> to vector<128x32xf32>
    %c0_18 = arith.constant 0 : index
    %c1 = arith.constant 1 : index
    %c0_19 = arith.constant 0 : index
    %38 = vector.load %arg14[%c0_18, %c1, %c0_19] : memref<10x32x32xf32, #tpu.memory_space<vmem>>, vector<8x16x32xf32>
    %39 = vector.shape_cast %38 : vector<8x16x32xf32> to vector<128x32xf32>
    %c0_20 = arith.constant 0 : index
    %c2 = arith.constant 2 : index
    %c0_21 = arith.constant 0 : index
    %40 = vector.load %arg14[%c0_20, %c2, %c0_21] : memref<10x32x32xf32, #tpu.memory_space<vmem>>, vector<8x16x32xf32>
    %41 = vector.shape_cast %40 : vector<8x16x32xf32> to vector<128x32xf32>
    %c1_22 = arith.constant 1 : index
    %c0_23 = arith.constant 0 : index
    %c0_24 = arith.constant 0 : index
    %42 = vector.load %arg14[%c1_22, %c0_23, %c0_24] : memref<10x32x32xf32, #tpu.memory_space<vmem>>, vector<8x16x32xf32>
    %43 = vector.shape_cast %42 : vector<8x16x32xf32> to vector<128x32xf32>
    %c1_25 = arith.constant 1 : index
    %c1_26 = arith.constant 1 : index
    %c0_27 = arith.constant 0 : index
    %44 = vector.load %arg14[%c1_25, %c1_26, %c0_27] : memref<10x32x32xf32, #tpu.memory_space<vmem>>, vector<8x16x32xf32>
    %45 = vector.shape_cast %44 : vector<8x16x32xf32> to vector<128x32xf32>
    %c1_28 = arith.constant 1 : index
    %c2_29 = arith.constant 2 : index
    %c0_30 = arith.constant 0 : index
    %46 = vector.load %arg14[%c1_28, %c2_29, %c0_30] : memref<10x32x32xf32, #tpu.memory_space<vmem>>, vector<8x16x32xf32>
    %47 = vector.shape_cast %46 : vector<8x16x32xf32> to vector<128x32xf32>
    %c2_31 = arith.constant 2 : index
    %c0_32 = arith.constant 0 : index
    %c0_33 = arith.constant 0 : index
    %48 = vector.load %arg14[%c2_31, %c0_32, %c0_33] : memref<10x32x32xf32, #tpu.memory_space<vmem>>, vector<8x16x32xf32>
    %49 = vector.shape_cast %48 : vector<8x16x32xf32> to vector<128x32xf32>
    %c2_34 = arith.constant 2 : index
    %c1_35 = arith.constant 1 : index
    %c0_36 = arith.constant 0 : index
    %50 = vector.load %arg14[%c2_34, %c1_35, %c0_36] : memref<10x32x32xf32, #tpu.memory_space<vmem>>, vector<8x16x32xf32>
    %51 = vector.shape_cast %50 : vector<8x16x32xf32> to vector<128x32xf32>
    %c2_37 = arith.constant 2 : index
    %c2_38 = arith.constant 2 : index
    %c0_39 = arith.constant 0 : index
    %52 = vector.load %arg14[%c2_37, %c2_38, %c0_39] : memref<10x32x32xf32, #tpu.memory_space<vmem>>, vector<8x16x32xf32>
    %53 = vector.shape_cast %52 : vector<8x16x32xf32> to vector<128x32xf32>
    %54 = tpu.concatenate %37, %39, %41, %43, %45, %47, %49, %51, %53 in 1 : vector<128x32xf32>, vector<128x32xf32>, vector<128x32xf32>, vector<128x32xf32>, vector<128x32xf32>, vector<128x32xf32>, vector<128x32xf32>, vector<128x32xf32>, vector<128x32xf32> -> vector<128x288xf32>
    %55 = arith.truncf %54 : vector<128x288xf32> to vector<128x288xbf16>
    %c0_40 = arith.constant 0 : index
    %c0_41 = arith.constant 0 : index
    %56 = vector.load %arg7[%c0_40, %c0_41] : memref<288x32xbf16, #tpu.memory_space<vmem>>, vector<288x32xbf16>
    %cst_42 = arith.constant dense<0.000000e+00> : vector<128x32xf32>
    %57 = tpu.matmul %55, %56, %cst_42 {dimension_numbers = #tpu.dot_dimension_numbers<[1], [0], [0], [1], [0, 0, 1, 1], [], []>} : vector<128x288xbf16>, vector<288x32xbf16>, vector<128x32xf32> -> vector<128x32xf32>
    %c0_43 = arith.constant 0 : index
    %c0_44 = arith.constant 0 : index
    %58 = vector.load %arg8[%c0_43, %c0_44] : memref<1x32xf32, #tpu.memory_space<vmem>>, vector<1x32xf32>
    %59 = vector.broadcast %58 : vector<1x32xf32> to vector<128x32xf32>
    %60 = arith.mulf %57, %59 : vector<128x32xf32>
    %c0_45 = arith.constant 0 : index
    %c0_46 = arith.constant 0 : index
    %61 = vector.load %arg9[%c0_45, %c0_46] : memref<1x32xf32, #tpu.memory_space<vmem>>, vector<1x32xf32>
    %62 = vector.broadcast %61 : vector<1x32xf32> to vector<128x32xf32>
    %63 = arith.addf %60, %62 : vector<128x32xf32>
    %cst_47 = arith.constant 0.000000e+00 : f32
    %64 = vector.broadcast %cst_47 : f32 to vector<128x32xf32>
    %65 = arith.maximumf %63, %64 : vector<128x32xf32>
    %66 = arith.truncf %65 : vector<128x32xf32> to vector<128x32xbf16>
    %c0_48 = arith.constant 0 : index
    %c0_49 = arith.constant 0 : index
    %67 = vector.load %arg10[%c0_48, %c0_49] : memref<32x64xbf16, #tpu.memory_space<vmem>>, vector<32x64xbf16>
    %cst_50 = arith.constant dense<0.000000e+00> : vector<128x64xf32>
    %68 = tpu.matmul %66, %67, %cst_50 {dimension_numbers = #tpu.dot_dimension_numbers<[1], [0], [0], [1], [0, 0, 1, 1], [], []>} : vector<128x32xbf16>, vector<32x64xbf16>, vector<128x64xf32> -> vector<128x64xf32>
    %c8_i32_51 = arith.constant 8 : i32
    %69 = arith.muli %arg1, %c8_i32_51 : i32
    %c0_52 = arith.constant 0 : index
    %c0_53 = arith.constant 0 : index
    %c0_54 = arith.constant 0 : index
    %c0_55 = arith.constant 0 : index
    %70 = vector.load %arg3[%c0_52, %c0_53, %c0_54, %c0_55] : memref<1x8x16x64xbf16, #tpu.memory_space<vmem>>, vector<1x8x16x64xbf16>
    %71 = vector.shape_cast %70 : vector<1x8x16x64xbf16> to vector<8x16x64xbf16>
    %72 = arith.extf %71 : vector<8x16x64xbf16> to vector<8x16x64xf32>
    %73 = vector.shape_cast %72 : vector<8x16x64xf32> to vector<128x64xf32>
    %c1_i32_56 = arith.constant 1 : i32
    %74 = arith.addi %69, %c1_i32_56 : i32
    %c0_57 = arith.constant 0 : index
    %75 = arith.index_cast %74 : i32 to index
    %c1_58 = arith.constant 1 : index
    %c0_59 = arith.constant 0 : index
    %76 = vector.load %arg2[%c0_57, %75, %c1_58, %c0_59] : memref<1x18x32x64xbf16, #tpu.memory_space<vmem>>, vector<1x8x16x64xbf16>
    %77 = vector.shape_cast %76 : vector<1x8x16x64xbf16> to vector<8x16x64xbf16>
    %78 = arith.extf %77 : vector<8x16x64xbf16> to vector<8x16x64xf32>
    %79 = vector.shape_cast %78 : vector<8x16x64xf32> to vector<128x64xf32>
    %80 = arith.addf %68, %73 : vector<128x64xf32>
    %c0_60 = arith.constant 0 : index
    %c0_61 = arith.constant 0 : index
    %81 = vector.load %arg11[%c0_60, %c0_61] : memref<1x64xf32, #tpu.memory_space<vmem>>, vector<1x64xf32>
    %82 = vector.broadcast %81 : vector<1x64xf32> to vector<128x64xf32>
    %83 = arith.mulf %80, %82 : vector<128x64xf32>
    %c0_62 = arith.constant 0 : index
    %c0_63 = arith.constant 0 : index
    %84 = vector.load %arg12[%c0_62, %c0_63] : memref<1x64xf32, #tpu.memory_space<vmem>>, vector<1x64xf32>
    %85 = vector.broadcast %84 : vector<1x64xf32> to vector<128x64xf32>
    %86 = arith.addf %83, %85 : vector<128x64xf32>
    %87 = arith.addf %86, %79 : vector<128x64xf32>
    %cst_64 = arith.constant 0.000000e+00 : f32
    %88 = vector.broadcast %cst_64 : f32 to vector<128x64xf32>
    %89 = arith.maximumf %87, %88 : vector<128x64xf32>
    %90 = vector.shape_cast %89 : vector<128x64xf32> to vector<8x16x64xf32>
    %c0_65 = arith.constant 0 : index
    %c0_66 = arith.constant 0 : index
    %c0_67 = arith.constant 0 : index
    %c0_68 = arith.constant 0 : index
    %91 = vector.load %arg13[%c0_65, %c0_66, %c0_67, %c0_68] : memref<1x8x16x64xf32, #tpu.memory_space<vmem>>, vector<1x8x16x64xf32>
    %92 = vector.shape_cast %91 : vector<1x8x16x64xf32> to vector<8x16x64xf32>
    %93 = vector.shape_cast %90 : vector<8x16x64xf32> to vector<1x8x16x64xf32>
    tpu.vector_store %arg13[%c0_65, %c0_66, %c0_67, %c0_68], %93 {strides = array<i32>} : memref<1x8x16x64xf32, #tpu.memory_space<vmem>>, vector<1x8x16x64xf32>,
    return
  }
  func.func @transform_0(%arg0: i32, %arg1: i32) -> (i32, i32, i32, i32) {
    %c0_i32 = arith.constant 0 : i32
    %c0_i32_0 = arith.constant 0 : i32
    %c0_i32_1 = arith.constant 0 : i32
    %c0_i32_2 = arith.constant 0 : i32
    return %arg0, %c0_i32, %c0_i32_0, %c0_i32_1 : i32, i32, i32, i32
  }
  func.func @transform_1(%arg0: i32, %arg1: i32) -> (i32, i32, i32, i32) {
    %c0_i32 = arith.constant 0 : i32
    %c0_i32_0 = arith.constant 0 : i32
    %c0_i32_1 = arith.constant 0 : i32
    return %arg0, %arg1, %c0_i32, %c0_i32_0 : i32, i32, i32, i32
  }
  func.func @transform_2(%arg0: i32, %arg1: i32) -> (i32, i32) {
    %c0_i32 = arith.constant 0 : i32
    %c0_i32_0 = arith.constant 0 : i32
    %c0_i32_1 = arith.constant 0 : i32
    return %c0_i32, %c0_i32_0 : i32, i32
  }
  func.func @transform_3(%arg0: i32, %arg1: i32) -> (i32, i32) {
    %c0_i32 = arith.constant 0 : i32
    %c0_i32_0 = arith.constant 0 : i32
    %c0_i32_1 = arith.constant 0 : i32
    return %c0_i32, %c0_i32_0 : i32, i32
  }
  func.func @transform_4(%arg0: i32, %arg1: i32) -> (i32, i32) {
    %c0_i32 = arith.constant 0 : i32
    %c0_i32_0 = arith.constant 0 : i32
    %c0_i32_1 = arith.constant 0 : i32
    return %c0_i32, %c0_i32_0 : i32, i32
  }
  func.func @transform_5(%arg0: i32, %arg1: i32) -> (i32, i32) {
    %c0_i32 = arith.constant 0 : i32
    %c0_i32_0 = arith.constant 0 : i32
    %c0_i32_1 = arith.constant 0 : i32
    return %c0_i32, %c0_i32_0 : i32, i32
  }
  func.func @transform_6(%arg0: i32, %arg1: i32) -> (i32, i32) {
    %c0_i32 = arith.constant 0 : i32
    %c0_i32_0 = arith.constant 0 : i32
    %c0_i32_1 = arith.constant 0 : i32
    return %c0_i32, %c0_i32_0 : i32, i32
  }
  func.func @transform_7(%arg0: i32, %arg1: i32) -> (i32, i32) {
    %c0_i32 = arith.constant 0 : i32
    %c0_i32_0 = arith.constant 0 : i32
    %c0_i32_1 = arith.constant 0 : i32
    return %c0_i32, %c0_i32_0 : i32, i32
  }
  func.func @transform_8(%arg0: i32, %arg1: i32) -> (i32, i32) {
    %c0_i32 = arith.constant 0 : i32
    %c0_i32_0 = arith.constant 0 : i32
    %c0_i32_1 = arith.constant 0 : i32
    return %c0_i32, %c0_i32_0 : i32, i32
  }
  func.func @transform_9(%arg0: i32, %arg1: i32) -> (i32, i32) {
    %c0_i32 = arith.constant 0 : i32
    %c0_i32_0 = arith.constant 0 : i32
    %c0_i32_1 = arith.constant 0 : i32
    return %c0_i32, %c0_i32_0 : i32, i32
  }
  func.func @transform_10(%arg0: i32, %arg1: i32) -> (i32, i32) {
    %c0_i32 = arith.constant 0 : i32
    %c0_i32_0 = arith.constant 0 : i32
    %c0_i32_1 = arith.constant 0 : i32
    return %c0_i32, %c0_i32_0 : i32, i32
  }
  func.func @transform_11(%arg0: i32, %arg1: i32) -> (i32, i32, i32, i32) {
    %c0_i32 = arith.constant 0 : i32
    %c0_i32_0 = arith.constant 0 : i32
    %c0_i32_1 = arith.constant 0 : i32
    return %arg0, %arg1, %c0_i32, %c0_i32_0 : i32, i32, i32, i32
  }
}

</mosaic_0001>

<bundles_post_ra>
// kernel: bottleneckx_elastic_forward.4
= control target key start
LH: loop header
LB: loop body
LE: loop exit
PB: predicated region body
PF: predicated region fallthrough
CT: control target
= control target key end

     0   :  { %s466_s6 = smov 0   ;;  %s468_s7 = smov 0   ;;  %s521_s0 = inlined_call_operand.vmem [shape: bf16[2,8,2,8,128], index: 0, kind: input, shape index: {}]   ;;  %s522_s1 = inlined_call_operand.vmem [shape: bf16[2,8,8,64], index: 1, kind: output, shape index: {}]  }
   0x1   :  { %s470_s8 = smov 0  }
   0x2 LB: > { %s23_s9 = sadd.s32 1, %s449_s7  ;;  %p358_p0 = scmp.ge.s32.totalorder %s453_s8, 1  ;;  %s453_s8 = sphi %s470_s8, %s11_s8   ;;  %s449_s7 = sphi %s468_s7, %s524_s7   ;;  %s445_s6 = sphi %s466_s6, %s523_s6  }
   0x3   : > { %p25_p1 = scmp.ge.s32.totalorder %s23_s9, 2  ;;  %p109_p2 = scmp.lt.s32.totalorder %s453_s8, 3 }
   0x5   : > { %s526_s9 = smov (%p25_p1, %s23_s9), 0  ;;  %p110_p3 = pnand %p358_p0, %p109_p2 }
   0x6   : > { %p139_p4 = scmp.lt.s32.totalorder (!%p110_p3), %s445_s6, 1  ;;  %s455_s14 = smov (!%p110_p3), 64   ;;  %vm255_vm0 = vcmask (!%p110_p3), 519168  }
   0x7   : > { %113 = sbr.rel (%p110_p3) target bundleno = 156 (0x9c), region = 24 }
   0xe   : > { %s528_s6 = smov (!%p139_p4, %s445_s6), 1 }
   0xf   : > { %s365_s10 = sshll.u32 %s528_s6, 6  ;;  %s366_s15 = sshll.u32 %s528_s6, 5 }
  0x10   : > { %s147_s13 = scalar_lea.vmem %s521_s0, %s365_s10  ;;  %s494_s18 = scalar_lea.vmem %s522_s1, %s366_s15 }
  0x11   : > { %v400_v0 = vld [vmem:[%s147_s13 + $0x10] sm:$0xff]   ;;  %v368_v1 = vld [vmem:[%s147_s13] sm:$0xff]   ;;  %v401_v2 = vld [vmem:[%s147_s13 + $0x18] sm:$0xff]  }
  0x12   : > { %v377_v3 = vunpack.c.l.bf16 %v400_v0  ;;  %v378_v4 = vunpack.c.h.bf16 %v400_v0  ;;  %v369_v5 = vunpack.c.l.bf16 %v368_v1  ;;  %v370_v6 = vunpack.c.h.bf16 %v368_v1  ;;  %v399_v7 = vld [vmem:[%s147_s13 + $0x8] sm:$0xff]   ;;  %v402_v13 = vld [vmem:[%s147_s13 + $0x20] sm:$0xff]   ;;  %v405_v22 = vld [vmem:[%s147_s13 + $0x38] sm:$0xff]  }
  0x13   : > { %v403_v8 = vld [vmem:[%s147_s13 + $0x28] sm:$0xff]   ;;  %v381_v9 = vunpack.c.l.bf16 %v401_v2  ;;  %v382_v10 = vunpack.c.h.bf16 %v401_v2  ;;  %v373_v11 = vunpack.c.l.bf16 %v399_v7  ;;  %v374_v12 = vunpack.c.h.bf16 %v399_v7  ;;  %v404_v23 = vld [vmem:[%s147_s13 + $0x30] sm:$0xff]  }
  0x14   : > { %v193_v14 = vadd.f32 %v378_v4, %v377_v3  ;;  %v191_v15 = vadd.f32 %v370_v6, %v369_v5  ;;  %v389_v16 = vunpack.c.l.bf16 %v403_v8  ;;  %v390_v17 = vunpack.c.h.bf16 %v403_v8 }
  0x15   : > { %v194_v18 = vadd.f32 %v382_v10, %v381_v9  ;;  %v192_v19 = vadd.f32 %v374_v12, %v373_v11  ;;  %v385_v20 = vunpack.c.l.bf16 %v402_v13  ;;  %v386_v21 = vunpack.c.h.bf16 %v402_v13 }
  0x16   : > { %211 = vrot.lane.b32.xlu1 %v193_v14, %s455_s14  ;;  %207 = vrot.lane.b32.xlu0 %v191_v15, %s455_s14  ;;  %v196_v24 = vadd.f32 %v390_v17, %v389_v16  ;;  %v397_v25 = vunpack.c.l.bf16 %v405_v22  ;;  %v398_v27 = vunpack.c.h.bf16 %v405_v22  ;;  %v393_v28 = vunpack.c.l.bf16 %v404_v23 }
  0x17   : > { %v195_v26 = vadd.f32 %v386_v21, %v385_v20  ;;  %v394_v29 = vunpack.c.h.bf16 %v404_v23 }
  0x18   : > { %v198_v30 = vadd.f32 %v398_v27, %v397_v25 }
  0x19   : > { %v197_v31 = vadd.f32 %v394_v29, %v393_v28 }
  0x1a   : > { %213 = vrot.lane.b32.xlu1 %v194_v18, %s455_s14  ;;  %209 = vrot.lane.b32.xlu0 %v192_v19, %s455_s14 }
  0x1e   : > { %217 = vrot.lane.b32.xlu1 %v196_v24, %s455_s14  ;;  %215 = vrot.lane.b32.xlu0 %v195_v26, %s455_s14 }
  0x22   : > { %221 = vrot.lane.b32.xlu1 %v198_v30, %s455_s14  ;;  %219 = vrot.lane.b32.xlu0 %v197_v31, %s455_s14 }
  0x88   : > { %v212_v32 = vpop.permute.xlu1 %211  ;;  %v208_v33 = vpop.permute.xlu0 %207 }
  0x89   : > { %v233_v34 = vadd.f32 %v212_v32, %v193_v14  ;;  %v231_v35 = vadd.f32 %v208_v33, %v191_v15 }
  0x8b   : > { %v241_v36 = vmul.f32 0.25, %v233_v34  ;;  %v239_v37 = vmul.f32 0.25, %v231_v35 }
  0x8c   : > { %v214_v38 = vpop.permute.xlu1 %213  ;;  %v210_v39 = vpop.permute.xlu0 %209 }
  0x8d   : > { %v249_v40 = vpack.c.bf16 %v241_v36, %v241_v36  ;;  %v247_v41 = vpack.c.bf16 %v239_v37, %v239_v37  ;;  %v234_v42 = vadd.f32 %v214_v38, %v194_v18  ;;  %v232_v43 = vadd.f32 %v210_v39, %v192_v19 }
  0x8f   : > { %258 = vst.msk [vmem:[%s494_s18 + $0x8] sm:$0xf] %vm255_vm0, %v249_v40  ;;  %256 = vst.msk [vmem:[%s494_s18] sm:$0xf] %vm255_vm0, %v247_v41  ;;  %v242_v44 = vmul.f32 0.25, %v234_v42  ;;  %v240_v45 = vmul.f32 0.25, %v232_v43 }
  0x90   : > { %v218_v46 = vpop.permute.xlu1 %217  ;;  %v216_v47 = vpop.permute.xlu0 %215 }
  0x91   : > { %v250_v48 = vpack.c.bf16 %v242_v44, %v242_v44  ;;  %v248_v49 = vpack.c.bf16 %v240_v45, %v240_v45  ;;  %v236_v50 = vadd.f32 %v218_v46, %v196_v24  ;;  %v235_v51 = vadd.f32 %v216_v47, %v195_v26 }
  0x93   : > { %259 = vst.msk [vmem:[%s494_s18 + $0xc] sm:$0xf] %vm255_vm0, %v250_v48  ;;  %257 = vst.msk [vmem:[%s494_s18 + $0x4] sm:$0xf] %vm255_vm0, %v248_v49  ;;  %v244_v52 = vmul.f32 0.25, %v236_v50  ;;  %v243_v53 = vmul.f32 0.25, %v235_v51 }
  0x94   : > { %v222_v54 = vpop.permute.xlu1 %221  ;;  %v220_v55 = vpop.permute.xlu0 %219 }
  0x95   : > { %v252_v56 = vpack.c.bf16 %v244_v52, %v244_v52  ;;  %v251_v57 = vpack.c.bf16 %v243_v53, %v243_v53  ;;  %v238_v58 = vadd.f32 %v222_v54, %v198_v30  ;;  %v237_v59 = vadd.f32 %v220_v55, %v197_v31 }
  0x97   : > { %261 = vst.msk [vmem:[%s494_s18 + $0x14] sm:$0xf] %vm255_vm0, %v252_v56  ;;  %260 = vst.msk [vmem:[%s494_s18 + $0x10] sm:$0xf] %vm255_vm0, %v251_v57  ;;  %v246_v60 = vmul.f32 0.25, %v238_v58  ;;  %v245_v61 = vmul.f32 0.25, %v237_v59 }
  0x99   : > { %v254_v62 = vpack.c.bf16 %v246_v60, %v246_v60  ;;  %v253_v63 = vpack.c.bf16 %v245_v61, %v245_v61 }
  0x9b   : > { %263 = vst.msk [vmem:[%s494_s18 + $0x1c] sm:$0xf] %vm255_vm0, %v254_v62  ;;  %262 = vst.msk [vmem:[%s494_s18 + $0x18] sm:$0xf] %vm255_vm0, %v253_v63 }
  0x9c PF: > { %s11_s8 = sadd.s32 1, %s453_s8   ;;  %s523_s6 = smov %s449_s7 }
  0x9d   : > { %p8_p5 = scmp.ge.s32.totalorder %s11_s8, 4   ;;  %s524_s7 = smov %s526_s9 }
  0x9f   :  { %10 = sbr.rel (!%p8_p5) target bundleno = 2 (0x2), region = 54 }

// kernel: bottleneckx_elastic_forward.6
= control target key start
LH: loop header
LB: loop body
LE: loop exit
PB: predicated region body
PF: predicated region fallthrough
CT: control target
= control target key end

     0   :  { %s992_s6 = smov 0   ;;  %s994_s7 = smov 0   ;;  %s1532_s0 = inlined_call_operand.vmem [shape: bf16[2,10,10,64], index: 0, kind: input, shape index: {}]   ;;  %s1533_s1 = inlined_call_operand.vmem [shape: bf16[2,16,8,128], index: 1, kind: output, shape index: {}]  }
   0x1   :  { %s996_s8 = smov 0  }
   0x2 LB: > { %s23_s9 = sadd.s32 1, %s975_s7  ;;  %p837_p0 = scmp.ge.s32.totalorder %s979_s8, 1  ;;  %s979_s8 = sphi %s996_s8, %s11_s8   ;;  %s975_s7 = sphi %s994_s7, %s1586_s7   ;;  %s971_s6 = sphi %s992_s6, %s1585_s6  }
   0x3   : > { %p25_p1 = scmp.ge.s32.totalorder %s23_s9, 2  ;;  %p101_p2 = scmp.lt.s32.totalorder %s979_s8, 3 }
   0x5   : > { %s1588_s9 = smov (%p25_p1, %s23_s9), 0  ;;  %p102_p3 = pnand %p837_p0, %p101_p2 }
   0x7   : > { %105 = sbr.rel (%p102_p3) target bundleno = 226 (0xe2), region = 24 }
   0xe   : > { %p125_p4 = scmp.lt.s32.totalorder %s971_s6, 1  ;;  %vm292_vm0 = vcmask 1046528   ;;  %s981_s14 = smov 64   ;;  %vm477_vm1 = vcmask 523264  }
  0x10   : > { %s1590_s6 = smov (!%p125_p4, %s971_s6), 1 }
  0x11   : > { %s891_s10 = smul.u32 80, %s1590_s6  ;;  %s843_s15 = sshll.u32 %s1590_s6, 6 }
  0x12   : > { %s1493_s18 = scalar_lea.vmem %s1533_s1, %s843_s15 }
  0x13   : > { %s1016_s13 = scalar_lea.vmem %s1532_s0, %s891_s10 }
  0x14   : > { %v1019_v0 = vld [vmem:[%s1016_s13 + $0x20] ss:$8 sps:$4 sm:$0xff]   ;;  %v1022_v1 = vld [vmem:[%s1016_s13 + $0x24] sm:$0x1]  ;;  %v155_v2 = vld [vmem:[%s1016_s13 + $0x2c] sm:$0x1] }
  0x15   : > { %v1026_v3 = vld [vmem:[%s1016_s13] ss:$48 sps:$4 sm:$0xff]   ;;  %v1029_v4 = vld [vmem:[%s1016_s13 + $0x34] sm:$0x1]  ;;  %v172_v5 = vunpack.c.l.bf16 %v1019_v0  ;;  %v1536_v6 = vunpack.c.l.bf16 %v1022_v1  ;;  %v174_v7 = vunpack.c.h.bf16 %v1019_v0  ;;  %v175_v8 = vunpack.c.l.bf16 %v155_v2  ;;  %v145_v9 = vld [vmem:[%s1016_s13 + $0x4] sm:$0x1] }
  0x16   : > { %v176_v10 = vunpack.c.h.bf16 %v1026_v3  ;;  %v177_v11 = vunpack.c.l.bf16 %v1029_v4  ;;  %v1038_v12 = vld [vmem:[%s1016_s13 + $0x8] ss:$8 sps:$4 sm:$0xff]   ;;  %v147_v13 = vld [vmem:[%s1016_s13 + $0xc] sm:$0x1]  ;;  %v164_v14 = vunpack.c.l.bf16 %v1026_v3  ;;  %v165_v15 = vunpack.c.l.bf16 %v145_v9  ;;  %v1067_v24 = vld [vmem:[%s1016_s13 + $0x14] sm:$0x1] }
  0x17   : > { %v1044_v16 = vmul.f32 0.25, %v172_v5  ;;  %v1048_v17 = vmul.f32 0.25, %v1536_v6  ;;  %v1050_v18 = vmul.f32 0.25, %v174_v7  ;;  %v1052_v19 = vmul.f32 0.25, %v175_v8 }
  0x18   : > { %v1054_v20 = vmul.f32 0.75, %v174_v7  ;;  %v1056_v21 = vmul.f32 0.75, %v175_v8  ;;  %v1060_v22 = vmul.f32 0.75, %v176_v10  ;;  %v1064_v23 = vmul.f32 0.75, %v177_v11 }
  0x19   : > { %v166_v25 = vunpack.c.l.bf16 %v1038_v12  ;;  %v167_v26 = vunpack.c.l.bf16 %v147_v13  ;;  %v168_v31 = vunpack.c.h.bf16 %v1038_v12  ;;  %v169_v32 = vunpack.c.l.bf16 %v1067_v24 }
  0x1a   : > { %v224_v27 = vadd.f32 %v1054_v20, %v1044_v16  ;;  %v225_v28 = vadd.f32 %v1056_v21, %v1048_v17  ;;  %v226_v29 = vadd.f32 %v1060_v22, %v1050_v18  ;;  %v227_v30 = vadd.f32 %v1064_v23, %v1052_v19 }
  0x1b   : > { %v184_v33 = vmul.f32 0.25, %v164_v14  ;;  %v185_v34 = vmul.f32 0.25, %v165_v15  ;;  %v186_v38 = vmul.f32 0.25, %v166_v25  ;;  %v187_v46 = vmul.f32 0.25, %v167_v26 }
  0x1c   : > { %v1080_v35 = vmul.f32 0.25, %v224_v27  ;;  %v1082_v36 = vmul.f32 0.25, %v226_v29  ;;  %v1084_v37 = vmul.f32 0.75, %v224_v27  ;;  %v1086_v39 = vmul.f32 0.75, %v225_v28 }
  0x1d   : > { %v1088_v40 = vmul.f32 0.75, %v227_v30  ;;  %v337_v41 = vmul.f32 0.25, %v225_v28  ;;  %v338_v42 = vmul.f32 0.25, %v227_v30  ;;  %v1090_v43 = vmul.f32 0.75, %v226_v29  ;;  %v1129_v29 = vld [vmem:[%s1016_s13 + $0x38] ss:$8 sps:$4 sm:$0xff]  }
  0x1e   : > { %1543 = vst [vmem:[#allocation2_spill] sm:$0xff] %v1080_v35  ;;  %1544 = vst [vmem:[#allocation3_spill] sm:$0xff] %v1082_v36  ;;  %v369_v44 = vrot.slane %v1080_v35, 1  ;;  %v372_v45 = vrot.slane %v1082_v36, 1  ;;  %v1096_v51 = vmul.f32 0.75, %v166_v25  ;;  %v1098_v52 = vmul.f32 0.75, %v167_v26 }
  0x1f   : > { %v370_v49 = vrot.slane %v337_v41, 1  ;;  %v373_v50 = vrot.slane %v338_v42, 1  ;;  %v1102_v53 = vmul.f32 0.75, %v168_v31  ;;  %v1106_v54 = vmul.f32 0.75, %v169_v32  ;;  %v159_v41 = vld [vmem:[%s1016_s13 + $0x3c] sm:$0x1] }
  0x20   : > { %v216_v61 = vadd.f32 %v1096_v51, %v184_v33  ;;  %v217_v62 = vadd.f32 %v1098_v52, %v185_v34  ;;  %v1137_v42 = vld [vmem:[%s1016_s13 + $0x44] sm:$0x1]  ;;  %v206_v24 = vmul.f32 0.75, %v172_v5  ;;  %v1549_v35 = vunpack.c.l.bf16 %v1022_v1 }
  0x21   : > { %v371_v55 = vsel %vm292_vm0, %v369_v44, %v370_v49  ;;  %v374_v56 = vsel %vm292_vm0, %v372_v45, %v373_v50  ;;  %v406_v57 = vadd.f32 %v370_v49, %v1086_v39  ;;  %v408_v58 = vadd.f32 %v373_v50, %v1088_v40 }
  0x22   : > { %v405_v59 = vadd.f32 %v371_v55, %v1084_v37  ;;  %v407_v60 = vadd.f32 %v374_v56, %v1090_v43  ;;  %v218_v8 = vadd.f32 %v1102_v53, %v186_v38  ;;  %v219_v14 = vadd.f32 %v1106_v54, %v187_v46 }
  0x23   : > { %v442_v2 = vrot.slane %v406_v57, 1  ;;  %v445_v7 = vrot.slane %v408_v58, 1  ;;  %v1119_v15 = vmul.f32 0.25, %v216_v61  ;;  %v1124_v27 = vmul.f32 0.75, %v216_v61 }
  0x24   : > { %v441_v9 = vrot.slane %v405_v59, 1  ;;  %v444_v13 = vrot.slane %v407_v60, 1  ;;  %v1122_v26 = vmul.f32 0.25, %v218_v8  ;;  %v1126_v28 = vmul.f32 0.75, %v217_v62 }
  0x25   : > { %v1133_v34 = vmul.f32 0.75, %v218_v8  ;;  %v333_v38 = vmul.f32 0.25, %v217_v62  ;;  %v1139_v45 = vmul.f32 0.75, %v219_v14  ;;  %v334_v50 = vmul.f32 0.25, %v219_v14 }
  0x26   : > { %v443_v30 = vsel %vm292_vm0, %v441_v9, %v442_v2  ;;  %v446_v33 = vsel %vm292_vm0, %v444_v13, %v445_v7  ;;  %v357_v55 = vrot.slane %v1119_v15, 1  ;;  %v360_v57 = vrot.slane %v1122_v26, 1 }
  0x27   : > { %v927_v44 = vpack.i.bf16 %v446_v33, %v443_v30  ;;  %v358_v56 = vrot.slane %v333_v38, 1  ;;  %v178_v58 = vunpack.c.l.bf16 %v1129_v29  ;;  %v179_v59 = vunpack.c.l.bf16 %v159_v41 }
  0x28   : > { %v1535_v60 = vunpack.c.h.bf16 %v1129_v29  ;;  %v1534_v61 = vunpack.c.l.bf16 %v1137_v42  ;;  %v361_v2 = vrot.slane %v334_v50, 1  ;;  %v1153_v8 = vmul.f32 0.25, %v176_v10 }
  0x29   : > { %928 = vrot.lane.b32.xlu1 %v927_v44, %s981_s14  ;;  %v359_v62 = vsel %vm292_vm0, %v357_v55, %v358_v56  ;;  %v398_v7 = vadd.f32 %v358_v56, %v1126_v28  ;;  %v1158_v13 = vmul.f32 0.25, %v177_v11  ;;  %v1160_v14 = vmul.f32 0.25, %v178_v58  ;;  %v1176_v11 = vld [vmem:[%s1016_s13 + $0x18] ss:$48 sps:$4 sm:$0xff]  }
  0x2a   : > { %v397_v9 = vadd.f32 %v359_v62, %v1124_v27  ;;  %v1162_v30 = vmul.f32 0.25, %v179_v59  ;;  %v362_v33 = vsel %vm292_vm0, %v360_v57, %v361_v2  ;;  %v400_v38 = vadd.f32 %v361_v2, %v1139_v45  ;;  %v151_v62 = vld [vmem:[%s1016_s13 + $0x1c] sm:$0x1] }
  0x2b   : > { %v430_v41 = vrot.slane %v398_v7, 1  ;;  %v1166_v44 = vmul.f32 0.75, %v178_v58  ;;  %v399_v3 = vadd.f32 %v362_v33, %v1133_v34  ;;  %v1169_v50 = vmul.f32 0.75, %v179_v59 }
  0x2c   : > { %v429_v10 = vrot.slane %v397_v9, 1  ;;  %v1173_v4 = vmul.f32 0.75, %v1535_v60  ;;  %v433_v56 = vrot.slane %v400_v38, 1  ;;  %v1181_v57 = vmul.f32 0.75, %v1534_v61 }
  0x2d   : > { %v228_v58 = vadd.f32 %v1166_v44, %v1153_v8  ;;  %v432_v2 = vrot.slane %v399_v3, 1  ;;  %v229_v7 = vadd.f32 %v1169_v50, %v1158_v13  ;;  %v170_v46 = vunpack.c.l.bf16 %v1176_v11 }
  0x2e   : > { %v431_v59 = vsel %vm292_vm0, %v429_v10, %v430_v41  ;;  %v230_v9 = vadd.f32 %v1173_v4, %v1160_v14  ;;  %v231_v38 = vadd.f32 %v1181_v57, %v1162_v30  ;;  %v171_v3 = vunpack.c.l.bf16 %v151_v62 }
  0x2f   : > { %v1194_v55 = vmul.f32 0.25, %v228_v58  ;;  %v434_v49 = vsel %vm292_vm0, %v432_v2, %v433_v56  ;;  %v1200_v41 = vmul.f32 0.75, %v228_v58  ;;  %v1202_v25 = vmul.f32 0.75, %v229_v7 }
  0x30   : > { %v1198_v63 = vmul.f32 0.25, %v230_v9  ;;  %v917_v10 = vpack.i.bf16 %v434_v49, %v431_v59  ;;  %v1204_v47 = vmul.f32 0.75, %v230_v9  ;;  %v339_v33 = vmul.f32 0.25, %v229_v7 }
  0x31   : > { %1545 = vst [vmem:[#allocation4_spill] sm:$0xff] %v1194_v55  ;;  %1547 = vst [vmem:[#allocation6_spill] sm:$0xff] %v1200_v41  ;;  %v1206_v48 = vmul.f32 0.75, %v231_v38  ;;  %v340_v60 = vmul.f32 0.25, %v231_v38  ;;  %v375_v6 = vrot.slane %v1194_v55, 1  ;;  %v188_v49 = vmul.f32 0.25, %v168_v31 }
  0x32   : > { %1546 = vst [vmem:[#allocation5_spill] sm:$0xff] %v1198_v63  ;;  %1548 = vst [vmem:[#allocation7_spill] sm:$0xff] %v1204_v47  ;;  %918 = vrot.lane.b32.xlu0 %v917_v10, %s981_s14  ;;  %v376_v58 = vrot.slane %v339_v33, 1  ;;  %v378_v62 = vrot.slane %v1198_v63, 1  ;;  %v1217_v2 = vmul.f32 0.25, %v169_v32  ;;  %v1219_v7 = vmul.f32 0.25, %v170_v46 }
  0x33   : > { %v379_v59 = vrot.slane %v340_v60, 1  ;;  %v1221_v9 = vmul.f32 0.25, %v171_v3  ;;  %v204_v61 = vmul.f32 0.75, %v170_v46  ;;  %v205_v33 = vmul.f32 0.75, %v171_v3 }
  0x34   : > { %v377_v38 = vsel %vm292_vm0, %v375_v6, %v376_v58  ;;  %v410_v10 = vadd.f32 %v376_v58, %v1202_v25  ;;  %v207_v36 = vmul.f32 0.75, %v1549_v35  ;;  %v222_v3 = vadd.f32 %v206_v24, %v1219_v7 }
  0x35   : > { %v380_v56 = vsel %vm292_vm0, %v378_v62, %v379_v59  ;;  %v409_v12 = vadd.f32 %v377_v38, %v1200_v41  ;;  %v412_v31 = vadd.f32 %v379_v59, %v1206_v48  ;;  %v220_v6 = vadd.f32 %v204_v61, %v188_v49 }
  0x36   : > { %v411_v32 = vadd.f32 %v380_v56, %v1204_v47  ;;  %v448_v60 = vrot.slane %v410_v10, 1  ;;  %v221_v46 = vadd.f32 %v205_v33, %v1217_v2  ;;  %v223_v59 = vadd.f32 %v207_v36, %v1221_v9 }
  0x37   : > { %v447_v63 = vrot.slane %v409_v12, 1  ;;  %v451_v58 = vrot.slane %v412_v31, 1  ;;  %v1237_v0 = vmul.f32 0.25, %v220_v6  ;;  %v1241_v1 = vmul.f32 0.25, %v222_v3 }
  0x38   : > { %v450_v38 = vrot.slane %v411_v32, 1  ;;  %v1243_v35 = vmul.f32 0.75, %v220_v6  ;;  %v1246_v12 = vmul.f32 0.75, %v221_v46  ;;  %v1248_v31 = vmul.f32 0.75, %v222_v3 }
  0x39   : > { %v449_v56 = vsel %vm292_vm0, %v447_v63, %v448_v60  ;;  %v335_v62 = vmul.f32 0.25, %v221_v46  ;;  %v1250_v55 = vmul.f32 0.75, %v223_v59  ;;  %v336_v41 = vmul.f32 0.25, %v223_v59 }
  0x3a   : > { %v452_v10 = vsel %vm292_vm0, %v450_v38, %v451_v58  ;;  %v363_v63 = vrot.slane %v1237_v0, 1  ;;  %v366_v6 = vrot.slane %v1241_v1, 1  ;;  %v240_v46 = vadd.f32 %v204_v61, %v1044_v16 }
  0x3b   : > { %v932_v32 = vpack.i.bf16 %v452_v10, %v449_v56  ;;  %v364_v60 = vrot.slane %v335_v62, 1  ;;  %v367_v3 = vrot.slane %v336_v41, 1  ;;  %v242_v38 = vadd.f32 %v206_v24, %v1050_v18 }
  0x3c   : > { %v241_v47 = vadd.f32 %v205_v33, %v1048_v17  ;;  %v243_v41 = vadd.f32 %v207_v36, %v1052_v19  ;;  %v1269_v18 = vmul.f32 0.25, %v240_v46  ;;  %v236_v24 = vadd.f32 %v1096_v51, %v188_v49 }
  0x3d   : > { %933 = vrot.lane.b32.xlu1 %v932_v32, %s981_s14  ;;  %v365_v59 = vsel %vm292_vm0, %v363_v63, %v364_v60  ;;  %v402_v10 = vadd.f32 %v364_v60, %v1246_v12  ;;  %v368_v62 = vsel %vm292_vm0, %v366_v6, %v367_v3  ;;  %v404_v32 = vadd.f32 %v367_v3, %v1250_v55 }
  0x3e   : > { %v401_v5 = vadd.f32 %v365_v59, %v1243_v35  ;;  %v403_v16 = vadd.f32 %v368_v62, %v1248_v31  ;;  %v1272_v60 = vmul.f32 0.25, %v242_v38  ;;  %v1274_v17 = vmul.f32 0.75, %v240_v46 }
  0x3f   : > { %v436_v61 = vrot.slane %v402_v10, 1  ;;  %v439_v58 = vrot.slane %v404_v32, 1  ;;  %v1276_v6 = vmul.f32 0.75, %v241_v47  ;;  %v1278_v59 = vmul.f32 0.75, %v242_v38 }
  0x40   : > { %v435_v63 = vrot.slane %v401_v5, 1  ;;  %v438_v33 = vrot.slane %v403_v16, 1  ;;  %v568_v3 = vmul.f32 0.25, %v241_v47  ;;  %v1281_v36 = vmul.f32 0.75, %v243_v41 }
  0x41   : > { %v569_v62 = vmul.f32 0.25, %v243_v41  ;;  %v596_v5 = vrot.slane %v1269_v18, 1  ;;  %v599_v38 = vrot.slane %v1272_v60, 1  ;;  %v237_v41 = vadd.f32 %v1098_v52, %v1217_v2 }
  0x42   : > { %v437_v19 = vsel %vm292_vm0, %v435_v63, %v436_v61  ;;  %v440_v51 = vsel %vm292_vm0, %v438_v33, %v439_v58  ;;  %v597_v46 = vrot.slane %v568_v3, 1  ;;  %v238_v58 = vadd.f32 %v1102_v53, %v1219_v7 }
  0x43   : > { %v922_v32 = vpack.i.bf16 %v440_v51, %v437_v19  ;;  %v600_v47 = vrot.slane %v569_v62, 1  ;;  %v239_v62 = vadd.f32 %v1106_v54, %v1221_v9  ;;  %v1303_v2 = vmul.f32 0.25, %v236_v24  ;;  %v163_v51 = vld [vmem:[%s1016_s13 + $0x4c] sm:$0x1] }
  0x44   : > { %v598_v61 = vsel %vm292_vm0, %v596_v5, %v597_v46  ;;  %v635_v63 = vadd.f32 %v597_v46, %v1276_v6  ;;  %v1305_v46 = vmul.f32 0.25, %v238_v58  ;;  %v566_v54 = vmul.f32 0.25, %v237_v41 }
  0x45   : > { %923 = vrot.lane.b32.xlu0 %v922_v32, %s981_s14  ;;  %v601_v33 = vsel %vm292_vm0, %v599_v38, %v600_v47  ;;  %v634_v3 = vadd.f32 %v598_v61, %v1274_v17  ;;  %v637_v19 = vadd.f32 %v600_v47, %v1281_v36  ;;  %v1307_v32 = vmul.f32 0.75, %v236_v24 }
  0x46   : > { %v636_v5 = vadd.f32 %v601_v33, %v1278_v59  ;;  %v669_v52 = vrot.slane %v635_v63, 1  ;;  %v1309_v61 = vmul.f32 0.75, %v237_v41  ;;  %v1311_v47 = vmul.f32 0.75, %v238_v58 }
  0x47   : > { %v668_v53 = vrot.slane %v634_v3, 1  ;;  %v672_v7 = vrot.slane %v637_v19, 1  ;;  %v1314_v16 = vmul.f32 0.75, %v239_v62  ;;  %v567_v33 = vmul.f32 0.25, %v239_v62 }
  0x48   : > { %v671_v38 = vrot.slane %v636_v5, 1  ;;  %v590_v24 = vrot.slane %v1303_v2, 1  ;;  %v591_v5 = vrot.slane %v566_v54, 1  ;;  %v593_v58 = vrot.slane %v1305_v46, 1 }
  0x49   : > { %v670_v9 = vsel %vm292_vm0, %v668_v53, %v669_v52  ;;  %v594_v49 = vrot.slane %v567_v33, 1  ;;  %v182_v41 = vunpack.c.h.bf16 %v1176_v11  ;;  %v183_v63 = vunpack.c.l.bf16 %v163_v51 }
  0x4a   : > { %v673_v3 = vsel %vm292_vm0, %v671_v38, %v672_v7  ;;  %v592_v52 = vsel %vm292_vm0, %v590_v24, %v591_v5  ;;  %v631_v53 = vadd.f32 %v591_v5, %v1309_v61  ;;  %v1550_v62 = vunpack.c.h.bf16 %v1129_v29 }
  0x4b   : > { %v942_v10 = vpack.i.bf16 %v673_v3, %v670_v9  ;;  %v595_v7 = vsel %vm292_vm0, %v593_v58, %v594_v49  ;;  %v630_v38 = vadd.f32 %v592_v52, %v1307_v32  ;;  %v633_v54 = vadd.f32 %v594_v49, %v1314_v16 }
  0x4c   : > { %v232_v56 = vmul.f32 0.25, %v1550_v62  ;;  %v1551_v9 = vunpack.c.l.bf16 %v1137_v42  ;;  %v632_v11 = vadd.f32 %v595_v7, %v1311_v47  ;;  %v663_v3 = vrot.slane %v631_v53, 1 }
  0x4d   : > { %943 = vrot.lane.b32.xlu1 %v942_v10, %s981_s14  ;;  %v234_v24 = vmul.f32 0.25, %v182_v41  ;;  %v235_v5 = vmul.f32 0.25, %v183_v63  ;;  %v662_v51 = vrot.slane %v630_v38, 1  ;;  %v666_v19 = vrot.slane %v633_v54, 1 }
  0x4e   : > { %v233_v33 = vmul.f32 0.25, %v1551_v9  ;;  %v248_v29 = vadd.f32 %v232_v56, %v1166_v44  ;;  %v665_v62 = vrot.slane %v632_v11, 1  ;;  %v530_v42 = vrot.slane %v1314_v16, 1 }
  0x4f   : > { %v250_v52 = vadd.f32 %v234_v24, %v1173_v4  ;;  %v251_v49 = vadd.f32 %v235_v5, %v1181_v57  ;;  %v664_v7 = vsel %vm292_vm0, %v662_v51, %v663_v3  ;;  %v244_v63 = vadd.f32 %v1054_v20, %v1153_v8 }
  0x50   : > { %v249_v10 = vadd.f32 %v233_v33, %v1169_v50  ;;  %v1341_v53 = vmul.f32 0.25, %v248_v29  ;;  %v667_v44 = vsel %vm292_vm0, %v665_v62, %v666_v19  ;;  %v1348_v50 = vmul.f32 0.75, %v248_v29 }
  0x51   : > { %v1346_v56 = vmul.f32 0.25, %v250_v52  ;;  %v937_v4 = vpack.i.bf16 %v667_v44, %v664_v7  ;;  %v1352_v38 = vmul.f32 0.75, %v250_v52  ;;  %v1354_v57 = vmul.f32 0.75, %v251_v49 }
  0x52   : > { %v1350_v41 = vmul.f32 0.75, %v249_v10  ;;  %v572_v54 = vmul.f32 0.25, %v249_v10  ;;  %v573_v11 = vmul.f32 0.25, %v251_v49  ;;  %v608_v20 = vrot.slane %v1341_v53, 1 }
  0x53   : > { %938 = vrot.lane.b32.xlu0 %v937_v4, %s981_s14  ;;  %v611_v3 = vrot.slane %v1346_v56, 1  ;;  %v246_v24 = vadd.f32 %v1060_v22, %v1160_v14  ;;  %v245_v29 = vadd.f32 %v1056_v21, %v1158_v13  ;;  %v247_v10 = vadd.f32 %v1064_v23, %v1162_v30 }
  0x54   : > { %v609_v19 = vrot.slane %v572_v54, 1  ;;  %v612_v51 = vrot.slane %v573_v11, 1  ;;  %v1371_v49 = vmul.f32 0.25, %v244_v63  ;;  %v1373_v7 = vmul.f32 0.75, %v244_v63 }
  0x55   : > { %v1378_v4 = vmul.f32 0.25, %v246_v24  ;;  %v503_v23 = vmul.f32 0.75, %v245_v29  ;;  %v504_v30 = vmul.f32 0.75, %v246_v24  ;;  %v570_v5 = vmul.f32 0.25, %v245_v29 }
  0x56   : > { %v610_v62 = vsel %vm292_vm0, %v608_v20, %v609_v19  ;;  %v643_v52 = vadd.f32 %v609_v19, %v1350_v41  ;;  %v613_v44 = vsel %vm292_vm0, %v611_v3, %v612_v51  ;;  %v645_v14 = vadd.f32 %v612_v51, %v1354_v57 }
  0x57   : > { %v642_v22 = vadd.f32 %v610_v62, %v1348_v50  ;;  %v644_v21 = vadd.f32 %v613_v44, %v1352_v38  ;;  %v505_v20 = vmul.f32 0.75, %v247_v10  ;;  %v538_v19 = vrot.slane %v1373_v7, 1 }
  0x58   : > { %v681_v13 = vrot.slane %v643_v52, 1  ;;  %v684_v11 = vrot.slane %v645_v14, 1  ;;  %v539_v8 = vrot.slane %v503_v23, 1  ;;  %v571_v3 = vmul.f32 0.25, %v247_v10 }
  0x59   : > { %v680_v54 = vrot.slane %v642_v22, 1  ;;  %v683_v63 = vrot.slane %v644_v21, 1  ;;  %v602_v51 = vrot.slane %v1371_v49, 1  ;;  %v605_v9 = vrot.slane %v1378_v4, 1 }
  0x5a   : > { %v1552_v44 = vrot.slane %v1086_v39, 1  ;;  %v1553_v52 = vrot.slane %v1084_v37, 1  ;;  %v603_v14 = vrot.slane %v570_v5, 1  ;;  %v606_v21 = vrot.slane %v571_v3, 1 }
  0x5b   : > { %v682_v62 = vsel %vm292_vm0, %v680_v54, %v681_v13  ;;  %v685_v22 = vsel %vm292_vm0, %v683_v63, %v684_v11  ;;  %v1554_v29 = vrot.slane %v1088_v40, 1  ;;  %v1555_v10 = vrot.slane %v1090_v43, 1 }
  0x5c   : > { %v1390_v24 = vsel %vm292_vm0, %v1553_v52, %v1552_v44  ;;  %v952_v54 = vpack.i.bf16 %v685_v22, %v682_v62  ;;  %v541_v33 = vrot.slane %v504_v30, 1  ;;  %v542_v58 = vrot.slane %v505_v20, 1 }
  0x5d   : > { %v1398_v13 = vsel %vm292_vm0, %v1555_v10, %v1554_v29  ;;  %v1556_v39 = vrot.slane %v1126_v28, 1  ;;  %v1557_v37 = vrot.slane %v1124_v27, 1  ;;  %v604_v11 = vsel %vm292_vm0, %v602_v51, %v603_v14 }
  0x5e   : > { %v607_v5 = vsel %vm292_vm0, %v605_v9, %v606_v21  ;;  %v639_v63 = vadd.f32 %v603_v14, %v503_v23  ;;  %v641_v40 = vadd.f32 %v606_v21, %v505_v20  ;;  %953 = vrot.lane.b32.xlu1 %v952_v54, %s981_s14  ;;  %v638_v43 = vadd.f32 %v604_v11, %v1373_v7  ;;  %v1561_v23 = vld [vmem:[#allocation6_spill] sm:$0xff]  ;;  %v1564_v21 = vld [vmem:[#allocation7_spill] sm:$0xff]  ;;  %v1566_v54 = vld [vmem:[#allocation4_spill] sm:$0xff] }
  0x5f   : > { %v295_v44 = vsel %vm292_vm0, %v1557_v37, %v1556_v39  ;;  %v640_v3 = vadd.f32 %v607_v5, %v504_v30  ;;  %v1558_v62 = vrot.slane %v1139_v45, 1  ;;  %v1559_v52 = vrot.slane %v1133_v34, 1  ;;  %v1567_v39 = vld [vmem:[#allocation5_spill] sm:$0xff] }
  0x60   : > { %v325_v27 = vadd.f32 %v295_v44, %v1119_v15  ;;  %v675_v22 = vrot.slane %v639_v63, 1  ;;  %v678_v29 = vrot.slane %v641_v40, 1  ;;  %v1560_v9 = vrot.slane %v1202_v25, 1 }
  0x61   : > { %v298_v28 = vsel %vm292_vm0, %v1559_v52, %v1558_v62  ;;  %v1562_v20 = vrot.slane %v1561_v23, 1  ;;  %v674_v7 = vrot.slane %v638_v43, 1  ;;  %v677_v30 = vrot.slane %v640_v3, 1 }
  0x62   : > { %v326_v51 = vadd.f32 %v298_v28, %v1122_v26  ;;  %v1563_v45 = vrot.slane %v1206_v48, 1  ;;  %v1565_v34 = vrot.slane %v1564_v21, 1  ;;  %v1568_v25 = vrot.slane %v1246_v12, 1 }
  0x63   : > { %v313_v14 = vsel %vm292_vm0, %v1562_v20, %v1560_v9  ;;  %v1569_v26 = vrot.slane %v1243_v35, 1  ;;  %v1570_v11 = vrot.slane %v1250_v55, 1  ;;  %v1571_v48 = vrot.slane %v1248_v31, 1 }
  0x64   : > { %v316_v10 = vsel %vm292_vm0, %v1565_v34, %v1563_v45  ;;  %v1427_v15 = vadd.f32 %v313_v14, %v1566_v54  ;;  %v1572_v63 = vrot.slane %v1276_v6, 1  ;;  %v1573_v40 = vrot.slane %v1274_v17, 1 }
  0x65   : > { %v1430_v37 = vadd.f32 %v316_v10, %v1567_v39  ;;  %v301_v44 = vsel %vm292_vm0, %v1569_v26, %v1568_v25  ;;  %v304_v5 = vsel %vm292_vm0, %v1571_v48, %v1570_v11  ;;  %v676_v3 = vsel %vm292_vm0, %v674_v7, %v675_v22 }
  0x66   : > { %v534_v43 = vsel %vm292_vm0, %v1573_v40, %v1572_v63  ;;  %v679_v12 = vsel %vm292_vm0, %v677_v30, %v678_v29  ;;  %v327_v35 = vadd.f32 %v301_v44, %v1237_v0  ;;  %v328_v62 = vadd.f32 %v304_v5, %v1241_v1 }
  0x67   : > { %v947_v52 = vpack.i.bf16 %v679_v12, %v676_v3  ;;  %v1574_v55 = vrot.slane %v1281_v36, 1  ;;  %v1575_v31 = vrot.slane %v1278_v59, 1  ;;  %v560_v6 = vadd.f32 %v534_v43, %v1269_v18 }
  0x68   : > { %v1576_v17 = vrot.slane %v1309_v61, 1  ;;  %v1577_v9 = vrot.slane %v1307_v32, 1  ;;  %v1578_v0 = vrot.slane %v1311_v47, 1  ;;  %v1579_v36 = vrot.slane %v1350_v41, 1 }
  0x69   : > { %v537_v28 = vsel %vm292_vm0, %v1575_v31, %v1574_v55  ;;  %v1580_v18 = vrot.slane %v1348_v50, 1  ;;  %948 = vrot.lane.b32.xlu0 %v947_v52, %s981_s14  ;;  %v1582_v16 = vrot.slane %v1352_v38, 1  ;;  %v543_v50 = vsel %vm292_vm0, %v541_v33, %v542_v58  ;;  %v1583_v31 = vld [vmem:[#allocation3_spill] sm:$0xff] }
  0x6a   : > { %v528_v22 = vsel %vm292_vm0, %v1577_v9, %v1576_v17  ;;  %v561_v29 = vadd.f32 %v537_v28, %v1272_v60  ;;  %v531_v1 = vsel %vm292_vm0, %v1578_v0, %v530_v42  ;;  %v1581_v60 = vrot.slane %v1354_v57, 1  ;;  %v1584_v9 = vld [vmem:[#allocation2_spill] sm:$0xff] }
  0x6b   : > { %v558_v59 = vadd.f32 %v528_v22, %v1303_v2  ;;  %v546_v61 = vsel %vm292_vm0, %v1580_v18, %v1579_v36  ;;  %v559_v32 = vadd.f32 %v531_v1, %v1305_v46  ;;  %v540_v2 = vsel %vm292_vm0, %v538_v19, %v539_v8 }
  0x6c   : > { %v549_v47 = vsel %vm292_vm0, %v1582_v16, %v1581_v60  ;;  %v564_v42 = vadd.f32 %v546_v61, %v1341_v53  ;;  %v562_v23 = vadd.f32 %v540_v2, %v1371_v49  ;;  %v563_v20 = vadd.f32 %v543_v50, %v1378_v4 }
  0x6d   : > { %v565_v41 = vadd.f32 %v549_v47, %v1346_v56  ;;  %v330_v28 = vadd.f32 %v1398_v13, %v1583_v31  ;;  %v329_v22 = vadd.f32 %v1390_v24, %v1584_v9 }
  0x9b   : > { %v929_v14 = vpop.permute.xlu1 %928 }
  0x9c   : > { %v930_v17 = vunpack.i.l.bf16 %v929_v14 }
  0x9e   : > { %v482_v1 = vsel %vm477_vm1, %v329_v22, %v930_v17 }
  0xa4   : > { %v919_v46 = vpop.permute.xlu0 %918 }
  0xa5   : > { %v921_v19 = vunpack.i.h.bf16 %v919_v46  ;;  %v920_v34 = vunpack.i.l.bf16 %v919_v46 }
  0xa7   : > { %v479_v25 = vsel %vm477_vm1, %v326_v51, %v921_v19  ;;  %v478_v26 = vsel %vm477_vm1, %v325_v27, %v920_v34 }
  0xaf   : > { %v934_v7 = vpop.permute.xlu1 %933 }
  0xb0   : > { %v936_v63 = vunpack.i.h.bf16 %v934_v7  ;;  %v935_v40 = vunpack.i.l.bf16 %v934_v7 }
  0xb2   : > { %v485_v51 = vsel %vm477_vm1, %v1430_v37, %v936_v63  ;;  %v484_v27 = vsel %vm477_vm1, %v1427_v15, %v935_v40 }
  0xb7   : > { %v924_v57 = vpop.permute.xlu0 %923 }
  0xb8   : > { %v926_v30 = vunpack.i.h.bf16 %v924_v57  ;;  %v925_v38 = vunpack.i.l.bf16 %v924_v57 }
  0xba   : > { %v481_v8 = vsel %vm477_vm1, %v328_v62, %v926_v30  ;;  %v480_v56 = vsel %vm477_vm1, %v327_v35, %v925_v38 }
  0xbf   : > { %v944_v45 = vpop.permute.xlu1 %943 }
  0xc0   : > { %v946_v21 = vunpack.i.h.bf16 %v944_v45  ;;  %v945_v53 = vunpack.i.l.bf16 %v944_v45 }
  0xc2   : > { %v713_v58 = vsel %vm477_vm1, %v561_v29, %v946_v21  ;;  %v712_v33 = vsel %vm477_vm1, %v560_v6, %v945_v53  ;;  %v931_v6 = vunpack.i.h.bf16 %v929_v14 }
  0xc3   : > { %v857_v49 = vpack.c.bf16 %v712_v33, %v480_v56  ;;  %v862_v4 = vpack.c.bf16 %v713_v58, %v481_v8 }
  0xc4   : > { %v483_v0 = vsel %vm477_vm1, %v330_v28, %v931_v6 }
  0xc5   : > { %885 = vst [vmem:[%s1493_s18 + $0x10] sm:$0xff] %v857_v49   ;;  %886 = vst [vmem:[%s1493_s18 + $0x18] sm:$0xff] %v862_v4   ;;  %v939_v10 = vpop.permute.xlu0 %938 }
  0xc6   : > { %v941_v54 = vunpack.i.h.bf16 %v939_v10  ;;  %v940_v39 = vunpack.i.l.bf16 %v939_v10 }
  0xc8   : > { %v711_v44 = vsel %vm477_vm1, %v559_v32, %v941_v54  ;;  %v710_v11 = vsel %vm477_vm1, %v558_v59, %v940_v39 }
  0xc9   : > { %v847_v48 = vpack.c.bf16 %v710_v11, %v478_v26  ;;  %v852_v5 = vpack.c.bf16 %v711_v44, %v479_v25 }
  0xcb   : > { %848 = vst [vmem:[%s1493_s18] sm:$0xff] %v847_v48   ;;  %884 = vst [vmem:[%s1493_s18 + $0x8] sm:$0xff] %v852_v5  }
  0xd0   : > { %v954_v43 = vpop.permute.xlu1 %953 }
  0xd1   : > { %v956_v3 = vunpack.i.h.bf16 %v954_v43  ;;  %v955_v12 = vunpack.i.l.bf16 %v954_v43 }
  0xd3   : > { %v717_v35 = vsel %vm477_vm1, %v565_v41, %v956_v3  ;;  %v716_v62 = vsel %vm477_vm1, %v564_v42, %v955_v12 }
  0xd4   : > { %v882_v52 = vpack.c.bf16 %v717_v35, %v485_v51  ;;  %v877_v55 = vpack.c.bf16 %v716_v62, %v484_v27 }
  0xd6   : > { %890 = vst [vmem:[%s1493_s18 + $0x38] sm:$0xff] %v882_v52   ;;  %889 = vst [vmem:[%s1493_s18 + $0x30] sm:$0xff] %v877_v55  }
  0xdb   : > { %v949_v37 = vpop.permute.xlu0 %948 }
  0xdc   : > { %v951_v15 = vunpack.i.h.bf16 %v949_v37  ;;  %v950_v29 = vunpack.i.l.bf16 %v949_v37 }
  0xde   : > { %v715_v59 = vsel %vm477_vm1, %v563_v20, %v951_v15  ;;  %v714_v36 = vsel %vm477_vm1, %v562_v23, %v950_v29 }
  0xdf   : > { %v872_v13 = vpack.c.bf16 %v715_v59, %v483_v0  ;;  %v867_v18 = vpack.c.bf16 %v714_v36, %v482_v1 }
  0xe1   : > { %888 = vst [vmem:[%s1493_s18 + $0x28] sm:$0xff] %v872_v13   ;;  %887 = vst [vmem:[%s1493_s18 + $0x20] sm:$0xff] %v867_v18  }
  0xe2 PF: > { %s11_s8 = sadd.s32 1, %s979_s8   ;;  %s1585_s6 = smov %s975_s7 }
  0xe3   : > { %p8_p5 = scmp.ge.s32.totalorder %s11_s8, 4   ;;  %s1586_s7 = smov %s1588_s9 }
  0xe5   :  { %10 = sbr.rel (!%p8_p5) target bundleno = 2 (0x2), region = 55 }

// kernel: bottleneckx_elastic_forward.5
= control target key start
LH: loop header
LB: loop body
LE: loop exit
PB: predicated region body
PF: predicated region fallthrough
CT: control target
= control target key end

     0   :  { %s3403_s0 = inlined_call_operand.hbm [shape: bf16[2,10,16,64], index: 0, kind: input, shape index: {}]   ;;  %s3404_s1 = inlined_call_operand.hbm [shape: bf16[64,32], index: 1, kind: input, shape index: {}]   ;;  %s3405_s2 = inlined_call_operand.hbm [shape: f32[1,32], index: 2, kind: input, shape index: {}]   ;;  %s3406_s3 = inlined_call_operand.hbm [shape: f32[1,32], index: 3, kind: input, shape index: {}]   ;;  %s3407_s4 = inlined_call_operand.hbm [shape: bf16[288,32], index: 4, kind: input, shape index: {}]   ;;  %s3408_s5 = inlined_call_operand.hbm [shape: f32[1,32], index: 5, kind: input, shape index: {}]   ;;  %s3409_s6 = inlined_call_operand.hbm [shape: f32[1,32], index: 6, kind: input, shape index: {}]   ;;  %s3410_s7 = inlined_call_operand.hbm [shape: bf16[32,64], index: 7, kind: input, shape index: {}]   ;;  %s3411_s8 = inlined_call_operand.hbm [shape: bf16[2,8,8,64], index: 8, kind: output, shape index: {}]  }
   0x1   :  { %3421 = sst [smem:[#allocation25_spill]] %s3404_s1 }
   0x2   :  { %3422 = sst [smem:[#allocation26_spill]] %s3405_s2 }
   0x3   :  { %3423 = sst [smem:[#allocation27_spill]] %s3406_s3 }
   0x4   :  { %3424 = sst [smem:[#allocation28_spill]] %s3411_s8 }
   0x5   :  { %13 = vsyncpa [#allocation4], 0 }
   0x6   :  { %15 = vsyncpa [#allocation4 + $0x1], 0 }
   0x7   :  { %16 = vsyncpa [#allocation7], 0 }
   0x8   :  { %17 = vsyncpa [#allocation10], 0 }
   0x9   :  { %18 = vsyncpa [#allocation13], 0 }
   0xa   :  { %19 = vsyncpa [#allocation16], 0 }
   0xb   :  { %20 = vsyncpa [#allocation5], 0 }
   0xc   :  { %22 = vsyncpa [#allocation5 + $0x1], 0  ;;  %s2745_s27 = smov 0   ;;  %s2747_s28 = smov 0  }
   0xd   :  { %s2749_s29 = smov 0   ;;  %s2751_s30 = smov 0  }
   0xe   :  { %s2753_s9 = smov 0   ;;  %s2755_s10 = smov 0  }
   0xf LB: > { %3425 = sst [smem:[#allocation24_spill]] %s2674_s30  ;;  %s3412_s11 = sadd.s32 4294967295, %s2682_s10   ;;  %s2682_s10 = sphi %s2755_s10, %s28_s10   ;;  %s2678_s9 = sphi %s2753_s9, %s3453_s9   ;;  %s2674_s30 = sphi %s2751_s30, %s3452_s30   ;;  %s2670_s29 = sphi %s2749_s29, %s3451_s29   ;;  %s2666_s28 = sphi %s2747_s28, %s3450_s28   ;;  %s2662_s27 = sphi %s2745_s27, %s3449_s27  }
  0x10   : > { %p1862_p0 = scmp.ge.s32.totalorder %s2682_s10, 1  ;;  %p2779_p1 = scmp.eq.s32.totalorder %s3412_s11, 0 }
  0x11   : > { %p246_p2 = scmp.lt.s32.totalorder %s2682_s10, 3  ;;  %s2684_s14 = smov [#allocation6]  }
  0x12   : > { %s3426_s12 = scalar_select %p2779_p1, 1, 0 }
  0x13   : > { %p2784_p3 = pnand %p1862_p0, %p246_p2  ;;  %s258_s15 = sshll.u32 %s2684_s14, 4  ;;  %s2788_s15 = int_to_ptr.vmem [resolvable:$true] %s258_s15 }
  0x14   : > { %s2685_s17 = smov [#allocation9]   ;;  %s2686_s19 = smov [#allocation12]  }
  0x15   : > { %s3427_s13 = scalar_select %p2784_p3, 1, 0 }
  0x16   : > { %p2096_p4 = pneg %p2784_p3  ;;  %s283_s18 = sshll.u32 %s2685_s17, 4  ;;  %s2799_s18 = int_to_ptr.vmem [resolvable:$true] %s283_s18 }
  0x17   : > { %s2801_s20 = sshll.u32 %s2686_s19, 4  ;;  %s3429_s1 = sld [smem:[#allocation25_spill]]  ;;  %s308_s20 = int_to_ptr.vmem [resolvable:$true] %s2801_s20 }
  0x18   : > { %p2795_p6 = pnand %p2096_p4, %p2779_p1 }
  0x1a   : > { %p2811_p8 = pneg %p2795_p6 }
  0x1d   : > { %s2358_s23 = scalar_lea.hbm %s3429_s1, 512 }
  0x1e   : > { %p2359_p7 = scmp.ne.s32.totalorder %s3429_s1, %s2358_s23  ;;  %p2365_p11 = scmp.lt.u32.totalorder %s2358_s23, %s3429_s1 }
  0x20   : > { %p2361_p9 = pnand %p2811_p8, %p2359_p7 }
  0x22   : > { %p2362_p10 = pneg %p2361_p9 }
  0x24   : > { %p2367_p12 = pnand %p2365_p11, %p2362_p10 }
  0x26   : > { %2370 = shalt.err (!%p2367_p12)
}
  0x27   : > { %s2371_s19 = scalar_lea.vmem %s2788_s15, 512  ;;  %p2379_p4 = scmp.lt.s32.totalorder %s2788_s15, %s2788_s15 }
  0x28   : > { %p2372_p13 = scmp.ne.s32.totalorder %s2788_s15, %s2371_s19  ;;  %p2380_p5 = scmp.lt.s32.totalorder %s2371_s19, %s2371_s19 }
  0x2a   : > { %p2374_p0 = pnand %p2372_p13, %p2811_p8  ;;  %p2381_p7 = por %p2380_p5, %p2379_p4 }
  0x2c   : > { %p2375_p2 = pneg %p2374_p0 }
  0x2e   : > { %p2382_p9 = pnand %p2381_p7, %p2375_p2 }
  0x30   : > { %2385 = shalt.err (!%p2382_p9)
}
  0x31   : > { %s3417_s21 = smov 64   ;;  %s3419_s22 = smov 4  }
  0x32   : > { %2099 = dma.hbm_to_vmem [thread:$0]  (!%p2795_p6), %s3429_s1, 512, %s2788_s15, [#allocation7], %s3417_s21, %s3417_s21, %s3419_s22  }
  0x33   : > { %s3431_s3 = sld [smem:[#allocation27_spill]] }
  0x39   : > { %s2386_s17 = scalar_lea.hbm %s3431_s3, 16 }
  0x3a   : > { %p2387_p5 = scmp.ne.s32.totalorder %s3431_s3, %s2386_s17  ;;  %p2393_p12 = scmp.lt.u32.totalorder %s2386_s17, %s3431_s3 }
  0x3c   : > { %p2389_p10 = pnand %p2387_p5, %p2811_p8 }
  0x3e   : > { %p2390_p11 = pneg %p2389_p10 }
  0x40   : > { %p2395_p13 = pnand %p2393_p12, %p2390_p11 }
  0x42   : > { %2398 = shalt.err (!%p2395_p13)
}
  0x43   : > { %s2399_s15 = scalar_lea.vmem %s2799_s18, 16  ;;  %s2406_s11 = scalar_lea.vmem %s2799_s18, 32 }
  0x44   : > { %p2400_p0 = scmp.ne.s32.totalorder %s2799_s18, %s2399_s15  ;;  %p2407_p7 = scmp.lt.s32.totalorder %s2799_s18, %s2799_s18 }
  0x45   : > { %p2408_p9 = scmp.lt.s32.totalorder %s2406_s11, %s2399_s15 }
  0x46   : > { %p2402_p2 = pnand %p2400_p0, %p2811_p8 }
  0x47   : > { %p2409_p5 = por %p2408_p9, %p2407_p7 }
  0x48   : > { %p2403_p4 = pneg %p2402_p2 }
  0x4a   : > { %p2410_p10 = pnand %p2409_p5, %p2403_p4 }
  0x4c   : > { %2413 = shalt.err (!%p2410_p10)
}
  0x4d   : > { %2105 = dma.hbm_to_vmem [thread:$0]  (!%p2795_p6), %s3431_s3, 16, %s2799_s18, [#allocation10]  }
  0x4e   : > { %s2414_s25 = scalar_lea.hbm %s3408_s5, 16 }
  0x4f   : > { %p2415_p11 = scmp.ne.s32.totalorder %s3408_s5, %s2414_s25  ;;  %p2421_p0 = scmp.lt.u32.totalorder %s2414_s25, %s3408_s5 }
  0x51   : > { %p2417_p12 = pnand %p2415_p11, %p2811_p8 }
  0x53   : > { %p2418_p13 = pneg %p2417_p12 }
  0x55   : > { %p2423_p2 = pnand %p2421_p0, %p2418_p13 }
  0x57   : > { %2426 = shalt.err (!%p2423_p2)
}
  0x58   : > { %s2427_s11 = scalar_lea.vmem %s308_s20, 16  ;;  %s2434_s18 = scalar_lea.vmem %s308_s20, 32 }
  0x59   : > { %p2428_p4 = scmp.ne.s32.totalorder %s308_s20, %s2427_s11  ;;  %p2435_p5 = scmp.lt.s32.totalorder %s308_s20, %s308_s20 }
  0x5a   : > { %p2436_p10 = scmp.lt.s32.totalorder %s2434_s18, %s2427_s11 }
  0x5b   : > { %p2430_p7 = pnand %p2428_p4, %p2811_p8 }
  0x5c   : > { %p2437_p3 = por %p2436_p10, %p2435_p5 }
  0x5d   : > { %p2431_p9 = pneg %p2430_p7 }
  0x5f   : > { %p2438_p1 = pnand %p2437_p3, %p2431_p9 }
  0x61   : > { %2441 = shalt.err (!%p2438_p1)
}
  0x62   : > { %2111 = dma.hbm_to_vmem [thread:$0]  (!%p2795_p6), %s3408_s5, 16, %s308_s20, [#allocation13]  }
  0x63   : > { %s2689_s23 = smov [#allocation8]   ;;  %s2690_s25 = smov [#allocation11]  }
  0x64   : > { %s272_s24 = sshll.u32 %s2689_s23, 4  ;;  %s293_s14 = sshll.u32 %s2690_s25, 4  ;;  %s273_s24 = int_to_ptr.vmem [resolvable:$true] %s272_s24  ;;  %s294_s14 = int_to_ptr.vmem [resolvable:$true] %s293_s14 }
  0x65   : > { %s3432_s2 = sld [smem:[#allocation26_spill]] }
  0x6b   : > { %s2442_s15 = scalar_lea.hbm %s3432_s2, 16 }
  0x6c   : > { %p2443_p1 = scmp.ne.s32.totalorder %s3432_s2, %s2442_s15  ;;  %p2449_p12 = scmp.lt.u32.totalorder %s2442_s15, %s3432_s2 }
  0x6e   : > { %p2445_p3 = pnand %p2443_p1, %p2811_p8 }
  0x70   : > { %p2446_p11 = pneg %p2445_p3 }
  0x72   : > { %p2451_p13 = pnand %p2449_p12, %p2446_p11 }
  0x74   : > { %2454 = shalt.err (!%p2451_p13)
}
  0x75   : > { %s2455_s20 = scalar_lea.vmem %s273_s24, 16  ;;  %s2462_s30 = scalar_lea.vmem %s273_s24, 32 }
  0x76   : > { %p2456_p0 = scmp.ne.s32.totalorder %s273_s24, %s2455_s20  ;;  %p2463_p7 = scmp.lt.s32.totalorder %s273_s24, %s273_s24 }
  0x77   : > { %p2464_p9 = scmp.lt.s32.totalorder %s2462_s30, %s2455_s20 }
  0x78   : > { %p2458_p2 = pnand %p2456_p0, %p2811_p8 }
  0x79   : > { %p2465_p5 = por %p2464_p9, %p2463_p7 }
  0x7a   : > { %p2459_p4 = pneg %p2458_p2 }
  0x7c   : > { %p2466_p10 = pnand %p2465_p5, %p2459_p4 }
  0x7e   : > { %2469 = shalt.err (!%p2466_p10)
}
  0x7f   : > { %2102 = dma.hbm_to_vmem [thread:$0]  (!%p2795_p6), %s3432_s2, 16, %s273_s24, [#allocation7]  }
  0x80   : > { %s2470_s19 = scalar_lea.hbm %s3407_s4, 2304 }
  0x81   : > { %p2471_p1 = scmp.ne.s32.totalorder %s3407_s4, %s2470_s19  ;;  %p2477_p12 = scmp.lt.u32.totalorder %s2470_s19, %s3407_s4 }
  0x83   : > { %p2473_p3 = pnand %p2471_p1, %p2811_p8 }
  0x85   : > { %p2474_p11 = pneg %p2473_p3 }
  0x87   : > { %p2479_p13 = pnand %p2477_p12, %p2474_p11 }
  0x89   : > { %2482 = shalt.err (!%p2479_p13)
}
  0x8a   : > { %s2483_s20 = scalar_lea.vmem %s294_s14, 2304  ;;  %p2491_p7 = scmp.lt.s32.totalorder %s294_s14, %s294_s14 }
  0x8b   : > { %p2484_p0 = scmp.ne.s32.totalorder %s294_s14, %s2483_s20  ;;  %p2492_p9 = scmp.lt.s32.totalorder %s2483_s20, %s2483_s20 }
  0x8d   : > { %p2486_p2 = pnand %p2484_p0, %p2811_p8  ;;  %p2493_p5 = por %p2492_p9, %p2491_p7 }
  0x8f   : > { %p2487_p4 = pneg %p2486_p2 }
  0x91   : > { %p2494_p10 = pnand %p2493_p5, %p2487_p4 }
  0x93   : > { %2497 = shalt.err (!%p2494_p10)
}
  0x94   : > { %s3433_s24 = smov 64   ;;  %s2691_s25 = smov [#allocation14]  }
  0x95   : > { %2108 = dma.hbm_to_vmem [thread:$0]  (!%p2795_p6), %s3407_s4, 2304, %s294_s14, [#allocation10], %s3433_s24, %s3433_s24, %s3419_s22  }
  0x96   : > { %s318_s21 = sshll.u32 %s2691_s25, 4  ;;  %s2692_s17 = smov [#allocation15]   ;;  %s319_s21 = int_to_ptr.vmem [resolvable:$true] %s318_s21 }
  0x97   : > { %s328_s19 = sshll.u32 %s2692_s17, 4  ;;  %s2498_s18 = scalar_lea.hbm %s3409_s6, 16  ;;  %s329_s19 = int_to_ptr.vmem [resolvable:$true] %s328_s19 }
  0x98   : > { %p2499_p1 = scmp.ne.s32.totalorder %s3409_s6, %s2498_s18  ;;  %p2505_p12 = scmp.lt.u32.totalorder %s2498_s18, %s3409_s6 }
  0x9a   : > { %p2501_p3 = pnand %p2499_p1, %p2811_p8 }
  0x9c   : > { %p2502_p11 = pneg %p2501_p3 }
  0x9e   : > { %p2507_p13 = pnand %p2505_p12, %p2502_p11 }
  0xa0   : > { %2510 = shalt.err (!%p2507_p13)
}
  0xa1   : > { %s2511_s14 = scalar_lea.vmem %s319_s21, 16  ;;  %s2518_s23 = scalar_lea.vmem %s319_s21, 32 }
  0xa2   : > { %p2512_p0 = scmp.ne.s32.totalorder %s319_s21, %s2511_s14  ;;  %p2519_p7 = scmp.lt.s32.totalorder %s319_s21, %s319_s21 }
  0xa3   : > { %p2520_p9 = scmp.lt.s32.totalorder %s2518_s23, %s2511_s14 }
  0xa4   : > { %p2514_p2 = pnand %p2512_p0, %p2811_p8 }
  0xa5   : > { %p2521_p5 = por %p2520_p9, %p2519_p7 }
  0xa6   : > { %p2515_p4 = pneg %p2514_p2 }
  0xa8   : > { %p2522_p10 = pnand %p2521_p5, %p2515_p4 }
  0xaa   : > { %2525 = shalt.err (!%p2522_p10)
}
  0xab   : > { %2114 = dma.hbm_to_vmem [thread:$0]  (!%p2795_p6), %s3409_s6, 16, %s319_s21, [#allocation13]  }
  0xac   : > { %s2526_s11 = scalar_lea.hbm %s3410_s7, 256 }
  0xad   : > { %p2527_p1 = scmp.ne.s32.totalorder %s3410_s7, %s2526_s11  ;;  %p2533_p12 = scmp.lt.u32.totalorder %s2526_s11, %s3410_s7 }
  0xaf   : > { %p2529_p3 = pnand %p2527_p1, %p2811_p8 }
  0xb1   : > { %p2530_p11 = pneg %p2529_p3 }
  0xb3   : > { %p2535_p13 = pnand %p2533_p12, %p2530_p11 }
  0xb5   : > { %2538 = shalt.err (!%p2535_p13)
}
  0xb6   : > { %s2539_s14 = scalar_lea.vmem %s329_s19, 256  ;;  %p2547_p7 = scmp.lt.s32.totalorder %s329_s19, %s329_s19 }
  0xb7   : > { %p2540_p0 = scmp.ne.s32.totalorder %s329_s19, %s2539_s14  ;;  %p2548_p9 = scmp.lt.s32.totalorder %s2539_s14, %s2539_s14 }
  0xb9   : > { %p2542_p2 = pnand %p2540_p0, %p2811_p8  ;;  %p2549_p5 = por %p2548_p9, %p2547_p7 }
  0xbb   : > { %p2543_p4 = pneg %p2542_p2 }
  0xbd   : > { %p2550_p10 = pnand %p2549_p5, %p2543_p4 }
  0xbf   : > { %2553 = shalt.err (!%p2550_p10)
}
  0xc0   : > { %2117 = dma.hbm_to_vmem [thread:$0]  (!%p2795_p6), %s3410_s7, 256, %s329_s19, [#allocation16], %s3433_s24, %s3433_s24, %s3419_s22  }
  0xc1   : > { %s1861_s16 = sadd.s32 4294967294, %s2682_s10   ;;  %s40_s26 = sadd.s32 1, %s2678_s9 }
  0xc2   : > { %s47_s25 = sadd.s32 1, %s2670_s29  ;;  %p42_p8 = scmp.ge.s32.totalorder %s40_s26, 2 }
  0xc3   : > { %p54_p1 = scmp.ne.s32.totalorder %s2670_s29, %s2666_s28  ;;  %p55_p3 = scmp.eq.s32.totalorder %s2682_s10, 0 }
  0xc4   : > { %p60_p11 = scmp.ne.s32.totalorder %s2666_s28, %s2662_s27  ;;  %s3455_s26 = smov (%p42_p8, %s40_s26), 0 }
  0xc5   : > { %p2966_p12 = por %p55_p3, %p54_p1  ;;  %p3435_p13 = scmp.ne.s32.totalorder %s3426_s12, 0 }
  0xc6   : > { %s44_s1 = ssub.s32 %s2678_s9, %s3455_s26  ;;  %s3437_s15 = sadd.s32 4294967295, %s2682_s10  }
  0xc7   : > { %p2972_p6 = por %p3435_p13, %p60_p11  ;;  %p233_p0 = scmp.eq.s32.totalorder %s3437_s15, 1 }
  0xc8   : > { %p45_p2 = scmp.eq.s32.totalorder %s44_s1, 0  ;;  %p239_p4 = scmp.eq.s32.totalorder %s1861_s16, 1 }
  0xc9   : > { %p2980_p7 = por %p233_p0, %p54_p1  ;;  %p2133_p9 = scmp.lt.s32.totalorder %s2682_s10, 2 }
  0xca   : > { %s2986_s18 = scalar_select %p45_p2, %s2670_s29, %s47_s25  }
  0xcb   : > { %s3438_s11 = scalar_select %p2980_p7, 1, 0 }
  0xcc   : > { %p2988_p5 = por %p239_p4, %p60_p11  ;;  %s342_s20 = sand.u32 1, %s2670_s29  }
  0xcd   : > { %s2061_s30 = smul.u32 80, %s342_s20  ;;  %p2996_p10 = pnand %p2133_p9, %p2966_p12 }
  0xce   : > { %s3439_s8 = scalar_select %p2988_p5, 1, 0 }
  0xcf   : > { %s2062_s14 = smul.u32 1280, %s2678_s9  ;;  %s346_s25 = scalar_lea.vmem [#allocation3], %s2061_s30 }
  0xd0   : > { %s353_s15 = sshll.u32 %s346_s25, 4  ;;  %s3007_s17 = scalar_lea.sflag [#allocation4], %s342_s20  ;;  %s3005_s15 = int_to_ptr.vmem [resolvable:$true] %s353_s15 }
  0xd1   : > { %s3003_s1 = scalar_lea.hbm %s3403_s0, %s2062_s14  ;;  %p2556_p1 = pneg %p2996_p10 }
  0xd2   : > { %s2554_s22 = scalar_lea.hbm %s3003_s1, 1280  ;;  %s2559_s16 = scalar_lea.hbm %s3403_s0, 2560 }
  0xd3   : > { %p2555_p8 = scmp.ne.s32.totalorder %s3003_s1, %s2554_s22  ;;  %p2560_p12 = scmp.lt.u32.totalorder %s3003_s1, %s3403_s0 }
  0xd4   : > { %p2561_p13 = scmp.lt.u32.totalorder %s2559_s16, %s2554_s22  ;;  %p2563_p2 = scmp.lt.u32.totalorder %s2554_s22, %s3003_s1 }
  0xd5   : > { %p2557_p3 = pnand %p2556_p1, %p2555_p8 }
  0xd6   : > { %p2562_p0 = por %p2561_p13, %p2560_p12 }
  0xd7   : > { %p2558_p11 = pneg %p2557_p3 }
  0xd8   : > { %p2564_p4 = por %p2563_p2, %p2562_p0 }
  0xda   : > { %p2565_p9 = pnand %p2564_p4, %p2558_p11 }
  0xdc   : > { %2568 = shalt.err (!%p2565_p9)
}
  0xdd   : > { %s2569_s20 = scalar_lea.vmem %s3005_s15, 1280  ;;  %s2693_s30 = smov [#allocation3]  }
  0xde   : > { %p2570_p8 = scmp.ne.s32.totalorder %s3005_s15, %s2569_s20  ;;  %s2574_s25 = sshll.u32 %s2693_s30, 4  ;;  %s2575_s25 = int_to_ptr.vmem [resolvable:$false] %s2574_s25 }
  0xdf   : > { %s2576_s2 = scalar_lea.vmem %s2575_s25, 2560  ;;  %p2577_p7 = scmp.lt.s32.totalorder %s3005_s15, %s2575_s25 }
  0xe0   : > { %p2572_p3 = pnand %p2570_p8, %p2556_p1  ;;  %p2578_p12 = scmp.lt.s32.totalorder %s2576_s2, %s2569_s20 }
  0xe2   : > { %p2573_p5 = pneg %p2572_p3  ;;  %p2579_p13 = por %p2578_p12, %p2577_p7 }
  0xe4   : > { %p2580_p0 = pnand %p2579_p13, %p2573_p5 }
  0xe6   : > { %2583 = shalt.err (!%p2580_p0)
}
  0xe7   : > { %s3441_s3 = smov 4   ;;  %p3442_p1 = scmp.ne.s32.totalorder %s3427_s13, 0 }
  0xe8   : > { %2121 = dma.hbm_to_vmem [thread:$0]  (!%p2996_p10), %s3003_s1, 1280, %s3005_s15, %s3007_s17, %s3433_s24, %s3433_s24, %s3441_s3  }
  0xe9   : > { %365 = sbr.rel (%p3442_p1) target bundleno = 1128 (0x468), region = 52  ;;  %s3041_s22 = sand.u32 (!%p3442_p1), 1, %s2666_s28  }
  0xea   : > { %s2063_s14 = smul.u32 (!%p3442_p1), 80, %s3041_s22  ;;  %s368_s23 = scalar_lea.sflag (!%p3442_p1), [#allocation4], %s3041_s22 }
  0xec   : > { %s3045_s16 = scalar_lea.vmem (!%p3442_p1), [#allocation3], %s2063_s14 }
  0xf0   : > { %2637 = dma.done.wait (%p2972_p6), %s368_s23, 1280  }
  0xf1   : > { %2639 = vsyncadd (%p2972_p6), %s368_s23, 4294966016  ;;  %p3443_p7 = scmp.ne.s32.totalorder %s3426_s12, 0 }
  0xf3   : > { %2641 = dma.done.wait (%p3443_p7), [#allocation7], 528  }
  0xf4   : > { %2643 = vsyncadd (%p3443_p7), [#allocation7], 4294966768 }
  0xf5   : > { %2645 = dma.done.wait (%p3443_p7), [#allocation10], 2320  }
  0xf6   : > { %2647 = vsyncadd (%p3443_p7), [#allocation10], 4294964976 }
  0xf7   : > { %2649 = dma.done.wait (%p3443_p7), [#allocation13], 32  }
  0xf8   : > { %2651 = vsyncadd (%p3443_p7), [#allocation13], 4294967264 }
  0xf9   : > { %2653 = dma.done.wait (%p3443_p7), [#allocation16], 256  }
  0xfa   : > { %2655 = vsyncadd (%p3443_p7), [#allocation16], 4294967040  ;;  %v2324_v0 = vld [vmem:[#allocation6] sm:$0xff]   ;;  %v2325_v1 = vld [vmem:[#allocation6 + $0x8] sm:$0xff]   ;;  %vm540_vm0 = vcmask 523264   ;;  %vm905_vm1 = vcmask 261120   ;;  %v768_v24 = vlaneseq }
  0xfb   : > { %2009 = vmatprep.subr.bf16.mxu0 %v2324_v0  ;;  %v2326_v2 = vld [vmem:[#allocation6 + $0x10] sm:$0xff]   ;;  %v2327_v4 = vld [vmem:[#allocation6 + $0x18] sm:$0xff]   ;;  %v2694_v14 = vmov 0.0   ;;  %v2338_v15 = vld [vmem:[#allocation11 + $0x80] sm:$0xff]   ;;  %s2695_s12 = smov 64   ;;  %s2696_s13 = smov 32  }
  0xfc   : > { %2010 = vmatpush3.bf16.msra.mxu0 %v2324_v0  ;;  %v2328_v3 = vld [vmem:[%s3045_s16] sm:$0xff]   ;;  %v2329_v5 = vld [vmem:[%s3045_s16 + $0x8] sm:$0xff]   ;;  %v2330_v6 = vld [vmem:[%s3045_s16 + $0x10] sm:$0xff]   ;;  %906 = vst.msk [vmem:[#allocation2] sm:$0xff] %vm905_vm1, %v2694_v14  ;;  %v3093_v26 = vshrl.u32 %v768_v24, 7  ;;  %s2697_s24 = smov 96  }
  0xfd   : > { %2011 = vmatprep.subr.bf16.mxu0 %v2325_v1  ;;  %2017 = vmatprep.mubr.msk.bf16.mxu0 %vm540_vm0, %v2328_v3  ;;  %v2331_v7 = vld [vmem:[%s3045_s16 + $0x18] sm:$0xff]   ;;  %v2332_v8 = vld [vmem:[%s3045_s16 + $0x20] sm:$0xff]   ;;  %v2333_v9 = vld [vmem:[%s3045_s16 + $0x28] sm:$0xff]   ;;  %907 = vst.msk [vmem:[#allocation2 + $0x8] sm:$0xff] %vm905_vm1, %v2694_v14  ;;  %vm1208_vm4 = vcmask 785408   ;;  %s1880_s19 = sshll.u32 %s3041_s22, 5 }
  0xfe   : > { %v2334_v10 = vld [vmem:[%s3045_s16 + $0x30] sm:$0xff]   ;;  %v2335_v11 = vld [vmem:[%s3045_s16 + $0x38] sm:$0xff]   ;;  %v2336_v12 = vld [vmem:[%s3045_s16 + $0x40] sm:$0xff]   ;;  %924 = vst.msk [vmem:[#allocation2 + $0x90] sm:$0xff] %vm905_vm1, %v2694_v14  ;;  %v3099_v32 = vadd.s32 8, %v3093_v26  ;;  %vm801_vm2 = vcmp.ge.s32.totalorder %v3093_v26, 1 }
  0xff   : > { %v2337_v13 = vld [vmem:[%s3045_s16 + $0x48] sm:$0xff]   ;;  %925 = vst.msk [vmem:[#allocation2 + $0x98] sm:$0xff] %vm905_vm1, %v2694_v14  ;;  %v3091_v25 = vld [vmem:[#allocation8] ss:$0 sm:$0xff]  ;;  %v3095_v28 = vld [vmem:[#allocation9] ss:$0 sm:$0xff] }
 0x100   : > { %2012 = vmatpush3.bf16.msra.mxu0 %v2325_v1  ;;  %v2339_v16 = vld [vmem:[#allocation11 + $0x88] sm:$0xff]   ;;  %v2340_v17 = vld [vmem:[#allocation11 + $0x40] sm:$0xff]   ;;  %v2344_v21 = vld [vmem:[#allocation11 + $0x50] sm:$0xff]   ;;  %vm824_vm3 = vcmp.lt.s32.totalorder %v3099_v32, 9  ;;  %s3444_s21 = sld [smem:[#allocation24_spill]]  ;;  %vm1682_vm5 = vcmask 519168  }
 0x101   : > { %2013 = vmatprep.subr.bf16.mxu0 %v2326_v2  ;;  %v2341_v18 = vld [vmem:[#allocation11] sm:$0xff]   ;;  %v2342_v19 = vld [vmem:[#allocation11 + $0x48] sm:$0xff]   ;;  %1957 = vmatprep.subr.bf16.mxu1 %v2340_v17  ;;  %v2345_v22 = vld [vmem:[#allocation11 + $0x10] sm:$0xff]   ;;  %s431_s1 = scalar_lea.vmem [#allocation17], %s1880_s19  ;;  %s3445_s25 = sld [smem:[#allocation28_spill]] }
 0x102   : > { %1958 = vmatpush3.bf16.msra.mxu1 %v2341_v18  ;;  %v2343_v20 = vld [vmem:[#allocation11 + $0x8] sm:$0xff]   ;;  %v2346_v23 = vld [vmem:[#allocation11 + $0x58] sm:$0xff]   ;;  %v2348_v45 = vld [vmem:[#allocation11 + $0x60] sm:$0xff]   ;;  %s1707_s17 = sshll.u32 %s431_s1, 4  ;;  %s1692_s3 = scalar_lea.sflag [#allocation5], %s3041_s22  ;;  %s3350_s17 = int_to_ptr.vmem [resolvable:$true] %s1707_s17 }
 0x103   : > { %1959 = vmatprep.subr.bf16.mxu1 %v2342_v19  ;;  %v2347_v38 = vld [vmem:[#allocation11 + $0x18] sm:$0xff]   ;;  %v2349_v46 = vld [vmem:[#allocation11 + $0x20] sm:$0xff]   ;;  %v2350_v56 = vld [vmem:[#allocation11 + $0x68] sm:$0xff]   ;;  %s2584_s14 = scalar_lea.vmem %s3350_s17, 512  ;;  %p3446_p5 = scmp.ne.s32.totalorder %s3438_s11, 0 }
 0x104   : > { %2014 = vmatpush3.bf16.msra.mxu0 %v2326_v2  ;;  %v2351_v59 = vld [vmem:[#allocation11 + $0x28] sm:$0xff]   ;;  %v942_v62 = vld [vmem:[#allocation2 + $0x2] sm:$0xff]  ;;  %v2353_v14 = vld [vmem:[#allocation11 + $0x30] sm:$0xff]   ;;  %p2585_p6 = scmp.ne.s32.totalorder %s3350_s17, %s2584_s14  ;;  %s2698_s23 = smov [#allocation17]  }
 0x105   : > { %2015 = vmatprep.subr.bf16.mxu0 %v2327_v4  ;;  %v934_v63 = vld [vmem:[#allocation2 + $0x1] sm:$0xff]  ;;  %s2588_s16 = sshll.u32 %s2698_s23, 4  ;;  %s2589_s16 = int_to_ptr.vmem [resolvable:$false] %s2588_s16 }
 0x106   : > { %1960 = vmatpush3.bf16.msra.mxu1 %v2343_v20  ;;  %s1942_s15 = sshll.u32 %s3444_s21, 9  ;;  %p2586_p10 = pnand %p2585_p6, %p3446_p5 }
 0x107   : > { %1961 = vmatprep.subr.bf16.mxu1 %v2344_v21  ;;  %s3347_s2 = scalar_lea.hbm %s3445_s25, %s1942_s15  ;;  %p2591_p2 = scmp.lt.s32.totalorder %s3350_s17, %s2589_s16 }
 0x108   : > { %2016 = vmatpush3.bf16.msra.mxu0 %v2327_v4  ;;  %p2587_p11 = pneg %p2586_p10 }
 0x109   : > { %2037 = vmatprep.subr.bf16.mxu0 %v2338_v15 }
 0x10a   : > { %1962 = vmatpush3.bf16.msra.mxu1 %v2345_v22  ;;  %v2354_v22 = vld [vmem:[#allocation11 + $0x78] sm:$0xff]  }
 0x10b   : > { %2018 = vmatmul.mubr.msk.bf16.vlgmr.msra.gmra.mrb[0].mxu0 %vm540_vm0, %v2329_v5  ;;  %1963 = vmatprep.subr.bf16.mxu1 %v2346_v23 }
 0x10c   : > { %2021 = vmatprep.mubr.msk.bf16.mxu0 %vm540_vm0, %v2330_v6  ;;  %2038 = vmatpush3.bf16.msra.mxu0 %v2338_v15 }
 0x10d   : > { %2039 = vmatprep.subr.bf16.mxu0 %v2339_v16 }
 0x10e   : > { %1964 = vmatpush3.bf16.msra.mxu1 %v2347_v38 }
 0x10f   : > { %1965 = vmatprep.subr.bf16.mxu1 %v2348_v45 }
 0x110   : > { %2040 = vmatpush3.bf16.msra.mxu0 %v2339_v16 }
 0x112   : > { %1966 = vmatpush3.bf16.msra.mxu1 %v2349_v46 }
 0x113   : > { %2022 = vmatmul.mubr.msk.bf16.gmra.mrb[4].mxu0 %vm540_vm0, %v2331_v7  ;;  %1967 = vmatprep.subr.bf16.mxu1 %v2350_v56 }
 0x114   : > { %2025 = vmatprep.mubr.msk.bf16.mxu0 %vm540_vm0, %v2332_v8  ;;  %v2352_v8 = vld [vmem:[#allocation11 + $0x70] sm:$0xff]  }
 0x116   : > { %1968 = vmatpush3.bf16.msra.mxu1 %v2351_v59 }
 0x117   : > { %1969 = vmatprep.subr.bf16.mxu1 %v2352_v8 }
 0x11a   : > { %1970 = vmatpush3.bf16.msra.mxu1 %v2353_v14 }
 0x11b   : > { %2026 = vmatmul.mubr.msk.bf16.gmra.mrb[8].mxu0 %vm540_vm0, %v2333_v9  ;;  %1971 = vmatprep.subr.bf16.mxu1 %v2354_v22 }
 0x11c   : > { %2029 = vmatprep.mubr.msk.bf16.mxu0 %vm540_vm0, %v2334_v10 }
 0x123   : > { %2030 = vmatmul.mubr.msk.bf16.gmra.mrb[12].mxu0 %vm540_vm0, %v2335_v11 }
 0x124   : > { %2033 = vmatprep.mubr.msk.bf16.mxu0 %vm540_vm0, %v2336_v12 }
 0x12b   : > { %2034 = vmatmul.mubr.msk.bf16.gmra.mrb[16].mxu0 %vm540_vm0, %v2337_v13 }
 0x1de   : > { %v2019_v27 = vpop.f32.mrb[0].mxu0 }
 0x1df   : > { %v693_v29 = vmul.f32 %v2019_v27, %v3091_v25  ;;  %v605_v30 = vpop.f32.mrb[1].mxu0  ;;  %v2355_v27 = vld [vmem:[#allocation11 + $0x38] sm:$0xff]  }
 0x1e0   : > { %v2020_v31 = vpop.f32.mrb[2].mxu0  ;;  %1972 = vmatpush3.bf16.msra.mxu1 %v2355_v27 }
 0x1e1   : > { %v720_v33 = vadd.f32 %v3095_v28, %v693_v29  ;;  %v694_v34 = vmul.f32 %v2020_v31, %v3091_v25  ;;  %v608_v35 = vpop.f32.mrb[3].mxu0 }
 0x1e3   : > { %v740_v36 = vmax.f32 %v720_v33, 0.0  ;;  %v721_v37 = vadd.f32 %v3095_v28, %v694_v34 }
 0x1e5   : > { %v887_v39 = vsel %vm801_vm2, %v740_v36, 0.0  ;;  %v741_v40 = vmax.f32 %v721_v37, 0.0 }
 0x1e6   : > { %908 = vst.msk [vmem:[#allocation2 + $0x10] sm:$0xff] %vm905_vm1, %v887_v39  ;;  %v2023_v41 = vpop.f32.mrb[4].mxu0 }
 0x1e7   : > { %v888_v42 = vsel %vm824_vm3, %v741_v40, 0.0  ;;  %v697_v43 = vmul.f32 %v2023_v41, %v3091_v25  ;;  %v621_v44 = vpop.f32.mrb[5].mxu0 }
 0x1e8   : > { %909 = vst.msk [vmem:[#allocation2 + $0x18] sm:$0xff] %vm905_vm1, %v888_v42  ;;  %v695_v47 = vmul.f32 %v3091_v25, %v621_v44  ;;  %v2024_v48 = vpop.f32.mrb[6].mxu0 }
 0x1e9   : > { %v724_v49 = vadd.f32 %v3095_v28, %v697_v43  ;;  %v698_v50 = vmul.f32 %v2024_v48, %v3091_v25  ;;  %v624_v51 = vpop.f32.mrb[7].mxu0 }
 0x1ea   : > { %v722_v52 = vadd.f32 %v3095_v28, %v695_v47  ;;  %v696_v53 = vmul.f32 %v3091_v25, %v624_v51 }
 0x1eb   : > { %v744_v54 = vmax.f32 %v724_v49, 0.0  ;;  %v725_v55 = vadd.f32 %v3095_v28, %v698_v50 }
 0x1ec   : > { %v742_v57 = vmax.f32 %v722_v52, 0.0  ;;  %v723_v58 = vadd.f32 %v3095_v28, %v696_v53 }
 0x1ed   : > { %v891_v60 = vsel %vm801_vm2, %v744_v54, 0.0  ;;  %v745_v61 = vmax.f32 %v725_v55, 0.0  ;;  %v3177_v53 = vld [vmem:[#allocation2 + $0x10] sm:$0xff] }
 0x1ee   : > { %912 = vst.msk [vmem:[#allocation2 + $0x30] sm:$0xff] %vm905_vm1, %v891_v60  ;;  %v889_v0 = vsel %vm801_vm2, %v742_v57, 0.0  ;;  %v743_v1 = vmax.f32 %v723_v58, 0.0  ;;  %v2027_v2 = vpop.f32.mrb[8].mxu0 }
 0x1ef   : > { %910 = vst.msk [vmem:[#allocation2 + $0x20] sm:$0xff] %vm905_vm1, %v889_v0  ;;  %v892_v3 = vsel %vm824_vm3, %v745_v61, 0.0  ;;  %v701_v4 = vmul.f32 %v2027_v2, %v3091_v25  ;;  %v637_v5 = vpop.f32.mrb[9].mxu0  ;;  %v3129_v6 = vld [vmem:[#allocation2 + $0x12] sm:$0xff] }
 0x1f0   : > { %v3131_v7 = vld [vmem:[#allocation2 + $0x11] sm:$0xff]  ;;  %913 = vst.msk [vmem:[#allocation2 + $0x38] sm:$0xff] %vm905_vm1, %v892_v3  ;;  %v890_v9 = vsel %vm824_vm3, %v743_v1, 0.0  ;;  %v699_v10 = vmul.f32 %v3091_v25, %v637_v5  ;;  %v2028_v11 = vpop.f32.mrb[10].mxu0  ;;  %v2209_v12 = vpack.i.bf16 %v3129_v6, %v942_v62 }
 0x1f1   : > { %v2204_v13 = vpack.i.bf16 %v3131_v7, %v934_v63  ;;  %911 = vst.msk [vmem:[#allocation2 + $0x28] sm:$0xff] %vm905_vm1, %v890_v9  ;;  %v728_v15 = vadd.f32 %v3095_v28, %v701_v4  ;;  %v702_v16 = vmul.f32 %v2028_v11, %v3091_v25  ;;  %v640_v17 = vpop.f32.mrb[11].mxu0 }
 0x1f2   : > { %v726_v18 = vadd.f32 %v3095_v28, %v699_v10  ;;  %v700_v19 = vmul.f32 %v3091_v25, %v640_v17  ;;  %2210 = vrot.lane.b32.xlu1 %v2209_v12, %s2695_s12 }
 0x1f3   : > { %2205 = vrot.lane.b32.xlu0 %v2204_v13, %s2696_s13  ;;  %v748_v20 = vmax.f32 %v728_v15, 0.0  ;;  %v729_v21 = vadd.f32 %v3095_v28, %v702_v16 }
 0x1f4   : > { %v746_v23 = vmax.f32 %v726_v18, 0.0  ;;  %v727_v24 = vadd.f32 %v3095_v28, %v700_v19 }
 0x1f5   : > { %v895_v29 = vsel %vm801_vm2, %v748_v20, 0.0  ;;  %v749_v30 = vmax.f32 %v729_v21, 0.0  ;;  %v3150_v31 = vld [vmem:[#allocation2 + $0x30] sm:$0xff] }
 0x1f6   : > { %916 = vst.msk [vmem:[#allocation2 + $0x50] sm:$0xff] %vm905_vm1, %v895_v29  ;;  %v893_v33 = vsel %vm801_vm2, %v746_v23, 0.0  ;;  %v747_v34 = vmax.f32 %v727_v24, 0.0  ;;  %v2031_v35 = vpop.f32.mrb[12].mxu0  ;;  %v3155_v36 = vld [vmem:[#allocation2 + $0x20] sm:$0xff] }
 0x1f7   : > { %914 = vst.msk [vmem:[#allocation2 + $0x40] sm:$0xff] %vm905_vm1, %v893_v33  ;;  %v896_v37 = vsel %vm824_vm3, %v749_v30, 0.0  ;;  %v705_v38 = vmul.f32 %v2031_v35, %v3091_v25  ;;  %v653_v39 = vpop.f32.mrb[13].mxu0  ;;  %v2214_v40 = vpack.i.bf16 %v3150_v31, %v3155_v36  ;;  %v3163_v41 = vld [vmem:[#allocation2 + $0x32] sm:$0xff]  ;;  %v2219_v58 = vpack.i.bf16 %v3155_v36, %v3177_v53 }
 0x1f8   : > { %917 = vst.msk [vmem:[#allocation2 + $0x58] sm:$0xff] %vm905_vm1, %v896_v37  ;;  %v894_v42 = vsel %vm824_vm3, %v747_v34, 0.0  ;;  %v703_v43 = vmul.f32 %v3091_v25, %v653_v39  ;;  %v2032_v44 = vpop.f32.mrb[14].mxu0  ;;  %v992_v45 = vld [vmem:[#allocation2 + $0x22] sm:$0xff]  ;;  %v3181_v55 = vld [vmem:[#allocation2 + $0x31] sm:$0xff] }
 0x1f9   : > { %915 = vst.msk [vmem:[#allocation2 + $0x48] sm:$0xff] %vm905_vm1, %v894_v42  ;;  %v732_v46 = vadd.f32 %v3095_v28, %v705_v38  ;;  %v706_v47 = vmul.f32 %v2032_v44, %v3091_v25  ;;  %2215 = vrot.lane.b32.xlu1 %v2214_v40, %s2695_s12  ;;  %v656_v48 = vpop.f32.mrb[15].mxu0  ;;  %v1243_v49 = vpack.c.bf16 %v3163_v41, %v992_v45  ;;  %v3179_v54 = vld [vmem:[#allocation2 + $0x21] sm:$0xff]  ;;  %v999_v37 = vld [vmem:[#allocation2 + $0x92] sm:$0xff] }
 0x1fa   : > { %v2224_v50 = vpack.i.bf16 %v992_v45, %v3129_v6  ;;  %v730_v51 = vadd.f32 %v3095_v28, %v703_v43  ;;  %v704_v52 = vmul.f32 %v3091_v25, %v656_v48  ;;  %v2229_v63 = vpack.i.bf16 %v3181_v55, %v3179_v54 }
 0x1fb   : > { %v752_v56 = vmax.f32 %v732_v46, 0.0  ;;  %v733_v57 = vadd.f32 %v3095_v28, %v706_v47  ;;  %2041 = vmatprep.mubr.msk.bf16.mxu0 %vm905_vm1, %v1243_v49  ;;  %v2239_v18 = vpack.i.bf16 %v3163_v41, %v992_v45  ;;  %v983_v45 = vld [vmem:[#allocation2 + $0x90] sm:$0xff] }
 0x1fc   : > { %2225 = vrot.lane.b32.xlu0 %v2224_v50, %s2696_s13  ;;  %v750_v59 = vmax.f32 %v730_v51, 0.0  ;;  %v731_v60 = vadd.f32 %v3095_v28, %v704_v52  ;;  %v991_v52 = vld [vmem:[#allocation2 + $0x91] sm:$0xff] }
 0x1fd   : > { %v899_v61 = vsel %vm801_vm2, %v752_v56, 0.0  ;;  %v753_v62 = vmax.f32 %v733_v57, 0.0  ;;  %2220 = vrot.lane.b32.xlu1 %v2219_v58, %s2697_s24  ;;  %v3194_v0 = vld [vmem:[#allocation2 + $0x50] sm:$0xff] }
 0x1fe   : > { %920 = vst.msk [vmem:[#allocation2 + $0x70] sm:$0xff] %vm905_vm1, %v899_v61  ;;  %v897_v1 = vsel %vm801_vm2, %v750_v59, 0.0  ;;  %v751_v2 = vmax.f32 %v731_v60, 0.0  ;;  %v2035_v3 = vpop.f32.mrb[16].mxu0  ;;  %v3199_v4 = vld [vmem:[#allocation2 + $0x40] sm:$0xff] }
 0x1ff   : > { %918 = vst.msk [vmem:[#allocation2 + $0x60] sm:$0xff] %vm905_vm1, %v897_v1  ;;  %v900_v5 = vsel %vm824_vm3, %v753_v62, 0.0  ;;  %v669_v6 = vpop.f32.mrb[17].mxu0  ;;  %v2244_v8 = vpack.i.bf16 %v3194_v0, %v3199_v4  ;;  %v995_v9 = vld [vmem:[#allocation2 + $0x52] sm:$0xff]  ;;  %v2249_v27 = vpack.i.bf16 %v3199_v4, %v3150_v31 }
 0x200   : > { %2230 = vrot.lane.b32.xlu0 %v2229_v63, %s2697_s24  ;;  %921 = vst.msk [vmem:[#allocation2 + $0x78] sm:$0xff] %vm905_vm1, %v900_v5  ;;  %v898_v10 = vsel %vm824_vm3, %v751_v2, 0.0  ;;  %v707_v11 = vmul.f32 %v3091_v25, %v669_v6  ;;  %v2036_v12 = vpop.f32.mrb[18].mxu0  ;;  %v994_v13 = vld [vmem:[#allocation2 + $0x42] sm:$0xff] }
 0x201   : > { %919 = vst.msk [vmem:[#allocation2 + $0x68] sm:$0xff] %vm905_vm1, %v898_v10  ;;  %2235 = vrot.lane.b32.xlu1 %v2229_v63, %s2696_s13  ;;  %v672_v14 = vpop.f32.mrb[19].mxu0  ;;  %v1246_v15 = vpack.c.bf16 %v995_v9, %v994_v13  ;;  %v2254_v21 = vpack.i.bf16 %v994_v13, %v3163_v41  ;;  %v3223_v24 = vld [vmem:[#allocation2 + $0x41] sm:$0xff]  ;;  %v2269_v38 = vpack.i.bf16 %v995_v9, %v994_v13 }
 0x202   : > { %v734_v16 = vadd.f32 %v3095_v28, %v707_v11  ;;  %v708_v17 = vmul.f32 %v3091_v25, %v672_v14  ;;  %v3225_v25 = vld [vmem:[#allocation2 + $0x51] sm:$0xff]  ;;  %v926_v63 = vld [vmem:[#allocation2] sm:$0xff] }
 0x203   : > { %2042 = vmatmul.mubr.msk.bf16.vlgmr.msra.gmra.mrb[20].mxu0 %vm905_vm1, %v1246_v15  ;;  %v2259_v26 = vpack.i.bf16 %v3225_v25, %v3223_v24 }
 0x204   : > { %2245 = vrot.lane.b32.xlu0 %v2244_v8, %s2695_s12  ;;  %v754_v19 = vmax.f32 %v734_v16, 0.0  ;;  %v735_v20 = vadd.f32 %v3095_v28, %v708_v17 }
 0x205   : > { %2240 = vrot.lane.b32.xlu1 %v2239_v18, %s2695_s12  ;;  %v3233_v33 = vld [vmem:[#allocation2 + $0x70] sm:$0xff] }
 0x206   : > { %v901_v22 = vsel %vm801_vm2, %v754_v19, 0.0  ;;  %v755_v23 = vmax.f32 %v735_v20, 0.0  ;;  %v3239_v35 = vld [vmem:[#allocation2 + $0x60] sm:$0xff] }
 0x207   : > { %922 = vst.msk [vmem:[#allocation2 + $0x80] sm:$0xff] %vm905_vm1, %v901_v22  ;;  %v997_v28 = vld [vmem:[#allocation2 + $0x72] sm:$0xff]  ;;  %v2274_v32 = vpack.i.bf16 %v3233_v33, %v3239_v35  ;;  %v2279_v44 = vpack.i.bf16 %v3239_v35, %v3194_v0 }
 0x208   : > { %2255 = vrot.lane.b32.xlu0 %v2254_v21, %s2696_s13  ;;  %v902_v29 = vsel %vm824_vm3, %v755_v23, 0.0  ;;  %v996_v30 = vld [vmem:[#allocation2 + $0x62] sm:$0xff]  ;;  %v3250_v43 = vld [vmem:[#allocation2 + $0x71] sm:$0xff] }
 0x209   : > { %923 = vst.msk [vmem:[#allocation2 + $0x88] sm:$0xff] %vm905_vm1, %v902_v29  ;;  %2250 = vrot.lane.b32.xlu1 %v2249_v27, %s2697_s24  ;;  %v1249_v34 = vpack.c.bf16 %v997_v28, %v996_v30  ;;  %v2284_v40 = vpack.i.bf16 %v996_v30, %v995_v9  ;;  %v3248_v42 = vld [vmem:[#allocation2 + $0x61] sm:$0xff]  ;;  %v2299_v49 = vpack.i.bf16 %v997_v28, %v996_v30 }
 0x20a   : > { %v2289_v46 = vpack.i.bf16 %v3250_v43, %v3248_v42 }
 0x20b   : > { %2045 = vmatprep.mubr.msk.bf16.mxu0 %vm905_vm1, %v1249_v34 }
 0x20c   : > { %2260 = vrot.lane.b32.xlu0 %v2259_v26, %s2697_s24 }
 0x20d   : > { %2265 = vrot.lane.b32.xlu1 %v2259_v26, %s2696_s13 }
 0x20e   : > { %v982_v47 = vld [vmem:[#allocation2 + $0x80] sm:$0xff] }
 0x20f   : > { %v2304_v48 = vpack.i.bf16 %v983_v45, %v982_v47  ;;  %v2319_v56 = vpack.i.bf16 %v982_v47, %v3233_v33 }
 0x210   : > { %2275 = vrot.lane.b32.xlu0 %v2274_v32, %s2695_s12  ;;  %v998_v39 = vld [vmem:[#allocation2 + $0x82] sm:$0xff] }
 0x211   : > { %2270 = vrot.lane.b32.xlu1 %v2269_v38, %s2695_s12  ;;  %v1252_v41 = vpack.c.bf16 %v999_v37, %v998_v39  ;;  %v2309_v50 = vpack.i.bf16 %v998_v39, %v997_v28  ;;  %v3263_v51 = vld [vmem:[#allocation2 + $0x81] sm:$0xff] }
 0x212   : > { %v2314_v57 = vpack.i.bf16 %v991_v52, %v3263_v51 }
 0x213   : > { %2046 = vmatmul.mubr.msk.bf16.gmra.mrb[24].mxu0 %vm905_vm1, %v1252_v41 }
 0x214   : > { %2285 = vrot.lane.b32.xlu0 %v2284_v40, %s2696_s13 }
 0x215   : > { %2280 = vrot.lane.b32.xlu1 %v2279_v44, %s2697_s24 }
 0x218   : > { %2290 = vrot.lane.b32.xlu0 %v2289_v46, %s2697_s24 }
 0x219   : > { %2295 = vrot.lane.b32.xlu1 %v2289_v46, %s2696_s13 }
 0x21c   : > { %2305 = vrot.lane.b32.xlu0 %v2304_v48, %s2695_s12 }
 0x21d   : > { %2300 = vrot.lane.b32.xlu1 %v2299_v49, %s2695_s12 }
 0x220   : > { %2310 = vrot.lane.b32.xlu0 %v2309_v50, %s2696_s13  ;;  %s2590_s13 = scalar_lea.vmem %s2589_s16, 1024 }
 0x221   : > { %2320 = vrot.lane.b32.xlu1 %v2319_v56, %s2697_s24  ;;  %p2592_p4 = scmp.lt.s32.totalorder %s2590_s13, %s2584_s14 }
 0x223   : > { %p2593_p9 = por %p2592_p4, %p2591_p2 }
 0x224   : > { %2315 = vrot.lane.b32.xlu0 %v2314_v57, %s2697_s24 }
 0x225   : > { %p2594_p8 = pnand %p2593_p9, %p2587_p11 }
 0x264   : > { %v2211_v58 = vpop.permute.xlu1 %2210 }
 0x265   : > { %v2206_v59 = vpop.permute.xlu0 %2205  ;;  %v2213_v2 = vunpack.i.h.bf16 %v2211_v58  ;;  %v2212_v3 = vunpack.i.l.bf16 %v2211_v58 }
 0x266   : > { %v2208_v60 = vunpack.i.h.bf16 %v2206_v59  ;;  %v2207_v61 = vunpack.i.l.bf16 %v2206_v59 }
 0x268   : > { %v1193_v8 = vsel %vm905_vm1, %v3177_v53, %v2208_v60  ;;  %v1192_v9 = vsel %vm905_vm1, %v926_v63, %v2207_v61 }
 0x269   : > { %v1200_v20 = vsel %vm540_vm0, %v1192_v9, %v2212_v3  ;;  %v1201_v53 = vsel %vm540_vm0, %v1193_v8, %v2213_v2 }
 0x26b   : > { %v2216_v62 = vpop.permute.xlu1 %2215 }
 0x26c   : > { %v2218_v15 = vunpack.i.h.bf16 %v2216_v62  ;;  %v2217_v16 = vunpack.i.l.bf16 %v2216_v62 }
 0x26e   : > { %v2226_v1 = vpop.permute.xlu0 %2225 }
 0x26f   : > { %v2228_v5 = vunpack.i.h.bf16 %v2226_v1  ;;  %v2227_v6 = vunpack.i.l.bf16 %v2226_v1  ;;  %v2221_v10 = vpop.permute.xlu1 %2220 }
 0x270   : > { %v2223_v11 = vunpack.i.h.bf16 %v2221_v10  ;;  %v2222_v12 = vunpack.i.l.bf16 %v2221_v10 }
 0x271   : > { %v1217_v13 = vsel %vm905_vm1, %v3131_v7, %v2227_v6  ;;  %v1218_v14 = vsel %vm905_vm1, %v3179_v54, %v2228_v5 }
 0x272   : > { %v2231_v17 = vpop.permute.xlu0 %2230  ;;  %v1225_v22 = vsel %vm540_vm0, %v1217_v13, %v2217_v16  ;;  %v1226_v23 = vsel %vm540_vm0, %v1218_v14, %v2218_v15  ;;  %v1209_v27 = vsel %vm1208_vm4, %v1200_v20, %v2222_v12  ;;  %v1210_v7 = vsel %vm1208_vm4, %v1201_v53, %v2223_v11 }
 0x273   : > { %v2233_v18 = vunpack.i.h.bf16 %v2231_v17  ;;  %v2232_v19 = vunpack.i.l.bf16 %v2231_v17  ;;  %v2236_v21 = vpop.permute.xlu1 %2235  ;;  %v1241_v26 = vpack.c.bf16 %v1210_v7, %v1209_v27 }
 0x274   : > { %v2238_v32 = vunpack.i.h.bf16 %v2236_v21  ;;  %v2237_v37 = vunpack.i.l.bf16 %v2236_v21 }
 0x275   : > { %v1233_v54 = vsel %vm1208_vm4, %v1225_v22, %v2232_v19  ;;  %v1234_v28 = vsel %vm1208_vm4, %v1226_v23, %v2233_v18 }
 0x276   : > { %v2246_v29 = vpop.permute.xlu0 %2245  ;;  %v1242_v30 = vpack.c.bf16 %v1234_v28, %v1233_v54  ;;  %v1195_v50 = vsel %vm905_vm1, %v3150_v31, %v2238_v32  ;;  %v1194_v52 = vsel %vm905_vm1, %v3155_v36, %v2237_v37 }
 0x277   : > { %v2241_v34 = vpop.permute.xlu1 %2240  ;;  %v2248_v56 = vunpack.i.h.bf16 %v2246_v29  ;;  %v2247_v57 = vunpack.i.l.bf16 %v2246_v29 }
 0x278   : > { %1441 = vmatprep.mubr.bf16.mxu1 %v1242_v30  ;;  %v2243_v39 = vunpack.i.h.bf16 %v2241_v34  ;;  %v2242_v40 = vunpack.i.l.bf16 %v2241_v34 }
 0x279   : > { %1442 = vmatmul.mubr.bf16.vlgmr.msra.gmra.mrb[0].mxu1 %v1241_v26 }
 0x27a   : > { %v2256_v38 = vpop.permute.xlu0 %2255  ;;  %v1202_v59 = vsel %vm540_vm0, %v1194_v52, %v2242_v40  ;;  %v1203_v60 = vsel %vm540_vm0, %v1195_v50, %v2243_v39 }
 0x27b   : > { %v2258_v41 = vunpack.i.h.bf16 %v2256_v38  ;;  %v2257_v44 = vunpack.i.l.bf16 %v2256_v38  ;;  %v2251_v45 = vpop.permute.xlu1 %2250 }
 0x27c   : > { %v2253_v48 = vunpack.i.h.bf16 %v2251_v45  ;;  %v2252_v49 = vunpack.i.l.bf16 %v2251_v45 }
 0x27d   : > { %v1219_v46 = vsel %vm905_vm1, %v3181_v55, %v2257_v44  ;;  %v1220_v47 = vsel %vm905_vm1, %v3223_v24, %v2258_v41 }
 0x27e   : > { %v2261_v58 = vpop.permute.xlu0 %2260  ;;  %v1227_v24 = vsel %vm540_vm0, %v1219_v46, %v2247_v57  ;;  %v1228_v63 = vsel %vm540_vm0, %v1220_v47, %v2248_v56  ;;  %v1211_v1 = vsel %vm1208_vm4, %v1202_v59, %v2252_v49  ;;  %v1212_v31 = vsel %vm1208_vm4, %v1203_v60, %v2253_v48 }
 0x27f   : > { %v2263_v61 = vunpack.i.h.bf16 %v2261_v58  ;;  %v2262_v55 = vunpack.i.l.bf16 %v2261_v58  ;;  %v2266_v62 = vpop.permute.xlu1 %2265  ;;  %v1244_v6 = vpack.c.bf16 %v1212_v31, %v1211_v1 }
 0x280   : > { %v2268_v9 = vunpack.i.h.bf16 %v2266_v62  ;;  %v2267_v10 = vunpack.i.l.bf16 %v2266_v62 }
 0x281   : > { %v1235_v36 = vsel %vm1208_vm4, %v1227_v24, %v2262_v55  ;;  %v1236_v2 = vsel %vm1208_vm4, %v1228_v63, %v2263_v61 }
 0x282   : > { %v2276_v3 = vpop.permute.xlu0 %2275  ;;  %v1245_v5 = vpack.c.bf16 %v1236_v2, %v1235_v36  ;;  %v1197_v53 = vsel %vm905_vm1, %v3194_v0, %v2268_v9  ;;  %v1196_v21 = vsel %vm905_vm1, %v3199_v4, %v2267_v10 }
 0x283   : > { %v2271_v8 = vpop.permute.xlu1 %2270  ;;  %v2278_v22 = vunpack.i.h.bf16 %v2276_v3  ;;  %v2277_v23 = vunpack.i.l.bf16 %v2276_v3 }
 0x284   : > { %1449 = vmatprep.mubr.bf16.mxu1 %v1245_v5  ;;  %v2273_v12 = vunpack.i.h.bf16 %v2271_v8  ;;  %v2272_v13 = vunpack.i.l.bf16 %v2271_v8  ;;  %v2356_v8 = vld [vmem:[#allocation15] sm:$0xff]  }
 0x285   : > { %1450 = vmatmul.mubr.bf16.gmra.mrb[4].mxu1 %v1244_v6  ;;  %2049 = vmatprep.subr.bf16.mxu1 %v2356_v8 }
 0x286   : > { %v2286_v11 = vpop.permute.xlu0 %2285  ;;  %v1204_v7 = vsel %vm540_vm0, %v1196_v21, %v2272_v13  ;;  %v1205_v54 = vsel %vm540_vm0, %v1197_v53, %v2273_v12  ;;  %2050 = vmatpush3.bf16.msra.mxu1 %v2356_v8 }
 0x287   : > { %v2288_v14 = vunpack.i.h.bf16 %v2286_v11  ;;  %v2287_v15 = vunpack.i.l.bf16 %v2286_v11  ;;  %v2281_v16 = vpop.permute.xlu1 %2280  ;;  %v2357_v11 = vld [vmem:[#allocation15 + $0x8] sm:$0xff]  }
 0x288   : > { %v2283_v19 = vunpack.i.h.bf16 %v2281_v16  ;;  %v2282_v20 = vunpack.i.l.bf16 %v2281_v16  ;;  %2051 = vmatprep.subr.bf16.mxu1 %v2357_v11 }
 0x289   : > { %v1221_v17 = vsel %vm905_vm1, %v3225_v25, %v2287_v15  ;;  %v1222_v18 = vsel %vm905_vm1, %v3248_v42, %v2288_v14 }
 0x28a   : > { %v2291_v27 = vpop.permute.xlu0 %2290  ;;  %v1229_v42 = vsel %vm540_vm0, %v1221_v17, %v2277_v23  ;;  %v1230_v30 = vsel %vm540_vm0, %v1222_v18, %v2278_v22  ;;  %v1213_v26 = vsel %vm1208_vm4, %v1204_v7, %v2282_v20  ;;  %v1214_v0 = vsel %vm1208_vm4, %v1205_v54, %v2283_v19  ;;  %2052 = vmatpush3.bf16.msra.mxu1 %v2357_v11  ;;  %v1929_v20 = vld [vmem:[#allocation12] ss:$0 sm:$0xff]  ;;  %v1930_v23 = vld [vmem:[#allocation14] ss:$0 sm:$0xff] }
 0x28b   : > { %v2293_v28 = vunpack.i.h.bf16 %v2291_v27  ;;  %v2292_v25 = vunpack.i.l.bf16 %v2291_v27  ;;  %v2296_v29 = vpop.permute.xlu1 %2295  ;;  %v1247_v38 = vpack.c.bf16 %v1214_v0, %v1213_v26 }
 0x28c   : > { %v2298_v40 = vunpack.i.h.bf16 %v2296_v29  ;;  %v2297_v41 = vunpack.i.l.bf16 %v2296_v29 }
 0x28d   : > { %v1237_v4 = vsel %vm1208_vm4, %v1229_v42, %v2292_v25  ;;  %v1238_v34 = vsel %vm1208_vm4, %v1230_v30, %v2293_v28 }
 0x28e   : > { %v2306_v32 = vpop.permute.xlu0 %2305  ;;  %v1248_v37 = vpack.c.bf16 %v1238_v34, %v1237_v4  ;;  %v1199_v58 = vsel %vm905_vm1, %v3233_v33, %v2298_v40  ;;  %v1198_v59 = vsel %vm905_vm1, %v3239_v35, %v2297_v41 }
 0x28f   : > { %v2301_v39 = vpop.permute.xlu1 %2300  ;;  %v2308_v60 = vunpack.i.h.bf16 %v2306_v32  ;;  %v2307_v61 = vunpack.i.l.bf16 %v2306_v32 }
 0x290   : > { %1457 = vmatprep.mubr.bf16.mxu1 %v1248_v37  ;;  %v2303_v45 = vunpack.i.h.bf16 %v2301_v39  ;;  %v2302_v46 = vunpack.i.l.bf16 %v2301_v39 }
 0x291   : > { %1458 = vmatmul.mubr.bf16.gmra.mrb[8].mxu1 %v1247_v38 }
 0x292   : > { %v2311_v44 = vpop.permute.xlu0 %2310  ;;  %v1206_v62 = vsel %vm540_vm0, %v1198_v59, %v2302_v46  ;;  %v1207_v24 = vsel %vm540_vm0, %v1199_v58, %v2303_v45 }
 0x293   : > { %v2313_v47 = vunpack.i.h.bf16 %v2311_v44  ;;  %v2312_v48 = vunpack.i.l.bf16 %v2311_v44  ;;  %v2321_v49 = vpop.permute.xlu1 %2320 }
 0x294   : > { %v2323_v56 = vunpack.i.h.bf16 %v2321_v49  ;;  %v2322_v57 = vunpack.i.l.bf16 %v2321_v49 }
 0x295   : > { %v1223_v50 = vsel %vm905_vm1, %v3250_v43, %v2312_v48  ;;  %v1224_v52 = vsel %vm905_vm1, %v3263_v51, %v2313_v47 }
 0x296   : > { %v2316_v55 = vpop.permute.xlu0 %2315  ;;  %v1231_v1 = vsel %vm540_vm0, %v1223_v50, %v2307_v61  ;;  %v1232_v51 = vsel %vm540_vm0, %v1224_v52, %v2308_v60  ;;  %v1215_v31 = vsel %vm1208_vm4, %v1206_v62, %v2322_v57  ;;  %v1216_v33 = vsel %vm1208_vm4, %v1207_v24, %v2323_v56 }
 0x297   : > { %v2318_v63 = vunpack.i.h.bf16 %v2316_v55  ;;  %v2317_v43 = vunpack.i.l.bf16 %v2316_v55  ;;  %v1250_v3 = vpack.c.bf16 %v1216_v33, %v1215_v31 }
 0x299   : > { %v1239_v36 = vsel %vm1208_vm4, %v1231_v1, %v2317_v43  ;;  %v1240_v35 = vsel %vm1208_vm4, %v1232_v51, %v2318_v63 }
 0x29a   : > { %v1251_v2 = vpack.c.bf16 %v1240_v35, %v1239_v36 }
 0x29c   : > { %1465 = vmatprep.mubr.bf16.mxu1 %v1251_v2 }
 0x29d   : > { %1466 = vmatmul.mubr.bf16.gmra.mrb[12].mxu1 %v1250_v3 }
 0x2d6   : > { %v2043_v5 = vpop.f32.mrb[20].mxu0 }
 0x2d7   : > { %v1508_v6 = vpop.f32.mrb[21].mxu0 }
 0x2d8   : > { %v2044_v9 = vpop.f32.mrb[22].mxu0 }
 0x2d9   : > { %v1511_v10 = vpop.f32.mrb[23].mxu0 }
 0x2e6   : > { %v2047_v12 = vpop.f32.mrb[24].mxu0 }
 0x2e7   : > { %v1524_v13 = vpop.f32.mrb[25].mxu0 }
 0x2e8   : > { %v2048_v14 = vpop.f32.mrb[26].mxu0 }
 0x2e9   : > { %v1527_v15 = vpop.f32.mrb[27].mxu0 }
 0x34c   : > { %v1973_v16 = vpop.f32.mrb[0].mxu1 }
 0x34d   : > { %v1974_v17 = vpop.f32.mrb[1].mxu1 }
 0x34e   : > { %v1975_v18 = vadd.f32 %v1974_v17, %v1973_v16  ;;  %v1976_v19 = vpop.f32.mrb[2].mxu1 }
 0x34f   : > { %v1977_v53 = vpop.f32.mrb[3].mxu1 }
 0x350   : > { %v1509_v21 = vadd.f32 %v1975_v18, %v1508_v6  ;;  %v1978_v22 = vadd.f32 %v1977_v53, %v1976_v19 }
 0x352   : > { %v1546_v27 = vmul.f32 %v1929_v20, %v1509_v21  ;;  %v1512_v7 = vadd.f32 %v1978_v22, %v1511_v10 }
 0x354   : > { %v1561_v54 = vadd.f32 %v1930_v23, %v1546_v27  ;;  %v1547_v28 = vmul.f32 %v1929_v20, %v1512_v7 }
 0x356   : > { %v1562_v25 = vadd.f32 %v1930_v23, %v1547_v28  ;;  %v1569_v29 = vmax.f32 %v1561_v54, 0.0 }
 0x358   : > { %v1570_v42 = vmax.f32 %v1562_v25, 0.0  ;;  %v1979_v30 = vpop.f32.mrb[4].mxu1 }
 0x359   : > { %v1980_v26 = vpop.f32.mrb[5].mxu1 }
 0x35a   : > { %v1981_v0 = vadd.f32 %v1980_v26, %v1979_v30  ;;  %v1982_v4 = vpop.f32.mrb[6].mxu1  ;;  %v1577_v34 = vpack.c.bf16 %v1570_v42, %v1569_v29 }
 0x35b   : > { %v1983_v32 = vpop.f32.mrb[7].mxu1 }
 0x35c   : > { %v1517_v37 = vadd.f32 %v2043_v5, %v1981_v0  ;;  %v1984_v38 = vadd.f32 %v1983_v32, %v1982_v4  ;;  %2053 = vmatprep.mubr.msk.bf16.mxu1 %vm905_vm1, %v1577_v34 }
 0x35e   : > { %v1548_v39 = vmul.f32 %v1929_v20, %v1517_v37  ;;  %v1520_v40 = vadd.f32 %v2044_v9, %v1984_v38 }
 0x360   : > { %v1563_v41 = vadd.f32 %v1930_v23, %v1548_v39  ;;  %v1549_v44 = vmul.f32 %v1929_v20, %v1520_v40 }
 0x362   : > { %v1564_v45 = vadd.f32 %v1930_v23, %v1549_v44  ;;  %v1571_v46 = vmax.f32 %v1563_v41, 0.0 }
 0x364   : > { %v1572_v47 = vmax.f32 %v1564_v45, 0.0  ;;  %v1985_v48 = vpop.f32.mrb[8].mxu1 }
 0x365   : > { %v1986_v49 = vpop.f32.mrb[9].mxu1 }
 0x366   : > { %v1578_v50 = vpack.c.bf16 %v1572_v47, %v1571_v46  ;;  %v1987_v52 = vadd.f32 %v1986_v49, %v1985_v48  ;;  %v1988_v56 = vpop.f32.mrb[10].mxu1 }
 0x367   : > { %v1989_v57 = vpop.f32.mrb[11].mxu1 }
 0x368   : > { %v1525_v58 = vadd.f32 %v1987_v52, %v1524_v13  ;;  %v1990_v59 = vadd.f32 %v1989_v57, %v1988_v56  ;;  %2054 = vmatmul.mubr.msk.bf16.vlgmr.msra.gmra.mrb[16].mxu1 %vm905_vm1, %v1578_v50 }
 0x36a   : > { %v1550_v60 = vmul.f32 %v1929_v20, %v1525_v58  ;;  %v1528_v61 = vadd.f32 %v1990_v59, %v1527_v15 }
 0x36c   : > { %v1565_v55 = vadd.f32 %v1930_v23, %v1550_v60  ;;  %v1551_v62 = vmul.f32 %v1929_v20, %v1528_v61 }
 0x36e   : > { %v1566_v24 = vadd.f32 %v1930_v23, %v1551_v62  ;;  %v1573_v63 = vmax.f32 %v1565_v55, 0.0 }
 0x370   : > { %v1574_v43 = vmax.f32 %v1566_v24, 0.0  ;;  %v1991_v1 = vpop.f32.mrb[12].mxu1 }
 0x371   : > { %v1992_v51 = vpop.f32.mrb[13].mxu1 }
 0x372   : > { %v1993_v31 = vadd.f32 %v1992_v51, %v1991_v1  ;;  %v1994_v33 = vpop.f32.mrb[14].mxu1  ;;  %v1579_v36 = vpack.c.bf16 %v1574_v43, %v1573_v63 }
 0x373   : > { %v1995_v35 = vpop.f32.mrb[15].mxu1 }
 0x374   : > { %v1533_v2 = vadd.f32 %v2047_v12, %v1993_v31  ;;  %v1996_v3 = vadd.f32 %v1995_v35, %v1994_v33  ;;  %2057 = vmatprep.mubr.msk.bf16.mxu1 %vm905_vm1, %v1579_v36 }
 0x376   : > { %v1552_v5 = vmul.f32 %v1929_v20, %v1533_v2  ;;  %v1536_v6 = vadd.f32 %v2048_v14, %v1996_v3 }
 0x378   : > { %v1567_v8 = vadd.f32 %v1930_v23, %v1552_v5  ;;  %v1553_v9 = vmul.f32 %v1929_v20, %v1536_v6 }
 0x37a   : > { %v1568_v10 = vadd.f32 %v1930_v23, %v1553_v9  ;;  %v1575_v11 = vmax.f32 %v1567_v8, 0.0 }
 0x37c   : > { %v1576_v13 = vmax.f32 %v1568_v10, 0.0 }
 0x37e   : > { %v1580_v15 = vpack.c.bf16 %v1576_v13, %v1575_v11 }
 0x380   : > { %2058 = vmatmul.mubr.msk.bf16.gmra.mrb[20].mxu1 %vm905_vm1, %v1580_v15 }
 0x43b   : > { %v2055_v16 = vpop.f32.mrb[16].mxu1 }
 0x43c   : > { %v1676_v17 = vpack.c.bf16 %v2055_v16, %v2055_v16  ;;  %v1643_v18 = vpop.f32.mrb[17].mxu1 }
 0x43d   : > { %v1674_v12 = vpack.c.bf16 %v1643_v18, %v1643_v18  ;;  %v2056_v19 = vpop.f32.mrb[18].mxu1 }
 0x43e   : > { %1685 = vst.msk [vmem:[%s431_s1 + $0x8] sm:$0xf] %vm1682_vm5, %v1676_v17  ;;  %v1677_v14 = vpack.c.bf16 %v2056_v19, %v2056_v19  ;;  %v1646_v53 = vpop.f32.mrb[19].mxu1 }
 0x43f   : > { %1683 = vst.msk [vmem:[%s431_s1] sm:$0xf] %vm1682_vm5, %v1674_v12  ;;  %v1675_v20 = vpack.c.bf16 %v1646_v53, %v1646_v53 }
 0x440   : > { %1686 = vst.msk [vmem:[%s431_s1 + $0xc] sm:$0xf] %vm1682_vm5, %v1677_v14 }
 0x441   : > { %1684 = vst.msk [vmem:[%s431_s1 + $0x4] sm:$0xf] %vm1682_vm5, %v1675_v20 }
 0x453   : > { %v2059_v21 = vpop.f32.mrb[20].mxu1 }
 0x454   : > { %v1680_v22 = vpack.c.bf16 %v2059_v21, %v2059_v21  ;;  %v1659_v23 = vpop.f32.mrb[21].mxu1 }
 0x455   : > { %v1678_v27 = vpack.c.bf16 %v1659_v23, %v1659_v23  ;;  %v2060_v7 = vpop.f32.mrb[22].mxu1 }
 0x456   : > { %1689 = vst.msk [vmem:[%s431_s1 + $0x18] sm:$0xf] %vm1682_vm5, %v1680_v22  ;;  %v1681_v54 = vpack.c.bf16 %v2060_v7, %v2060_v7  ;;  %v1662_v28 = vpop.f32.mrb[23].mxu1 }
 0x457   : > { %1687 = vst.msk [vmem:[%s431_s1 + $0x10] sm:$0xf] %vm1682_vm5, %v1678_v27  ;;  %v1679_v25 = vpack.c.bf16 %v1662_v28, %v1662_v28 }
 0x458   : > { %1690 = vst.msk [vmem:[%s431_s1 + $0x1c] sm:$0xf] %vm1682_vm5, %v1681_v54 }
 0x459   : > { %1688 = vst.msk [vmem:[%s431_s1 + $0x14] sm:$0xf] %vm1682_vm5, %v1679_v25 }
 0x45a   : > { %2597 = shalt.err (!%p2594_p8)
}
 0x45b   : > { %s2598_s24 = scalar_lea.hbm %s3347_s2, 512  ;;  %s2602_s1 = scalar_lea.hbm %s3445_s25, 1024 }
 0x45c   : > { %p2599_p3 = scmp.ne.s32.totalorder %s3347_s2, %s2598_s24  ;;  %p2603_p0 = scmp.lt.u32.totalorder %s3347_s2, %s3445_s25 }
 0x45d   : > { %p2604_p1 = scmp.lt.u32.totalorder %s2602_s1, %s2598_s24  ;;  %p2606_p6 = scmp.lt.u32.totalorder %s2598_s24, %s3347_s2 }
 0x45e   : > { %p2600_p12 = pnand %p2599_p3, %p3446_p5 }
 0x45f   : > { %p2605_p7 = por %p2604_p1, %p2603_p0 }
 0x460   : > { %p2601_p13 = pneg %p2600_p12 }
 0x461   : > { %p2607_p10 = por %p2606_p6, %p2605_p7 }
 0x463   : > { %p2608_p11 = pnand %p2607_p10, %p2601_p13 }
 0x465   : > { %2611 = shalt.err (!%p2608_p11)
}
 0x466   : > { %s2699_s30 = smov 4  }
 0x467   : > { %2094 = dma.vmem_to_hbm [thread:$0]  (%p3446_p5), %s3350_s17, 512, %s3347_s2, %s1692_s3, %s2695_s12, %s2695_s12, %s2699_s30  }
 0x468 PF: > { %s1722_s14 = sand.u32 1, %s2662_s27   ;;  %p3447_p2 = scmp.ne.s32.totalorder %s3439_s8, 0 }
 0x469   : > { %p3448_p4 = scmp.ge.s32.totalorder %s2682_s10, 2  ;;  %s1723_s23 = scalar_lea.sflag [#allocation5], %s1722_s14 }
 0x46b   : > { %p2123_p9 = pnand %p3448_p4, %p3447_p2 }
 0x46d   : > { %2657 = dma.done.wait (!%p2123_p9), %s1723_s23, 512  }
 0x46e   : > { %2659 = vsyncadd (!%p2123_p9), %s1723_s23, 4294966784  ;;  %s28_s10 = sadd.s32 1, %s2682_s10   ;;  %s3449_s27 = smov %s2666_s28 }
 0x46f   : > { %p25_p8 = scmp.ge.s32.totalorder %s28_s10, 4   ;;  %s3450_s28 = smov %s2670_s29 }
 0x470   : > { %s3451_s29 = smov %s2986_s18  ;;  %s3452_s30 = smov %s2678_s9 }
 0x471   : > { %s3453_s9 = smov %s3455_s26  ;;  %27 = sbr.rel (!%p25_p8) target bundleno = 15 (0xf), region = 128 }
 0x478   :  { %1728 = vsyncpa [#allocation4], 1 }
 0x479   :  { %1730 = vsyncpa [#allocation4 + $0x1], 1 }
 0x47a   :  { %1731 = vsyncpa [#allocation7], 1 }
 0x47b   :  { %1732 = vsyncpa [#allocation10], 1 }
 0x47c   :  { %1733 = vsyncpa [#allocation13], 1 }
 0x47d   :  { %1734 = vsyncpa [#allocation16], 1 }
 0x47e   :  { %1735 = vsyncpa [#allocation5], 1 }
 0x47f   :  { %1737 = vsyncpa [#allocation5 + $0x1], 1 }

// kernel: bottleneckx_elastic_forward.7
= control target key start
LH: loop header
LB: loop body
LE: loop exit
PB: predicated region body
PF: predicated region fallthrough
CT: control target
= control target key end

     0   :  { %s5937_s0 = inlined_call_operand.hbm [shape: bf16[2,18,32,64], index: 0, kind: input, shape index: {}]   ;;  %s5938_s1 = inlined_call_operand.hbm [shape: bf16[2,16,16,64], index: 1, kind: input, shape index: {}]   ;;  %s5939_s2 = inlined_call_operand.hbm [shape: bf16[64,32], index: 2, kind: input, shape index: {}]   ;;  %s5940_s3 = inlined_call_operand.hbm [shape: f32[1,32], index: 3, kind: input, shape index: {}]   ;;  %s5941_s4 = inlined_call_operand.hbm [shape: f32[1,32], index: 4, kind: input, shape index: {}]   ;;  %s5942_s5 = inlined_call_operand.hbm [shape: bf16[288,32], index: 5, kind: input, shape index: {}]   ;;  %s5943_s6 = inlined_call_operand.hbm [shape: f32[1,32], index: 6, kind: input, shape index: {}]   ;;  %s5944_s7 = inlined_call_operand.hbm [shape: f32[1,32], index: 7, kind: input, shape index: {}]   ;;  %s5945_s8 = inlined_call_operand.hbm [shape: bf16[32,64], index: 8, kind: input, shape index: {}]   ;;  %s5946_s9 = inlined_call_operand.hbm [shape: f32[1,64], index: 9, kind: input, shape index: {}]   ;;  %s5947_s10 = inlined_call_operand.hbm [shape: f32[1,64], index: 10, kind: input, shape index: {}]   ;;  %s5948_s11 = inlined_call_operand.hbm [shape: f32[2,16,16,64], index: 11, kind: output, shape index: {}]  }
   0x1   :  { %5968 = sst [smem:[#allocation39_spill]] %s5937_s0 }
   0x2   :  { %5969 = sst [smem:[#allocation40_spill]] %s5938_s1 }
   0x3   :  { %5970 = sst [smem:[#allocation41_spill]] %s5939_s2 }
   0x4   :  { %5971 = sst [smem:[#allocation42_spill]] %s5940_s3 }
   0x5   :  { %5972 = sst [smem:[#allocation43_spill]] %s5941_s4 }
   0x6   :  { %5973 = sst [smem:[#allocation44_spill]] %s5942_s5 }
   0x7   :  { %5974 = sst [smem:[#allocation45_spill]] %s5943_s6 }
   0x8   :  { %5975 = sst [smem:[#allocation46_spill]] %s5944_s7 }
   0x9   :  { %5976 = sst [smem:[#allocation47_spill]] %s5945_s8 }
   0xa   :  { %5977 = sst [smem:[#allocation48_spill]] %s5946_s9 }
   0xb   :  { %5978 = sst [smem:[#allocation49_spill]] %s5947_s10 }
   0xc   :  { %5979 = sst [smem:[#allocation50_spill]] %s5948_s11 }
   0xd   :  { %16 = vsyncpa [#allocation4], 0 }
   0xe   :  { %18 = vsyncpa [#allocation4 + $0x1], 0 }
   0xf   :  { %19 = vsyncpa [#allocation7], 0 }
  0x10   :  { %21 = vsyncpa [#allocation7 + $0x1], 0 }
  0x11   :  { %22 = vsyncpa [#allocation10], 0 }
  0x12   :  { %23 = vsyncpa [#allocation13], 0 }
  0x13   :  { %24 = vsyncpa [#allocation16], 0 }
  0x14   :  { %25 = vsyncpa [#allocation19], 0 }
  0x15   :  { %26 = vsyncpa [#allocation5], 0 }
  0x16   :  { %28 = vsyncpa [#allocation5 + $0x1], 0  ;;  %s4608_s17 = smov 0   ;;  %s4610_s18 = smov 0  }
  0x17   :  { %s4612_s19 = smov 0   ;;  %s4614_s20 = smov 0  }
  0x18   :  { %s4616_s21 = smov 0   ;;  %s4618_s22 = smov 0  }
  0x19   :  { %s4620_s23 = smov 0   ;;  %s4622_s24 = smov 0  }
  0x1a   :  { %s4624_s25 = smov 0   ;;  %s4626_s26 = smov 0  }
  0x1b   :  { %s4628_s27 = smov 0  }
  0x1c LB: > { %5980 = sst [smem:[#allocation30_spill]] %s4487_s17  ;;  %s4664_s28 = sadd.s32 4294967295, %s4527_s27   ;;  %s4527_s27 = sphi %s4628_s27, %s34_s27   ;;  %s4523_s26 = sphi %s4626_s26, %s6076_s26   ;;  %s4519_s25 = sphi %s4624_s25, %s6069_s25   ;;  %s4515_s24 = sphi %s4622_s24, %s6075_s24   ;;  %s4511_s23 = sphi %s4620_s23, %s6068_s23   ;;  %s4507_s22 = sphi %s4618_s22, %s6074_s22   ;;  %s4503_s21 = sphi %s4616_s21, %s6073_s21   ;;  %s4499_s20 = sphi %s4614_s20, %s6072_s20   ;;  %s4495_s19 = sphi %s4612_s19, %s6071_s19   ;;  %s4491_s18 = sphi %s4610_s18, %s6067_s18   ;;  %s4487_s17 = sphi %s4608_s17, %s6066_s17  }
  0x1d   : > { %5981 = sst [smem:[#allocation31_spill]] %s4491_s18  ;;  %p3145_p0 = scmp.ge.s32.totalorder %s4527_s27, 1 }
  0x1e   : > { %5982 = sst [smem:[#allocation32_spill]] %s4495_s19  ;;  %p5957_p1 = scmp.eq.s32.totalorder %s4664_s28, 0 }
  0x1f   : > { %5983 = sst [smem:[#allocation33_spill]] %s4511_s23  ;;  %p322_p2 = scmp.lt.s32.totalorder %s4527_s27, 5 }
  0x20   : > { %5984 = sst [smem:[#allocation34_spill]] %s4515_s24  ;;  %s4529_s30 = smov [#allocation8]  }
  0x21   : > { %5985 = sst [smem:[#allocation35_spill]] %s4519_s25  ;;  %p4669_p3 = pnand %p3145_p0, %p322_p2 }
  0x22   : > { %s334_s12 = sshll.u32 %s4529_s30, 4  ;;  %s4530_s14 = smov [#allocation9]   ;;  %s4673_s12 = int_to_ptr.vmem [resolvable:$true] %s334_s12 }
  0x23   : > { %s5986_s29 = scalar_select %p4669_p3, 1, 0 }
  0x24   : > { %p3621_p4 = pneg %p4669_p3  ;;  %s348_s15 = sshll.u32 %s4530_s14, 4  ;;  %s4683_s15 = int_to_ptr.vmem [resolvable:$true] %s348_s15 }
  0x25   : > { %5987 = sst [smem:[#allocation36_spill]] %s5986_s29  ;;  %s4531_s16 = smov [#allocation12]  }
  0x26   : > { %p4679_p5 = pnand %p3621_p4, %p5957_p1  ;;  %s4685_s11 = sshll.u32 %s4531_s16, 4  ;;  %s370_s11 = int_to_ptr.vmem [resolvable:$true] %s4685_s11 }
  0x27   : > { %s5989_s2 = sld [smem:[#allocation41_spill]] }
  0x28   : > { %p4695_p7 = pneg %p4679_p5 }
  0x2d   : > { %s4069_s30 = scalar_lea.hbm %s5989_s2, 512 }
  0x2e   : > { %p4070_p6 = scmp.ne.s32.totalorder %s5989_s2, %s4069_s30  ;;  %p4076_p10 = scmp.lt.u32.totalorder %s4069_s30, %s5989_s2 }
  0x30   : > { %p4072_p8 = pnand %p4695_p7, %p4070_p6 }
  0x32   : > { %p4073_p9 = pneg %p4072_p8 }
  0x34   : > { %p4078_p11 = pnand %p4076_p10, %p4073_p9 }
  0x36   : > { %4081 = shalt.err (!%p4078_p11)
}
  0x37   : > { %s4082_s1 = scalar_lea.vmem %s4673_s12, 512  ;;  %p4090_p2 = scmp.lt.s32.totalorder %s4673_s12, %s4673_s12 }
  0x38   : > { %p4083_p12 = scmp.ne.s32.totalorder %s4673_s12, %s4082_s1  ;;  %p4091_p4 = scmp.lt.s32.totalorder %s4082_s1, %s4082_s1 }
  0x3a   : > { %p4085_p13 = pnand %p4083_p12, %p4695_p7  ;;  %p4092_p6 = por %p4091_p4, %p4090_p2 }
  0x3c   : > { %p4086_p0 = pneg %p4085_p13 }
  0x3e   : > { %p4093_p8 = pnand %p4092_p6, %p4086_p0 }
  0x40   : > { %4096 = shalt.err (!%p4093_p8)
}
  0x41   : > { %s5961_s23 = smov 64   ;;  %s5962_s24 = smov 4  }
  0x42   : > { %3624 = dma.hbm_to_vmem [thread:$0]  (!%p4679_p5), %s5989_s2, 512, %s4673_s12, [#allocation7], %s5961_s23, %s5961_s23, %s5962_s24  }
  0x43   : > { %s5991_s3 = sld [smem:[#allocation42_spill]] }
  0x49   : > { %s4097_s1 = scalar_lea.hbm %s5991_s3, 16 }
  0x4a   : > { %p4098_p9 = scmp.ne.s32.totalorder %s5991_s3, %s4097_s1  ;;  %p4104_p12 = scmp.lt.u32.totalorder %s4097_s1, %s5991_s3 }
  0x4c   : > { %p4100_p10 = pnand %p4098_p9, %p4695_p7 }
  0x4e   : > { %p4101_p11 = pneg %p4100_p10 }
  0x50   : > { %p4106_p13 = pnand %p4104_p12, %p4101_p11 }
  0x52   : > { %4109 = shalt.err (!%p4106_p13)
}
  0x53   : > { %s4110_s12 = scalar_lea.vmem %s4683_s15, 16  ;;  %s4117_s18 = scalar_lea.vmem %s4683_s15, 32 }
  0x54   : > { %p4111_p0 = scmp.ne.s32.totalorder %s4683_s15, %s4110_s12  ;;  %p4118_p6 = scmp.lt.s32.totalorder %s4683_s15, %s4683_s15 }
  0x55   : > { %p4119_p8 = scmp.lt.s32.totalorder %s4117_s18, %s4110_s12 }
  0x56   : > { %p4113_p2 = pnand %p4111_p0, %p4695_p7 }
  0x57   : > { %p4120_p9 = por %p4119_p8, %p4118_p6 }
  0x58   : > { %p4114_p4 = pneg %p4113_p2 }
  0x5a   : > { %p4121_p10 = pnand %p4120_p9, %p4114_p4 }
  0x5c   : > { %4124 = shalt.err (!%p4121_p10)
}
  0x5d   : > { %3627 = dma.hbm_to_vmem [thread:$0]  (!%p4679_p5), %s5991_s3, 16, %s4683_s15, [#allocation10]  }
  0x5e   : > { %s5992_s5 = sld [smem:[#allocation44_spill]] }
  0x64   : > { %s4125_s30 = scalar_lea.hbm %s5992_s5, 2304 }
  0x65   : > { %p4126_p11 = scmp.ne.s32.totalorder %s5992_s5, %s4125_s30  ;;  %p4132_p0 = scmp.lt.u32.totalorder %s4125_s30, %s5992_s5 }
  0x67   : > { %p4128_p12 = pnand %p4126_p11, %p4695_p7 }
  0x69   : > { %p4129_p13 = pneg %p4128_p12 }
  0x6b   : > { %p4134_p2 = pnand %p4132_p0, %p4129_p13 }
  0x6d   : > { %4137 = shalt.err (!%p4134_p2)
}
  0x6e   : > { %s4138_s18 = scalar_lea.vmem %s370_s11, 2304  ;;  %p4146_p9 = scmp.lt.s32.totalorder %s370_s11, %s370_s11 }
  0x6f   : > { %p4139_p4 = scmp.ne.s32.totalorder %s370_s11, %s4138_s18  ;;  %p4147_p10 = scmp.lt.s32.totalorder %s4138_s18, %s4138_s18 }
  0x71   : > { %p4141_p6 = pnand %p4139_p4, %p4695_p7  ;;  %p4148_p1 = por %p4147_p10, %p4146_p9 }
  0x73   : > { %p4142_p8 = pneg %p4141_p6 }
  0x75   : > { %p4149_p3 = pnand %p4148_p1, %p4142_p8 }
  0x77   : > { %4152 = shalt.err (!%p4149_p3)
}
  0x78   : > { %3633 = dma.hbm_to_vmem [thread:$0]  (!%p4679_p5), %s5992_s5, 2304, %s370_s11, [#allocation13], %s5961_s23, %s5961_s23, %s5962_s24  }
  0x79   : > { %s4534_s19 = smov [#allocation15]   ;;  %s4535_s29 = smov [#allocation18]  }
  0x7a   : > { %s394_s25 = sshll.u32 %s4534_s19, 4  ;;  %s418_s30 = sshll.u32 %s4535_s29, 4  ;;  %s395_s25 = int_to_ptr.vmem [resolvable:$true] %s394_s25  ;;  %s419_s30 = int_to_ptr.vmem [resolvable:$true] %s418_s30 }
  0x7b   : > { %s5993_s7 = sld [smem:[#allocation46_spill]] }
  0x81   : > { %s4153_s1 = scalar_lea.hbm %s5993_s7, 16 }
  0x82   : > { %p4154_p1 = scmp.ne.s32.totalorder %s5993_s7, %s4153_s1  ;;  %p4160_p12 = scmp.lt.u32.totalorder %s4153_s1, %s5993_s7 }
  0x84   : > { %p4156_p3 = pnand %p4154_p1, %p4695_p7 }
  0x86   : > { %p4157_p11 = pneg %p4156_p3 }
  0x88   : > { %p4162_p13 = pnand %p4160_p12, %p4157_p11 }
  0x8a   : > { %4165 = shalt.err (!%p4162_p13)
}
  0x8b   : > { %s4166_s11 = scalar_lea.vmem %s395_s25, 16  ;;  %s4173_s0 = scalar_lea.vmem %s395_s25, 32 }
  0x8c   : > { %p4167_p0 = scmp.ne.s32.totalorder %s395_s25, %s4166_s11  ;;  %p4174_p6 = scmp.lt.s32.totalorder %s395_s25, %s395_s25 }
  0x8d   : > { %p4175_p8 = scmp.lt.s32.totalorder %s4173_s0, %s4166_s11 }
  0x8e   : > { %p4169_p2 = pnand %p4167_p0, %p4695_p7 }
  0x8f   : > { %p4176_p9 = por %p4175_p8, %p4174_p6 }
  0x90   : > { %p4170_p4 = pneg %p4169_p2 }
  0x92   : > { %p4177_p10 = pnand %p4176_p9, %p4170_p4 }
  0x94   : > { %4180 = shalt.err (!%p4177_p10)
}
  0x95   : > { %3639 = dma.hbm_to_vmem [thread:$0]  (!%p4679_p5), %s5993_s7, 16, %s395_s25, [#allocation16]  }
  0x96   : > { %s5994_s9 = sld [smem:[#allocation48_spill]] }
  0x9c   : > { %s4181_s16 = scalar_lea.hbm %s5994_s9, 16 }
  0x9d   : > { %p4182_p1 = scmp.ne.s32.totalorder %s5994_s9, %s4181_s16  ;;  %p4188_p12 = scmp.lt.u32.totalorder %s4181_s16, %s5994_s9 }
  0x9f   : > { %p4184_p3 = pnand %p4182_p1, %p4695_p7 }
  0xa1   : > { %p4185_p11 = pneg %p4184_p3 }
  0xa3   : > { %p4190_p13 = pnand %p4188_p12, %p4185_p11 }
  0xa5   : > { %4193 = shalt.err (!%p4190_p13)
}
  0xa6   : > { %s4194_s11 = scalar_lea.vmem %s419_s30, 16  ;;  %s4201_s25 = scalar_lea.vmem %s419_s30, 32 }
  0xa7   : > { %p4195_p0 = scmp.ne.s32.totalorder %s419_s30, %s4194_s11  ;;  %p4202_p6 = scmp.lt.s32.totalorder %s419_s30, %s419_s30 }
  0xa8   : > { %p4203_p8 = scmp.lt.s32.totalorder %s4201_s25, %s4194_s11 }
  0xa9   : > { %p4197_p2 = pnand %p4195_p0, %p4695_p7 }
  0xaa   : > { %p4204_p9 = por %p4203_p8, %p4202_p6 }
  0xab   : > { %p4198_p4 = pneg %p4197_p2 }
  0xad   : > { %p4205_p10 = pnand %p4204_p9, %p4198_p4 }
  0xaf   : > { %4208 = shalt.err (!%p4205_p10)
}
  0xb0   : > { %3645 = dma.hbm_to_vmem [thread:$0]  (!%p4679_p5), %s5994_s9, 16, %s419_s30, [#allocation19]  }
  0xb1   : > { %s4536_s29 = smov [#allocation11]   ;;  %s4537_s14 = smov [#allocation14]  }
  0xb2   : > { %s359_s2 = sshll.u32 %s4536_s29, 4  ;;  %s383_s16 = sshll.u32 %s4537_s14, 4  ;;  %s360_s2 = int_to_ptr.vmem [resolvable:$true] %s359_s2  ;;  %s384_s16 = int_to_ptr.vmem [resolvable:$true] %s383_s16 }
  0xb3   : > { %s5995_s4 = sld [smem:[#allocation43_spill]] }
  0xb9   : > { %s4209_s18 = scalar_lea.hbm %s5995_s4, 16 }
  0xba   : > { %p4210_p1 = scmp.ne.s32.totalorder %s5995_s4, %s4209_s18  ;;  %p4216_p12 = scmp.lt.u32.totalorder %s4209_s18, %s5995_s4 }
  0xbc   : > { %p4212_p3 = pnand %p4210_p1, %p4695_p7 }
  0xbe   : > { %p4213_p11 = pneg %p4212_p3 }
  0xc0   : > { %p4218_p13 = pnand %p4216_p12, %p4213_p11 }
  0xc2   : > { %4221 = shalt.err (!%p4218_p13)
}
  0xc3   : > { %s4222_s30 = scalar_lea.vmem %s360_s2, 16  ;;  %s4229_s19 = scalar_lea.vmem %s360_s2, 32 }
  0xc4   : > { %p4223_p0 = scmp.ne.s32.totalorder %s360_s2, %s4222_s30  ;;  %p4230_p6 = scmp.lt.s32.totalorder %s360_s2, %s360_s2 }
  0xc5   : > { %p4231_p8 = scmp.lt.s32.totalorder %s4229_s19, %s4222_s30 }
  0xc6   : > { %p4225_p2 = pnand %p4223_p0, %p4695_p7 }
  0xc7   : > { %p4232_p9 = por %p4231_p8, %p4230_p6 }
  0xc8   : > { %p4226_p4 = pneg %p4225_p2 }
  0xca   : > { %p4233_p10 = pnand %p4232_p9, %p4226_p4 }
  0xcc   : > { %4236 = shalt.err (!%p4233_p10)
}
  0xcd   : > { %3630 = dma.hbm_to_vmem [thread:$0]  (!%p4679_p5), %s5995_s4, 16, %s360_s2, [#allocation10]  }
  0xce   : > { %s5996_s6 = sld [smem:[#allocation45_spill]] }
  0xd4   : > { %s4237_s18 = scalar_lea.hbm %s5996_s6, 16 }
  0xd5   : > { %p4238_p1 = scmp.ne.s32.totalorder %s5996_s6, %s4237_s18  ;;  %p4244_p12 = scmp.lt.u32.totalorder %s4237_s18, %s5996_s6 }
  0xd7   : > { %p4240_p3 = pnand %p4238_p1, %p4695_p7 }
  0xd9   : > { %p4241_p11 = pneg %p4240_p3 }
  0xdb   : > { %p4246_p13 = pnand %p4244_p12, %p4241_p11 }
  0xdd   : > { %4249 = shalt.err (!%p4246_p13)
}
  0xde   : > { %s4250_s30 = scalar_lea.vmem %s384_s16, 16  ;;  %s4257_s2 = scalar_lea.vmem %s384_s16, 32 }
  0xdf   : > { %p4251_p0 = scmp.ne.s32.totalorder %s384_s16, %s4250_s30  ;;  %p4258_p6 = scmp.lt.s32.totalorder %s384_s16, %s384_s16 }
  0xe0   : > { %p4259_p8 = scmp.lt.s32.totalorder %s4257_s2, %s4250_s30 }
  0xe1   : > { %p4253_p2 = pnand %p4251_p0, %p4695_p7 }
  0xe2   : > { %p4260_p9 = por %p4259_p8, %p4258_p6 }
  0xe3   : > { %p4254_p4 = pneg %p4253_p2 }
  0xe5   : > { %p4261_p10 = pnand %p4260_p9, %p4254_p4 }
  0xe7   : > { %4264 = shalt.err (!%p4261_p10)
}
  0xe8   : > { %3636 = dma.hbm_to_vmem [thread:$0]  (!%p4679_p5), %s5996_s6, 16, %s384_s16, [#allocation13]  }
  0xe9   : > { %s4538_s14 = smov [#allocation17]   ;;  %s4539_s12 = smov [#allocation20]  }
  0xea   : > { %s404_s1 = sshll.u32 %s4538_s14, 4  ;;  %s429_s18 = sshll.u32 %s4539_s12, 4  ;;  %s405_s1 = int_to_ptr.vmem [resolvable:$true] %s404_s1  ;;  %s430_s18 = int_to_ptr.vmem [resolvable:$true] %s429_s18 }
  0xeb   : > { %s5997_s8 = sld [smem:[#allocation47_spill]] }
  0xf1   : > { %s4265_s25 = scalar_lea.hbm %s5997_s8, 256 }
  0xf2   : > { %p4266_p1 = scmp.ne.s32.totalorder %s5997_s8, %s4265_s25  ;;  %p4272_p12 = scmp.lt.u32.totalorder %s4265_s25, %s5997_s8 }
  0xf4   : > { %p4268_p3 = pnand %p4266_p1, %p4695_p7 }
  0xf6   : > { %p4269_p11 = pneg %p4268_p3 }
  0xf8   : > { %p4274_p13 = pnand %p4272_p12, %p4269_p11 }
  0xfa   : > { %4277 = shalt.err (!%p4274_p13)
}
  0xfb   : > { %s4278_s16 = scalar_lea.vmem %s405_s1, 256  ;;  %p4286_p6 = scmp.lt.s32.totalorder %s405_s1, %s405_s1 }
  0xfc   : > { %p4279_p0 = scmp.ne.s32.totalorder %s405_s1, %s4278_s16  ;;  %p4287_p8 = scmp.lt.s32.totalorder %s4278_s16, %s4278_s16 }
  0xfe   : > { %p4281_p2 = pnand %p4279_p0, %p4695_p7  ;;  %p4288_p9 = por %p4287_p8, %p4286_p6 }
 0x100   : > { %p4282_p4 = pneg %p4281_p2 }
 0x102   : > { %p4289_p10 = pnand %p4288_p9, %p4282_p4 }
 0x104   : > { %4292 = shalt.err (!%p4289_p10)
}
 0x105   : > { %3642 = dma.hbm_to_vmem [thread:$0]  (!%p4679_p5), %s5997_s8, 256, %s405_s1, [#allocation16], %s5961_s23, %s5961_s23, %s5962_s24  }
 0x106   : > { %s5998_s10 = sld [smem:[#allocation49_spill]] }
 0x10c   : > { %s4293_s11 = scalar_lea.hbm %s5998_s10, 16 }
 0x10d   : > { %p4294_p1 = scmp.ne.s32.totalorder %s5998_s10, %s4293_s11  ;;  %p4300_p12 = scmp.lt.u32.totalorder %s4293_s11, %s5998_s10 }
 0x10f   : > { %p4296_p3 = pnand %p4294_p1, %p4695_p7 }
 0x111   : > { %p4297_p11 = pneg %p4296_p3 }
 0x113   : > { %p4302_p13 = pnand %p4300_p12, %p4297_p11 }
 0x115   : > { %4305 = shalt.err (!%p4302_p13)
}
 0x116   : > { %s4306_s19 = scalar_lea.vmem %s430_s18, 16  ;;  %s4313_s1 = scalar_lea.vmem %s430_s18, 32 }
 0x117   : > { %p4307_p0 = scmp.ne.s32.totalorder %s430_s18, %s4306_s19  ;;  %p4314_p6 = scmp.lt.s32.totalorder %s430_s18, %s430_s18 }
 0x118   : > { %p4315_p8 = scmp.lt.s32.totalorder %s4313_s1, %s4306_s19 }
 0x119   : > { %p4309_p2 = pnand %p4307_p0, %p4695_p7 }
 0x11a   : > { %p4316_p9 = por %p4315_p8, %p4314_p6 }
 0x11b   : > { %p4310_p4 = pneg %p4309_p2 }
 0x11d   : > { %p4317_p10 = pnand %p4316_p9, %p4310_p4 }
 0x11f   : > { %4320 = shalt.err (!%p4317_p10)
}
 0x120   : > { %3648 = dma.hbm_to_vmem [thread:$0]  (!%p4679_p5), %s5998_s10, 16, %s430_s18, [#allocation19]  }
 0x121   : > { %s46_s17 = sadd.s32 1, %s4523_s26  ;;  %p60_p7 = scmp.ne.s32.totalorder %s4507_s22, %s4503_s21 }
 0x122   : > { %p5960_p1 = scmp.eq.s32.totalorder %s4527_s27, 0  ;;  %p66_p3 = scmp.ne.s32.totalorder %s4503_s21, %s4499_s20 }
 0x123   : > { %p5959_p11 = scmp.lt.s32.totalorder %s4527_s27, 4  ;;  %s440_s13 = sand.u32 1, %s4507_s22  }
 0x124   : > { %p62_p12 = por %p5960_p1, %p60_p7  ;;  %p5999_p13 = scmp.eq.s32.totalorder %s4664_s28, 0 }
 0x125   : > { %s3576_s15 = smul.u32 288, %s440_s13  ;;  %s6002_s30 = sld [smem:[#allocation39_spill]] }
 0x126   : > { %p4889_p0 = por %p5999_p13, %p66_p3  ;;  %s3577_s11 = smul.u32 4608, %s4523_s26 }
 0x127   : > { %p4896_p2 = pnand %p5959_p11, %p62_p12  ;;  %s444_s2 = scalar_lea.vmem [#allocation3], %s3576_s15 }
 0x128   : > { %s451_s19 = sshll.u32 %s444_s2, 4  ;;  %s4907_s1 = scalar_lea.sflag [#allocation4], %s440_s13  ;;  %s4905_s19 = int_to_ptr.vmem [resolvable:$true] %s451_s19 }
 0x129   : > { %p4323_p4 = pneg %p4896_p2 }
 0x12b   : > { %s4903_s20 = scalar_lea.hbm %s6002_s30, %s3577_s11  ;;  %s4326_s18 = scalar_lea.hbm %s6002_s30, 9216 }
 0x12c   : > { %s4321_s16 = scalar_lea.hbm %s4903_s20, 4608  ;;  %p4327_p9 = scmp.lt.u32.totalorder %s4903_s20, %s6002_s30 }
 0x12d   : > { %p4322_p5 = scmp.ne.s32.totalorder %s4903_s20, %s4321_s16  ;;  %p4328_p10 = scmp.lt.u32.totalorder %s4326_s18, %s4321_s16 }
 0x12e   : > { %p4330_p3 = scmp.lt.u32.totalorder %s4321_s16, %s4903_s20 }
 0x12f   : > { %p4324_p6 = pnand %p4323_p4, %p4322_p5  ;;  %p4329_p7 = por %p4328_p10, %p4327_p9 }
 0x131   : > { %p4325_p8 = pneg %p4324_p6  ;;  %p4331_p12 = por %p4330_p3, %p4329_p7 }
 0x133   : > { %p4332_p13 = pnand %p4331_p12, %p4325_p8 }
 0x135   : > { %4335 = shalt.err (!%p4332_p13)
}
 0x136   : > { %s4336_s13 = scalar_lea.vmem %s4905_s19, 4608  ;;  %s4540_s15 = smov [#allocation3]  }
 0x137   : > { %p4337_p5 = scmp.ne.s32.totalorder %s4905_s19, %s4336_s13  ;;  %s4341_s2 = sshll.u32 %s4540_s15, 4  ;;  %s4342_s2 = int_to_ptr.vmem [resolvable:$false] %s4341_s2 }
 0x138   : > { %s4343_s14 = scalar_lea.vmem %s4342_s2, 9216  ;;  %p4344_p1 = scmp.lt.s32.totalorder %s4905_s19, %s4342_s2 }
 0x139   : > { %p4339_p6 = pnand %p4337_p5, %p4323_p4  ;;  %p4345_p9 = scmp.lt.s32.totalorder %s4343_s14, %s4336_s13 }
 0x13b   : > { %p4340_p11 = pneg %p4339_p6  ;;  %p4346_p10 = por %p4345_p9, %p4344_p1 }
 0x13d   : > { %p4347_p7 = pnand %p4346_p10, %p4340_p11 }
 0x13f   : > { %4350 = shalt.err (!%p4347_p7)
}
 0x140   : > { %s6003_s16 = sld [smem:[#allocation35_spill]]  ;;  %s6004_s29 = sld [smem:[#allocation32_spill]] }
 0x141   : > { %s6005_s11 = sld [smem:[#allocation31_spill]]  ;;  %s6006_s18 = sld [smem:[#allocation30_spill]] }
 0x142   : > { %3652 = dma.hbm_to_vmem [thread:$0]  (!%p4896_p2), %s4903_s20, 4608, %s4905_s19, %s4907_s1, %s5961_s23, %s5961_s23, %s5962_s24  }
 0x143   : > { %s3144_s25 = sadd.s32 4294967294, %s4527_s27   ;;  %p309_p8 = scmp.eq.s32.totalorder %s4664_s28, 3 }
 0x144   : > { %p6008_p2 = scmp.eq.s32.totalorder %s4527_s27, 0  ;;  %p6010_p13 = scmp.eq.s32.totalorder %s4664_s28, 0 }
 0x145   : > { %p315_p9 = scmp.eq.s32.totalorder %s3144_s25, 3  ;;  %s461_s14 = sand.u32 1, %s4527_s27  }
 0x146   : > { %s43_s0 = sadd.s32 1, %s6003_s16  ;;  %s81_s13 = sadd.s32 1, %s6004_s29 }
 0x147   : > { %p44_p1 = scmp.ge.s32.totalorder %s43_s0, 2  ;;  %p88_p11 = scmp.ne.s32.totalorder %s6004_s29, %s6005_s11 }
 0x148   : > { %p94_p4 = scmp.ne.s32.totalorder %s6005_s11, %s6006_s18  ;;  %s463_s23 = sand.u32 1, %s6004_s29  }
 0x149   : > { %s6078_s0 = smov (%p44_p1, %s43_s0), 0  ;;  %s6080_s17 = smov (!%p44_p1, %s46_s17), %s4523_s26 }
 0x14a   : > { %6007 = sst [smem:[#allocation37_spill]] %s6078_s0  ;;  %s77_s15 = ssub.s32 %s6003_s16, %s6078_s0 }
 0x14b   : > { %p4955_p3 = por %p88_p11, %p6008_p2  ;;  %p48_p12 = scmp.ge.s32.totalorder %s6080_s17, 2 }
 0x14c   : > { %p4961_p5 = por %p94_p4, %p6010_p13  ;;  %p4965_p6 = por %p309_p8, %p88_p11 }
 0x14d   : > { %s6082_s17 = smov (%p48_p12, %s6080_s17), 0  ;;  %p4971_p10 = por %p315_p9, %p94_p4 }
 0x14e   : > { %s6011_s19 = scalar_select %p4961_p5, 1, 0 }
 0x14f   : > { %s6012_s1 = scalar_select %p4965_p6, 1, 0 }
 0x150   : > { %6013 = sst [smem:[#allocation38_spill]] %s6082_s17  ;;  %s50_s11 = ssub.s32 %s4523_s26, %s6082_s17 }
 0x151   : > { %s6014_s2 = scalar_select %p4971_p10, 1, 0 }
 0x152   : > { %p51_p7 = scmp.eq.s32.totalorder %s50_s11, 0  ;;  %s78_s18 = sor.u32 %s77_s15, %s50_s11 }
 0x153   : > { %p79_p1 = scmp.eq.s32.totalorder %s78_s18, 0  ;;  %s6015_s24 = sadd.s32 1, %s4507_s22 }
 0x154   : > { %s4982_s3 = scalar_select %p51_p7, %s4507_s22, %s6015_s24  }
 0x155   : > { %s6084_s29 = smov (!%p79_p1, %s6004_s29), %s81_s13  ;;  %s3157_s25 = sshll.u32 %s463_s23, 6 }
 0x156   : > { %s3296_s4 = sshll.u32 %s6003_s16, 4  ;;  %s3160_s5 = sshll.u32 %s4523_s26, 5 }
 0x157   : > { %s472_s6 = sadd.s32 %s3296_s4, %s3160_s5  ;;  %s465_s7 = scalar_lea.vmem [#allocation6], %s3157_s25 }
 0x158   : > { %s475_s8 = sshll.u32 %s465_s7, 4  ;;  %s3161_s9 = sshll.u32 %s472_s6, 6  ;;  %s4989_s8 = int_to_ptr.vmem [resolvable:$true] %s475_s8 }
 0x159   : > { %s6016_s17 = sld [smem:[#allocation40_spill]]  ;;  %p6018_p11 = scmp.lt.s32.totalorder %s4527_s27, 4 }
 0x15a   : > { %s5004_s4 = scalar_lea.sflag [#allocation7], %s461_s14 }
 0x15b   : > { %p5000_p4 = pnand %p6018_p11, %p4955_p3 }
 0x15d   : > { %p4353_p2 = pneg %p5000_p4 }
 0x15f   : > { %s6017_s0 = smov %s6016_s17  ;;  %s4994_s15 = scalar_lea.hbm %s6016_s17, %s3161_s9 }
 0x160   : > { %s4351_s5 = scalar_lea.hbm %s4994_s15, 1024  ;;  %s4356_s9 = scalar_lea.hbm %s6017_s0, 4096 }
 0x161   : > { %p4352_p8 = scmp.ne.s32.totalorder %s4994_s15, %s4351_s5  ;;  %p4357_p3 = scmp.lt.u32.totalorder %s4994_s15, %s6017_s0 }
 0x162   : > { %p4358_p9 = scmp.lt.u32.totalorder %s4356_s9, %s4351_s5  ;;  %p4360_p1 = scmp.lt.u32.totalorder %s4351_s5, %s4994_s15 }
 0x163   : > { %p4354_p12 = pnand %p4353_p2, %p4352_p8 }
 0x164   : > { %p4359_p7 = por %p4358_p9, %p4357_p3 }
 0x165   : > { %p4355_p13 = pneg %p4354_p12 }
 0x166   : > { %p4361_p11 = por %p4360_p1, %p4359_p7 }
 0x168   : > { %p4362_p10 = pnand %p4361_p11, %p4355_p13 }
 0x16a   : > { %4365 = shalt.err (!%p4362_p10)
}
 0x16b   : > { %s4366_s17 = scalar_lea.vmem %s4989_s8, 1024  ;;  %s4541_s30 = smov [#allocation6]  }
 0x16c   : > { %p4367_p8 = scmp.ne.s32.totalorder %s4989_s8, %s4366_s17  ;;  %s4371_s16 = sshll.u32 %s4541_s30, 4  ;;  %s4372_s16 = int_to_ptr.vmem [resolvable:$false] %s4371_s16 }
 0x16d   : > { %s4373_s13 = scalar_lea.vmem %s4372_s16, 2048  ;;  %p4374_p5 = scmp.lt.s32.totalorder %s4989_s8, %s4372_s16 }
 0x16e   : > { %p4369_p12 = pnand %p4367_p8, %p4353_p2  ;;  %p4375_p3 = scmp.lt.s32.totalorder %s4373_s13, %s4366_s17 }
 0x170   : > { %p4370_p6 = pneg %p4369_p12  ;;  %p4376_p9 = por %p4375_p3, %p4374_p5 }
 0x172   : > { %p4377_p7 = pnand %p4376_p9, %p4370_p6 }
 0x174   : > { %4380 = shalt.err (!%p4377_p7)
}
 0x175   : > { %s6020_s20 = smov 4   ;;  %s6021_s14 = smov 64  }
 0x176   : > { %3655 = dma.hbm_to_vmem [thread:$0]  (!%p5000_p4), %s4994_s15, 1024, %s4989_s8, %s5004_s4, %s6021_s14, %s6021_s14, %s6020_s20  }
 0x177   : > { %s6022_s11 = sld [smem:[#allocation36_spill]] }
 0x17d   : > { %p6023_p10 = scmp.ne.s32.totalorder %s6022_s11, 0 }
 0x17e   : > { %s489_s18 = sand.u32 (!%p6023_p10), 1, %s4503_s21  }
 0x17f   : > { %487 = sbr.rel (%p6023_p10) target bundleno = 1355 (0x54b), region = 64  ;;  %s490_s5 = scalar_lea.sflag (!%p6023_p10), [#allocation4], %s489_s18 }
 0x180   : > { %s3578_s25 = smul.u32 (!%p6023_p10), 288, %s489_s18 }
 0x182   : > { %s493_s6 = scalar_lea.vmem (!%p6023_p10), [#allocation3], %s3578_s25 }
 0x186   : > { %4454 = dma.done.wait (%p4889_p0), %s490_s5, 4608  }
 0x187   : > { %4456 = vsyncadd (%p4889_p0), %s490_s5, 4294962688  ;;  %s6024_s23 = sld [smem:[#allocation31_spill]]  ;;  %s498_s7 = sand.u32 1, %s4664_s28  }
 0x188   : > { %s499_s15 = scalar_lea.sflag [#allocation7], %s498_s7  ;;  %p6025_p5 = scmp.ne.s32.totalorder %s6011_s19, 0 }
 0x18d   : > { %s5044_s9 = sand.u32 1, %s6024_s23  }
 0x18e   : > { %s3163_s8 = sshll.u32 %s5044_s9, 6 }
 0x18f   : > { %s5047_s4 = scalar_lea.vmem [#allocation6], %s3163_s8 }
 0x190   : > { %4458 = dma.done.wait (%p6025_p5), %s499_s15, 1024  }
 0x191   : > { %4460 = vsyncadd (%p6025_p5), %s499_s15, 4294966272  ;;  %p6026_p6 = scmp.eq.s32.totalorder %s4664_s28, 0 }
 0x193   : > { %4462 = dma.done.wait (%p6026_p6), [#allocation7], 512   ;;  %p6027_p0 = pmov %p6026_p6 }
 0x195   : > { %4464 = vsyncadd (%p6027_p0), [#allocation7], 4294966784  ;;  %p6028_p4 = pmov %p6027_p0 }
 0x196   : > { %p6029_p2 = pmov %p6027_p0 }
 0x197   : > { %4466 = dma.done.wait (%p6028_p4), [#allocation10], 32  }
 0x198   : > { %4468 = vsyncadd (%p6029_p2), [#allocation10], 4294967264  ;;  %p6030_p13 = pmov %p6027_p0 }
 0x199   : > { %p6031_p1 = pmov %p6027_p0 }
 0x19a   : > { %4470 = dma.done.wait (%p6030_p13), [#allocation13], 2320  }
 0x19b   : > { %4472 = vsyncadd (%p6031_p1), [#allocation13], 4294964976  ;;  %p6032_p11 = pmov %p6027_p0 }
 0x19c   : > { %p6033_p8 = pmov %p6027_p0 }
 0x19d   : > { %4474 = dma.done.wait (%p6032_p11), [#allocation16], 272  }
 0x19e   : > { %4476 = vsyncadd (%p6033_p8), [#allocation16], 4294967024  ;;  %p6034_p12 = pmov %p6027_p0 }
 0x19f   : > { %p6035_p3 = pmov %p6027_p0 }
 0x1a0   : > { %4478 = dma.done.wait (%p6034_p12), [#allocation19], 32  }
 0x1a1   : > { %4480 = vsyncadd (%p6035_p3), [#allocation19], 4294967264  ;;  %s6036_s12 = sld [smem:[#allocation33_spill]]  ;;  %vm1402_vm0 = vcmask 261120   ;;  %v4025_v0 = vld [vmem:[#allocation8] sm:$0xff]   ;;  %v4026_v1 = vld [vmem:[#allocation8 + $0x8] sm:$0xff]   ;;  %v1159_v26 = vlaneseq }
 0x1a2   : > { %3488 = vmatprep.subr.bf16.mxu0 %v4025_v0  ;;  %v4027_v2 = vld [vmem:[#allocation8 + $0x10] sm:$0xff]   ;;  %vm761_vm1 = vcmask 523264   ;;  %v4028_v4 = vld [vmem:[#allocation8 + $0x18] sm:$0xff]   ;;  %v4049_v24 = vld [vmem:[#allocation12 + $0x80] sm:$0xff]   ;;  %s4542_s24 = smov 64   ;;  %s4543_s17 = smov 32  }
 0x1a3   : > { %3489 = vmatpush3.bf16.msra.mxu0 %v4025_v0  ;;  %v4050_v25 = vld [vmem:[#allocation12 + $0x88] sm:$0xff]   ;;  %v5117_v27 = vshrl.u32 %v1159_v26, 7  ;;  %v4051_v28 = vld [vmem:[#allocation12 + $0x40] sm:$0xff]   ;;  %v5124_v33 = vld [vmem:[#allocation9] ss:$0 sm:$0xff]  ;;  %s4544_s30 = smov 96  }
 0x1a4   : > { %3490 = vmatprep.subr.bf16.mxu0 %v4026_v1  ;;  %v4052_v29 = vld [vmem:[#allocation12] sm:$0xff]   ;;  %v4053_v30 = vld [vmem:[#allocation12 + $0x48] sm:$0xff]   ;;  %3404 = vmatprep.subr.bf16.mxu1 %v4051_v28  ;;  %v5128_v35 = vld [vmem:[#allocation11] ss:$0 sm:$0xff]  ;;  %s3173_s16 = sshll.u32 %s5044_s9, 7  ;;  %s6061_s20 = sld [smem:[#allocation34_spill]] }
 0x1a5   : > { %v5122_v32 = vadd.s32 16, %v5117_v27  ;;  %3405 = vmatpush3.bf16.msra.mxu1 %v4052_v29  ;;  %vm1194_vm6 = vcmp.ge.s32.totalorder %v5117_v27, 1  ;;  %v4054_v50 = vld [vmem:[#allocation12 + $0x8] sm:$0xff]   ;;  %v4055_v61 = vld [vmem:[#allocation12 + $0x50] sm:$0xff]   ;;  %v4060_v28 = vld [vmem:[#allocation12 + $0x20] sm:$0xff]   ;;  %s5778_s13 = scalar_lea.vmem [#allocation21], %s3173_s16 }
 0x1a6   : > { %3406 = vmatprep.subr.bf16.mxu1 %v4053_v30  ;;  %v4056_v0 = vld [vmem:[#allocation12 + $0x10] sm:$0xff]   ;;  %s2939_s5 = sshll.u32 %s5778_s13, 4  ;;  %s6062_s7 = sld [smem:[#allocation50_spill]]  ;;  %s5868_s5 = int_to_ptr.vmem [resolvable:$true] %s2939_s5 }
 0x1a7   : > { %s3298_s19 = sshll.u32 %s6036_s12, 7  ;;  %3491 = vmatpush3.bf16.msra.mxu0 %v4026_v1  ;;  %s3174_s28 = sshll.u32 %s6036_s12, 3  ;;  %vm1240_vm5 = vcmp.lt.s32.totalorder %v5122_v32, 17  ;;  %v4057_v1 = vld [vmem:[#allocation12 + $0x58] sm:$0xff]  }
 0x1a8   : > { %s5074_s10 = scalar_lea.vmem %s493_s6, %s3298_s19 [#allocation3]  ;;  %3492 = vmatprep.subr.bf16.mxu0 %v4027_v2  ;;  %v5119_v31 = vstv %s3174_s28  ;;  %s3300_s14 = sshll.u32 %s6036_s12, 4 }
 0x1a9   : > { %v4029_v3 = vld [vmem:[%s5074_s10] sm:$0xff]   ;;  %v4030_v5 = vld [vmem:[%s5074_s10 + $0x8] sm:$0xff]   ;;  %v4031_v6 = vld [vmem:[%s5074_s10 + $0x10] sm:$0xff]   ;;  %vm1164_vm2 = vcmp.ge.s32.totalorder %v5119_v31, 1  ;;  %vm1174_vm3 = vcmp.lt.s32.totalorder %v5119_v31, 17  ;;  %v1150_v41 = vadd.s32 1, %v5119_v31  ;;  %3407 = vmatpush3.bf16.msra.mxu1 %v4054_v50 }
 0x1aa   : > { %3496 = vmatprep.mubr.msk.bf16.mxu0 %vm761_vm1, %v4029_v3  ;;  %v4032_v7 = vld [vmem:[%s5074_s10 + $0x18] sm:$0xff]   ;;  %v4033_v8 = vld [vmem:[%s5074_s10 + $0x20] sm:$0xff]   ;;  %v4034_v9 = vld [vmem:[%s5074_s10 + $0x28] sm:$0xff]   ;;  %v1151_v60 = vadd.s32 2, %v5119_v31  ;;  %3408 = vmatprep.subr.bf16.mxu1 %v4055_v61  ;;  %s3292_s11 = sshll.u32 %s6061_s20, 5  ;;  %s2923_s15 = scalar_lea.sflag [#allocation5], %s5044_s9 }
 0x1ab   : > { %3493 = vmatpush3.bf16.msra.mxu0 %v4027_v2  ;;  %v4035_v10 = vld [vmem:[%s5074_s10 + $0x30] sm:$0xff]   ;;  %v4036_v11 = vld [vmem:[%s5074_s10 + $0x38] sm:$0xff]   ;;  %v4037_v12 = vld [vmem:[%s5074_s10 + $0x40] sm:$0xff]   ;;  %vm1165_vm9 = vcmp.ge.s32.totalorder %v1150_v41, 1  ;;  %vm1175_vm10 = vcmp.lt.s32.totalorder %v1150_v41, 17  ;;  %s2936_s18 = sadd.s32 %s3300_s14, %s3292_s11  ;;  %p6063_p7 = scmp.ne.s32.totalorder %s6012_s1, 0 }
 0x1ac   : > { %3494 = vmatprep.subr.bf16.mxu0 %v4028_v4  ;;  %v4038_v13 = vld [vmem:[%s5074_s10 + $0x48] sm:$0xff]   ;;  %v4039_v14 = vld [vmem:[%s5074_s10 + $0x50] sm:$0xff]   ;;  %v4040_v15 = vld [vmem:[%s5074_s10 + $0x58] sm:$0xff]   ;;  %vm1166_vm14 = vcmp.ge.s32.totalorder %v1151_v60, 1  ;;  %vm1176_vm15 = vcmp.lt.s32.totalorder %v1151_v60, 17  ;;  %s3293_s25 = sshll.u32 %s2936_s18, 7 }
 0x1ad   : > { %v4041_v16 = vld [vmem:[%s5074_s10 + $0x60] sm:$0xff]   ;;  %v4042_v17 = vld [vmem:[%s5074_s10 + $0x68] sm:$0xff]   ;;  %v4043_v18 = vld [vmem:[%s5074_s10 + $0x70] sm:$0xff]   ;;  %3409 = vmatpush3.bf16.msra.mxu1 %v4056_v0  ;;  %s5866_s8 = scalar_lea.hbm %s6062_s7, %s3293_s25  ;;  %s4545_s12 = smov [#allocation21]  }
 0x1ae   : > { %v4044_v19 = vld [vmem:[%s5074_s10 + $0x78] sm:$0xff]   ;;  %v4045_v20 = vld [vmem:[%s5074_s10 + $0x80] sm:$0xff]   ;;  %v4046_v21 = vld [vmem:[%s5074_s10 + $0x88] sm:$0xff]   ;;  %3410 = vmatprep.subr.bf16.mxu1 %v4057_v1  ;;  %s4385_s19 = sshll.u32 %s4545_s12, 4  ;;  %s4386_s19 = int_to_ptr.vmem [resolvable:$false] %s4385_s19 }
 0x1af   : > { %3495 = vmatpush3.bf16.msra.mxu0 %v4028_v4  ;;  %v4047_v22 = vld [vmem:[%s5074_s10 + $0x90] sm:$0xff]   ;;  %v4048_v23 = vld [vmem:[%s5074_s10 + $0x98] sm:$0xff]   ;;  %vm5131_vm4 = vmand %vm1164_vm2, %vm1174_vm3  ;;  %p4388_p6 = scmp.lt.s32.totalorder %s5868_s5, %s4386_s19 }
 0x1b0   : > { %3536 = vmatprep.subr.bf16.mxu0 %v4049_v24  ;;  %vm1244_vm7 = vmand %vm5131_vm4, %vm1240_vm5 }
 0x1b1   : > { %vm1198_vm8 = vmand %vm5131_vm4, %vm1194_vm6 }
 0x1b2   : > { %3497 = vmatmul.mubr.msk.bf16.vlgmr.msra.gmra.mrb[0].mxu0 %vm761_vm1, %v4030_v5  ;;  %vm5154_vm11 = vmand %vm1165_vm9, %vm1175_vm10 }
 0x1b3   : > { %3500 = vmatprep.mubr.msk.bf16.mxu0 %vm761_vm1, %v4031_v6  ;;  %3537 = vmatpush3.bf16.msra.mxu0 %v4049_v24  ;;  %vm1248_vm12 = vmand %vm5154_vm11, %vm1240_vm5 }
 0x1b4   : > { %3538 = vmatprep.subr.bf16.mxu0 %v4050_v25  ;;  %vm1202_vm13 = vmand %vm5154_vm11, %vm1194_vm6 }
 0x1b5   : > { %vm5178_vm2 = vmand %vm1166_vm14, %vm1176_vm15 }
 0x1b6   : > { %vm5192_vm3 = vmand %vm5178_vm2, %vm1240_vm5 }
 0x1b7   : > { %3539 = vmatpush3.bf16.msra.mxu0 %v4050_v25 }
 0x1ba   : > { %3501 = vmatmul.mubr.msk.bf16.gmra.mrb[4].mxu0 %vm761_vm1, %v4032_v7 }
 0x1bb   : > { %3504 = vmatprep.mubr.msk.bf16.mxu0 %vm761_vm1, %v4033_v8  ;;  %v4058_v8 = vld [vmem:[#allocation12 + $0x18] sm:$0xff]  }
 0x1bc   : > { %3411 = vmatpush3.bf16.msra.mxu1 %v4058_v8 }
 0x1c2   : > { %3505 = vmatmul.mubr.msk.bf16.gmra.mrb[8].mxu0 %vm761_vm1, %v4034_v9 }
 0x1c3   : > { %3508 = vmatprep.mubr.msk.bf16.mxu0 %vm761_vm1, %v4035_v10 }
 0x1ca   : > { %3509 = vmatmul.mubr.msk.bf16.gmra.mrb[12].mxu0 %vm761_vm1, %v4036_v11 }
 0x1cb   : > { %3512 = vmatprep.mubr.msk.bf16.mxu0 %vm761_vm1, %v4037_v12  ;;  %v4059_v12 = vld [vmem:[#allocation12 + $0x60] sm:$0xff]  }
 0x1cc   : > { %3412 = vmatprep.subr.bf16.mxu1 %v4059_v12 }
 0x1cd   : > { %3413 = vmatpush3.bf16.msra.mxu1 %v4060_v28 }
 0x1d2   : > { %3513 = vmatmul.mubr.msk.bf16.gmra.mrb[16].mxu0 %vm761_vm1, %v4038_v13 }
 0x1d3   : > { %3516 = vmatprep.mubr.msk.bf16.mxu0 %vm761_vm1, %v4039_v14 }
 0x1da   : > { %3517 = vmatmul.mubr.msk.bf16.gmra.mrb[20].mxu0 %vm761_vm1, %v4040_v15 }
 0x1db   : > { %3520 = vmatprep.mubr.msk.bf16.mxu0 %vm761_vm1, %v4041_v16  ;;  %v1152_v16 = vadd.s32 3, %v5119_v31 }
 0x1e2   : > { %3521 = vmatmul.mubr.msk.bf16.gmra.mrb[24].mxu0 %vm761_vm1, %v4042_v17 }
 0x1e3   : > { %3524 = vmatprep.mubr.msk.bf16.mxu0 %vm761_vm1, %v4043_v18 }
 0x1ea   : > { %3525 = vmatmul.mubr.msk.bf16.gmra.mrb[28].mxu0 %vm761_vm1, %v4044_v19 }
 0x1eb   : > { %3528 = vmatprep.mubr.msk.bf16.mxu0 %vm761_vm1, %v4045_v20 }
 0x1f2   : > { %3529 = vmatmul.mubr.msk.bf16.gmra.mrb[32].mxu0 %vm761_vm1, %v4046_v21 }
 0x1f3   : > { %3532 = vmatprep.mubr.msk.bf16.mxu0 %vm761_vm1, %v4047_v22 }
 0x1fa   : > { %3533 = vmatmul.mubr.msk.bf16.gmra.mrb[36].mxu0 %vm761_vm1, %v4048_v23 }
 0x285   : > { %v3498_v34 = vpop.f32.mrb[0].mxu0 }
 0x286   : > { %v1024_v36 = vmul.f32 %v3498_v34, %v5124_v33  ;;  %v856_v38 = vpop.f32.mrb[1].mxu0 }
 0x287   : > { %v1022_v39 = vmul.f32 %v5124_v33, %v856_v38  ;;  %v3499_v40 = vpop.f32.mrb[2].mxu0 }
 0x288   : > { %v1071_v42 = vadd.f32 %v5128_v35, %v1024_v36  ;;  %v859_v43 = vpop.f32.mrb[3].mxu0  ;;  %v4061_v40 = vld [vmem:[#allocation12 + $0x68] sm:$0xff]  }
 0x289   : > { %v1069_v44 = vadd.f32 %v5128_v35, %v1022_v39  ;;  %v1023_v45 = vmul.f32 %v5124_v33, %v859_v43  ;;  %3414 = vmatprep.subr.bf16.mxu1 %v4061_v40 }
 0x28a   : > { %v1111_v46 = vmax.f32 %v1071_v42, 0.0  ;;  %v4062_v42 = vld [vmem:[#allocation12 + $0x28] sm:$0xff]  }
 0x28b   : > { %v1109_v47 = vmax.f32 %v1069_v44, 0.0  ;;  %v1070_v48 = vadd.f32 %v5128_v35, %v1023_v45  ;;  %3415 = vmatpush3.bf16.msra.mxu1 %v4062_v42 }
 0x28c   : > { %v1364_v49 = vsel %vm1244_vm7, %v1111_v46, 0.0  ;;  %vm1167_vm7 = vcmp.ge.s32.totalorder %v1152_v16, 1 }
 0x28d   : > { %1405 = vst.msk [vmem:[#allocation2 + $0x10] sm:$0xff] %vm1402_vm0, %v1364_v49  ;;  %v1362_v51 = vsel %vm1198_vm8, %v1109_v47, 0.0  ;;  %v1110_v52 = vmax.f32 %v1070_v48, 0.0  ;;  %v3502_v53 = vpop.f32.mrb[4].mxu0  ;;  %vm1177_vm8 = vcmp.lt.s32.totalorder %v1152_v16, 17 }
 0x28e   : > { %1403 = vst.msk [vmem:[#allocation2] sm:$0xff] %vm1402_vm0, %v1362_v51  ;;  %v1028_v54 = vmul.f32 %v3502_v53, %v5124_v33  ;;  %v872_v56 = vpop.f32.mrb[5].mxu0  ;;  %vm5208_vm9 = vmand %vm1167_vm7, %vm1177_vm8 }
 0x28f   : > { %v1363_v57 = vsel %vm5131_vm4, %v1110_v52, 0.0  ;;  %v1026_v58 = vmul.f32 %v5124_v33, %v872_v56  ;;  %v3503_v59 = vpop.f32.mrb[6].mxu0  ;;  %vm1206_vm4 = vmand %vm5178_vm2, %vm1194_vm6  ;;  %v1153_v56 = vadd.s32 4, %v5119_v31 }
 0x290   : > { %1404 = vst.msk [vmem:[#allocation2 + $0x8] sm:$0xff] %vm1402_vm0, %v1363_v57  ;;  %v1075_v62 = vadd.f32 %v5128_v35, %v1028_v54  ;;  %v875_v63 = vpop.f32.mrb[7].mxu0  ;;  %vm5228_vm10 = vmand %vm5208_vm9, %vm1240_vm5 }
 0x291   : > { %v1073_v2 = vadd.f32 %v5128_v35, %v1026_v58  ;;  %v1027_v3 = vmul.f32 %v5124_v33, %v875_v63 }
 0x292   : > { %v1115_v4 = vmax.f32 %v1075_v62, 0.0  ;;  %v4063_v62 = vld [vmem:[#allocation12 + $0x70] sm:$0xff]  }
 0x293   : > { %v1113_v5 = vmax.f32 %v1073_v2, 0.0  ;;  %v1074_v6 = vadd.f32 %v5128_v35, %v1027_v3  ;;  %v4064_v3 = vld [vmem:[#allocation12 + $0x30] sm:$0xff]   ;;  %3416 = vmatprep.subr.bf16.mxu1 %v4063_v62 }
 0x294   : > { %v1368_v7 = vsel %vm1248_vm12, %v1115_v4, 0.0  ;;  %vm1168_vm12 = vcmp.ge.s32.totalorder %v1153_v56, 1  ;;  %3417 = vmatpush3.bf16.msra.mxu1 %v4064_v3 }
 0x295   : > { %1409 = vst.msk [vmem:[#allocation2 + $0x30] sm:$0xff] %vm1402_vm0, %v1368_v7  ;;  %v1366_v9 = vsel %vm1202_vm13, %v1113_v5, 0.0  ;;  %v1114_v10 = vmax.f32 %v1074_v6, 0.0  ;;  %v3506_v11 = vpop.f32.mrb[8].mxu0  ;;  %vm1178_vm13 = vcmp.lt.s32.totalorder %v1153_v56, 17  ;;  %v4065_v7 = vld [vmem:[#allocation12 + $0x78] sm:$0xff]  }
 0x296   : > { %1407 = vst.msk [vmem:[#allocation2 + $0x20] sm:$0xff] %vm1402_vm0, %v1366_v9  ;;  %v1032_v13 = vmul.f32 %v3506_v11, %v5124_v33  ;;  %v888_v15 = vpop.f32.mrb[9].mxu0  ;;  %3418 = vmatprep.subr.bf16.mxu1 %v4065_v7  ;;  %vm5257_vm14 = vmand %vm1168_vm12, %vm1178_vm13 }
 0x297   : > { %v1367_v17 = vsel %vm5154_vm11, %v1114_v10, 0.0  ;;  %v1030_v18 = vmul.f32 %v5124_v33, %v888_v15  ;;  %v3507_v19 = vpop.f32.mrb[10].mxu0  ;;  %v1475_v20 = vld [vmem:[#allocation2 + $0x2] sm:$0xff]  ;;  %v1476_v21 = vld [vmem:[#allocation2 + $0xa] sm:$0xff]  ;;  %vm1210_vm11 = vmand %vm5208_vm9, %vm1194_vm6 }
 0x298   : > { %v1459_v22 = vld [vmem:[#allocation2 + $0x1] sm:$0xff]  ;;  %1408 = vst.msk [vmem:[#allocation2 + $0x28] sm:$0xff] %vm1402_vm0, %v1367_v17  ;;  %v1079_v23 = vadd.f32 %v5128_v35, %v1032_v13  ;;  %v891_v24 = vpop.f32.mrb[11].mxu0  ;;  %v3790_v25 = vpack.i.bf16 %v1476_v21, %v1475_v20  ;;  %v1460_v26 = vld [vmem:[#allocation2 + $0x9] sm:$0xff]  ;;  %vm1260_vm15 = vmand %vm5257_vm14, %vm1240_vm5 }
 0x299   : > { %v1077_v30 = vadd.f32 %v5128_v35, %v1030_v18  ;;  %v1031_v34 = vmul.f32 %v5124_v33, %v891_v24  ;;  %v3785_v36 = vpack.i.bf16 %v1460_v26, %v1459_v22  ;;  %v4066_v10 = vld [vmem:[#allocation12 + $0x38] sm:$0xff]  }
 0x29a   : > { %v1119_v37 = vmax.f32 %v1079_v23, 0.0  ;;  %3791 = vrot.lane.b32.xlu1 %v3790_v25, %s4542_s24  ;;  %v1154_v23 = vadd.s32 5, %v5119_v31  ;;  %3419 = vmatpush3.bf16.msra.mxu1 %v4066_v10 }
 0x29b   : > { %v1117_v38 = vmax.f32 %v1077_v30, 0.0  ;;  %v1078_v39 = vadd.f32 %v5128_v35, %v1031_v34  ;;  %3786 = vrot.lane.b32.xlu0 %v3785_v36, %s4543_s17 }
 0x29c   : > { %v1372_v41 = vsel %vm5192_vm3, %v1119_v37, 0.0  ;;  %vm1169_vm3 = vcmp.ge.s32.totalorder %v1154_v23, 1 }
 0x29d   : > { %1413 = vst.msk [vmem:[#allocation2 + $0x50] sm:$0xff] %vm1402_vm0, %v1372_v41  ;;  %v1370_v43 = vsel %vm1206_vm4, %v1117_v38, 0.0  ;;  %v1118_v44 = vmax.f32 %v1078_v39, 0.0  ;;  %v3510_v45 = vpop.f32.mrb[12].mxu0  ;;  %v5214_v49 = vld [vmem:[#allocation2 + $0x20] sm:$0xff]  ;;  %vm1179_vm4 = vcmp.lt.s32.totalorder %v1154_v23, 17 }
 0x29e   : > { %1411 = vst.msk [vmem:[#allocation2 + $0x40] sm:$0xff] %vm1402_vm0, %v1370_v43  ;;  %v1036_v47 = vmul.f32 %v3510_v45, %v5124_v33  ;;  %v904_v48 = vpop.f32.mrb[13].mxu0  ;;  %vm5297_vm7 = vmand %vm1169_vm3, %vm1179_vm4  ;;  %v1156_v23 = vadd.s32 7, %v5119_v31 }
 0x29f   : > { %v1371_v50 = vsel %vm5178_vm2, %v1118_v44, 0.0  ;;  %v1034_v51 = vmul.f32 %v5124_v33, %v904_v48  ;;  %v3511_v52 = vpop.f32.mrb[14].mxu0  ;;  %v1524_v53 = vld [vmem:[#allocation2 + $0x22] sm:$0xff]  ;;  %v1525_v54 = vld [vmem:[#allocation2 + $0x2a] sm:$0xff]  ;;  %vm1214_vm2 = vmand %vm5257_vm14, %vm1194_vm6 }
 0x2a0   : > { %v5219_v55 = vld [vmem:[#allocation2 + $0x28] sm:$0xff]  ;;  %1412 = vst.msk [vmem:[#allocation2 + $0x48] sm:$0xff] %vm1402_vm0, %v1371_v50  ;;  %v1083_v57 = vadd.f32 %v5128_v35, %v1036_v47  ;;  %v907_v59 = vpop.f32.mrb[15].mxu0  ;;  %v3795_v60 = vpack.i.bf16 %v1525_v54, %v1524_v53  ;;  %vm1264_vm8 = vmand %vm5297_vm7, %vm1240_vm5 }
 0x2a1   : > { %v3800_v61 = vpack.i.bf16 %v5219_v55, %v5214_v49  ;;  %v1081_v63 = vadd.f32 %v5128_v35, %v1034_v51  ;;  %v1035_v0 = vmul.f32 %v5124_v33, %v907_v59  ;;  %v5236_v1 = vld [vmem:[#allocation2 + $0x21] sm:$0xff]  ;;  %v5238_v2 = vld [vmem:[#allocation2 + $0x29] sm:$0xff]  ;;  %v1155_v59 = vadd.s32 6, %v5119_v31 }
 0x2a2   : > { %v1123_v4 = vmax.f32 %v1083_v57, 0.0  ;;  %3796 = vrot.lane.b32.xlu0 %v3795_v60, %s4543_s17  ;;  %v3805_v9 = vpack.i.bf16 %v5238_v2, %v5236_v1 }
 0x2a3   : > { %3801 = vrot.lane.b32.xlu1 %v3800_v61, %s4544_s30  ;;  %v1121_v5 = vmax.f32 %v1081_v63, 0.0  ;;  %v1082_v6 = vadd.f32 %v5128_v35, %v1035_v0 }
 0x2a4   : > { %v1376_v8 = vsel %vm5228_vm10, %v1123_v4, 0.0  ;;  %vm1170_vm10 = vcmp.ge.s32.totalorder %v1155_v59, 1 }
 0x2a5   : > { %1417 = vst.msk [vmem:[#allocation2 + $0x70] sm:$0xff] %vm1402_vm0, %v1376_v8  ;;  %v1374_v11 = vsel %vm1210_vm11, %v1121_v5, 0.0  ;;  %v1122_v12 = vmax.f32 %v1082_v6, 0.0  ;;  %v3514_v13 = vpop.f32.mrb[16].mxu0  ;;  %v5289_v40 = vld [vmem:[#allocation2 + $0x40] sm:$0xff]  ;;  %vm1180_vm11 = vcmp.lt.s32.totalorder %v1155_v59, 17 }
 0x2a6   : > { %1415 = vst.msk [vmem:[#allocation2 + $0x60] sm:$0xff] %vm1402_vm0, %v1374_v11  ;;  %v1040_v14 = vmul.f32 %v3514_v13, %v5124_v33  ;;  %v920_v16 = vpop.f32.mrb[17].mxu0  ;;  %vm5338_vm12 = vmand %vm1170_vm10, %vm1180_vm11 }
 0x2a7   : > { %3806 = vrot.lane.b32.xlu1 %v3805_v9, %s4543_s17  ;;  %v1375_v17 = vsel %vm5208_vm9, %v1122_v12, 0.0  ;;  %v1038_v18 = vmul.f32 %v5124_v33, %v920_v16  ;;  %v3515_v19 = vpop.f32.mrb[18].mxu0  ;;  %v1573_v20 = vld [vmem:[#allocation2 + $0x42] sm:$0xff]  ;;  %v1574_v21 = vld [vmem:[#allocation2 + $0x4a] sm:$0xff]  ;;  %vm1218_vm9 = vmand %vm5297_vm7, %vm1194_vm6 }
 0x2a8   : > { %v5264_v22 = vld [vmem:[#allocation2 + $0x41] sm:$0xff]  ;;  %1416 = vst.msk [vmem:[#allocation2 + $0x68] sm:$0xff] %vm1402_vm0, %v1375_v17  ;;  %v1087_v24 = vadd.f32 %v5128_v35, %v1040_v14  ;;  %v923_v25 = vpop.f32.mrb[19].mxu0  ;;  %v2072_v26 = vpack.c.bf16 %v1574_v21, %v1573_v20  ;;  %v5269_v28 = vld [vmem:[#allocation2 + $0x49] sm:$0xff]  ;;  %v3825_v45 = vpack.i.bf16 %v1574_v21, %v1573_v20  ;;  %vm1268_vm13 = vmand %vm5338_vm12, %vm1240_vm5 }
 0x2a9   : > { %v1085_v29 = vadd.f32 %v5128_v35, %v1038_v18  ;;  %v1039_v30 = vmul.f32 %v5124_v33, %v923_v25  ;;  %v3820_v34 = vpack.i.bf16 %v5269_v28, %v5264_v22  ;;  %v5279_v36 = vld [vmem:[#allocation2 + $0x48] sm:$0xff] }
 0x2aa   : > { %v1127_v37 = vmax.f32 %v1087_v24, 0.0  ;;  %3540 = vmatprep.mubr.msk.bf16.mxu0 %vm1402_vm0, %v2072_v26  ;;  %v3815_v42 = vpack.i.bf16 %v5279_v36, %v5289_v40 }
 0x2ab   : > { %3811 = vrot.lane.b32.xlu1 %v3795_v60, %s4542_s24  ;;  %v1125_v38 = vmax.f32 %v1085_v29, 0.0  ;;  %v1086_v39 = vadd.f32 %v5128_v35, %v1039_v30  ;;  %3821 = vrot.lane.b32.xlu0 %v3820_v34, %s4544_s30 }
 0x2ac   : > { %v1380_v41 = vsel %vm1260_vm15, %v1127_v37, 0.0  ;;  %vm1171_vm15 = vcmp.ge.s32.totalorder %v1156_v23, 1 }
 0x2ad   : > { %1421 = vst.msk [vmem:[#allocation2 + $0x90] sm:$0xff] %vm1402_vm0, %v1380_v41  ;;  %v1378_v43 = vsel %vm1214_vm2, %v1125_v38, 0.0  ;;  %v1126_v44 = vmax.f32 %v1086_v39, 0.0  ;;  %v3518_v46 = vpop.f32.mrb[20].mxu0  ;;  %v5301_v51 = vld [vmem:[#allocation2 + $0x60] sm:$0xff]  ;;  %vm1181_vm2 = vcmp.lt.s32.totalorder %v1156_v23, 17 }
 0x2ae   : > { %1419 = vst.msk [vmem:[#allocation2 + $0x80] sm:$0xff] %vm1402_vm0, %v1378_v43  ;;  %v1044_v47 = vmul.f32 %v3518_v46, %v5124_v33  ;;  %v936_v50 = vpop.f32.mrb[21].mxu0  ;;  %vm5379_vm3 = vmand %vm1171_vm15, %vm1181_vm2 }
 0x2af   : > { %3816 = vrot.lane.b32.xlu1 %v3815_v42, %s4542_s24  ;;  %v1379_v52 = vsel %vm5257_vm14, %v1126_v44, 0.0  ;;  %3826 = vrot.lane.b32.xlu0 %v3825_v45, %s4543_s17  ;;  %v1042_v53 = vmul.f32 %v5124_v33, %v936_v50  ;;  %v3519_v54 = vpop.f32.mrb[22].mxu0  ;;  %v1575_v56 = vld [vmem:[#allocation2 + $0x62] sm:$0xff]  ;;  %v1576_v57 = vld [vmem:[#allocation2 + $0x6a] sm:$0xff]  ;;  %vm1222_vm14 = vmand %vm5338_vm12, %vm1194_vm6 }
 0x2b0   : > { %v5307_v58 = vld [vmem:[#allocation2 + $0x68] sm:$0xff]  ;;  %1420 = vst.msk [vmem:[#allocation2 + $0x88] sm:$0xff] %vm1402_vm0, %v1379_v52  ;;  %v1091_v60 = vadd.f32 %v5128_v35, %v1044_v47  ;;  %v2075_v61 = vpack.c.bf16 %v1576_v57, %v1575_v56  ;;  %v939_v63 = vpop.f32.mrb[23].mxu0  ;;  %v3855_v29 = vpack.i.bf16 %v1576_v57, %v1575_v56  ;;  %vm1272_vm4 = vmand %vm5379_vm3, %vm1240_vm5 }
 0x2b1   : > { %v3845_v62 = vpack.i.bf16 %v5307_v58, %v5301_v51  ;;  %v1089_v0 = vadd.f32 %v5128_v35, %v1042_v53  ;;  %v1043_v3 = vmul.f32 %v5124_v33, %v939_v63  ;;  %v5326_v5 = vld [vmem:[#allocation2 + $0x61] sm:$0xff]  ;;  %v5328_v6 = vld [vmem:[#allocation2 + $0x69] sm:$0xff] }
 0x2b2   : > { %v1131_v4 = vmax.f32 %v1091_v60, 0.0  ;;  %3541 = vmatmul.mubr.msk.bf16.vlgmr.msra.gmra.mrb[40].mxu0 %vm1402_vm0, %v2075_v61  ;;  %v3850_v12 = vpack.i.bf16 %v5328_v6, %v5326_v5 }
 0x2b3   : > { %3831 = vrot.lane.b32.xlu1 %v3815_v42, %s4544_s30  ;;  %v1129_v7 = vmax.f32 %v1089_v0, 0.0  ;;  %3846 = vrot.lane.b32.xlu0 %v3845_v62, %s4542_s24  ;;  %v1090_v8 = vadd.f32 %v5128_v35, %v1043_v3 }
 0x2b4   : > { %v1384_v9 = vsel %vm1264_vm8, %v1131_v4, 0.0 }
 0x2b5   : > { %1425 = vst.msk [vmem:[#allocation2 + $0xb0] sm:$0xff] %vm1402_vm0, %v1384_v9  ;;  %v1382_v10 = vsel %vm1218_vm9, %v1129_v7, 0.0  ;;  %v1130_v11 = vmax.f32 %v1090_v8, 0.0  ;;  %v3522_v13 = vpop.f32.mrb[24].mxu0  ;;  %v5357_v37 = vld [vmem:[#allocation2 + $0x80] sm:$0xff] }
 0x2b6   : > { %1423 = vst.msk [vmem:[#allocation2 + $0xa0] sm:$0xff] %vm1402_vm0, %v1382_v10  ;;  %v1048_v14 = vmul.f32 %v3522_v13, %v5124_v33  ;;  %v952_v16 = vpop.f32.mrb[25].mxu0 }
 0x2b7   : > { %3836 = vrot.lane.b32.xlu1 %v3820_v34, %s4543_s17  ;;  %v1383_v17 = vsel %vm5297_vm7, %v1130_v11, 0.0  ;;  %3851 = vrot.lane.b32.xlu0 %v3850_v12, %s4544_s30  ;;  %v1577_v18 = vld [vmem:[#allocation2 + $0x82] sm:$0xff]  ;;  %v1578_v19 = vld [vmem:[#allocation2 + $0x8a] sm:$0xff]  ;;  %v1046_v20 = vmul.f32 %v5124_v33, %v952_v16  ;;  %v3523_v21 = vpop.f32.mrb[26].mxu0  ;;  %vm1226_vm7 = vmand %vm5379_vm3, %vm1194_vm6 }
 0x2b8   : > { %1424 = vst.msk [vmem:[#allocation2 + $0xa8] sm:$0xff] %vm1402_vm0, %v1383_v17  ;;  %v2078_v24 = vpack.c.bf16 %v1578_v19, %v1577_v18  ;;  %v1095_v25 = vadd.f32 %v5128_v35, %v1048_v14  ;;  %v955_v26 = vpop.f32.mrb[27].mxu0  ;;  %v5359_v38 = vld [vmem:[#allocation2 + $0x88] sm:$0xff]  ;;  %v5413_v14 = vpack.i.bf16 %v1578_v19, %v1577_v18 }
 0x2b9   : > { %v1093_v30 = vadd.f32 %v5128_v35, %v1046_v20  ;;  %v1047_v34 = vmul.f32 %v5124_v33, %v955_v26  ;;  %v5369_v44 = vpack.i.bf16 %v5359_v38, %v5357_v37  ;;  %v5374_v48 = vld [vmem:[#allocation2 + $0x81] sm:$0xff]  ;;  %v5376_v50 = vld [vmem:[#allocation2 + $0x89] sm:$0xff] }
 0x2ba   : > { %3544 = vmatprep.mubr.msk.bf16.mxu0 %vm1402_vm0, %v2078_v24  ;;  %v1135_v39 = vmax.f32 %v1095_v25, 0.0  ;;  %v3880_v4 = vpack.i.bf16 %v5376_v50, %v5374_v48 }
 0x2bb   : > { %3841 = vrot.lane.b32.xlu1 %v3825_v45, %s4542_s24  ;;  %3856 = vrot.lane.b32.xlu0 %v3855_v29, %s4543_s17  ;;  %v1133_v41 = vmax.f32 %v1093_v30, 0.0  ;;  %v1094_v42 = vadd.f32 %v5128_v35, %v1047_v34  ;;  %v1158_v30 = vadd.s32 9, %v5119_v31 }
 0x2bc   : > { %v1388_v43 = vsel %vm1268_vm13, %v1135_v39, 0.0 }
 0x2bd   : > { %1429 = vst.msk [vmem:[#allocation2 + $0xd0] sm:$0xff] %vm1402_vm0, %v1388_v43  ;;  %v1386_v45 = vsel %vm1222_vm14, %v1133_v41, 0.0  ;;  %v1134_v46 = vmax.f32 %v1094_v42, 0.0  ;;  %v3526_v47 = vpop.f32.mrb[28].mxu0  ;;  %v5418_v17 = vld [vmem:[#allocation2 + $0xa0] sm:$0xff]  ;;  %vm1173_vm13 = vcmp.ge.s32.totalorder %v1158_v30, 1 }
 0x2be   : > { %1427 = vst.msk [vmem:[#allocation2 + $0xc0] sm:$0xff] %vm1402_vm0, %v1386_v45  ;;  %v1052_v52 = vmul.f32 %v3526_v47, %v5124_v33  ;;  %v968_v54 = vpop.f32.mrb[29].mxu0  ;;  %vm1183_vm14 = vcmp.lt.s32.totalorder %v1158_v30, 17 }
 0x2bf   : > { %3861 = vrot.lane.b32.xlu1 %v3845_v62, %s4544_s30  ;;  %3876 = vrot.lane.b32.xlu0 %v5369_v44, %s4542_s24  ;;  %v1387_v56 = vsel %vm5338_vm12, %v1134_v46, 0.0  ;;  %v5387_v57 = vld [vmem:[#allocation2 + $0xa2] sm:$0xff]  ;;  %v5389_v59 = vld [vmem:[#allocation2 + $0xaa] sm:$0xff]  ;;  %v1050_v60 = vmul.f32 %v5124_v33, %v968_v54  ;;  %v3527_v61 = vpop.f32.mrb[30].mxu0  ;;  %v1157_v62 = vadd.s32 8, %v5119_v31  ;;  %vm5468_vm15 = vmand %vm1173_vm13, %vm1183_vm14 }
 0x2c0   : > { %1428 = vst.msk [vmem:[#allocation2 + $0xc8] sm:$0xff] %vm1402_vm0, %v1387_v56  ;;  %v2081_v63 = vpack.c.bf16 %v5389_v59, %v5387_v57  ;;  %v1099_v0 = vadd.f32 %v5128_v35, %v1052_v52  ;;  %v971_v3 = vpop.f32.mrb[31].mxu0  ;;  %v5420_v20 = vld [vmem:[#allocation2 + $0xa8] sm:$0xff]  ;;  %vm1280_vm2 = vmand %vm5468_vm15, %vm1240_vm5 }
 0x2c1   : > { %v1097_v7 = vadd.f32 %v5128_v35, %v1050_v60  ;;  %v1051_v8 = vmul.f32 %v5124_v33, %v971_v3  ;;  %vm1172_vm8 = vcmp.ge.s32.totalorder %v1157_v62, 1  ;;  %vm1182_vm9 = vcmp.lt.s32.totalorder %v1157_v62, 17  ;;  %v5451_v45 = vld [vmem:[#allocation2 + $0xa1] sm:$0xff]  ;;  %v5453_v46 = vld [vmem:[#allocation2 + $0xa9] sm:$0xff] }
 0x2c2   : > { %3545 = vmatmul.mubr.msk.bf16.gmra.mrb[44].mxu0 %vm1402_vm0, %v2081_v63  ;;  %v1139_v9 = vmax.f32 %v1099_v0, 0.0  ;;  %vm5423_vm10 = vmand %vm1172_vm8, %vm1182_vm9  ;;  %v3905_v42 = vpack.i.bf16 %v5420_v20, %v5418_v17  ;;  %v3910_v54 = vpack.i.bf16 %v5453_v46, %v5451_v45 }
 0x2c3   : > { %3866 = vrot.lane.b32.xlu1 %v3850_v12, %s4543_s17  ;;  %3881 = vrot.lane.b32.xlu0 %v3880_v4, %s4544_s30  ;;  %v1137_v10 = vmax.f32 %v1097_v7, 0.0  ;;  %v1098_v11 = vadd.f32 %v5128_v35, %v1051_v8  ;;  %vm1276_vm11 = vmand %vm5423_vm10, %vm1240_vm5  ;;  %vm2005_vm5 = vcmask 785408  }
 0x2c4   : > { %v1392_v13 = vsel %vm1272_vm4, %v1139_v9, 0.0  ;;  %vm1230_vm12 = vmand %vm5423_vm10, %vm1194_vm6 }
 0x2c5   : > { %1433 = vst.msk [vmem:[#allocation2 + $0xf0] sm:$0xff] %vm1402_vm0, %v1392_v13  ;;  %v1390_v12 = vsel %vm1226_vm7, %v1137_v10, 0.0  ;;  %v1138_v15 = vmax.f32 %v1098_v11, 0.0  ;;  %v3530_v16 = vpop.f32.mrb[32].mxu0 }
 0x2c6   : > { %1431 = vst.msk [vmem:[#allocation2 + $0xe0] sm:$0xff] %vm1402_vm0, %v1390_v12  ;;  %v1056_v21 = vmul.f32 %v3530_v16, %v5124_v33  ;;  %v984_v18 = vpop.f32.mrb[33].mxu0  ;;  %v3915_v12 = vpack.i.bf16 %v5389_v59, %v5387_v57 }
 0x2c7   : > { %3871 = vrot.lane.b32.xlu1 %v3855_v29, %s4542_s24  ;;  %3886 = vrot.lane.b32.xlu0 %v5413_v14, %s4543_s17  ;;  %v1391_v19 = vsel %vm5379_vm3, %v1138_v15, 0.0  ;;  %v5431_v24 = vld [vmem:[#allocation2 + $0xc2] sm:$0xff]  ;;  %v5433_v25 = vld [vmem:[#allocation2 + $0xca] sm:$0xff]  ;;  %v1054_v26 = vmul.f32 %v5124_v33, %v984_v18  ;;  %v3531_v29 = vpop.f32.mrb[34].mxu0  ;;  %vm1234_vm3 = vmand %vm5468_vm15, %vm1194_vm6 }
 0x2c8   : > { %1432 = vst.msk [vmem:[#allocation2 + $0xe8] sm:$0xff] %vm1402_vm0, %v1391_v19  ;;  %v2084_v34 = vpack.c.bf16 %v5433_v25, %v5431_v24  ;;  %v1103_v39 = vadd.f32 %v5128_v35, %v1056_v21  ;;  %v987_v41 = vpop.f32.mrb[35].mxu0  ;;  %v5488_v21 = vld [vmem:[#allocation2 + $0xc0] sm:$0xff]  ;;  %v5490_v23 = vld [vmem:[#allocation2 + $0xc8] sm:$0xff] }
 0x2c9   : > { %v1101_v43 = vadd.f32 %v5128_v35, %v1054_v26  ;;  %v1055_v31 = vmul.f32 %v5124_v33, %v987_v41  ;;  %v3935_v59 = vpack.i.bf16 %v5490_v23, %v5488_v21  ;;  %v5503_v26 = vld [vmem:[#allocation2 + $0xc1] sm:$0xff]  ;;  %v5505_v27 = vld [vmem:[#allocation2 + $0xc9] sm:$0xff]  ;;  %v3945_v41 = vpack.i.bf16 %v5433_v25, %v5431_v24 }
 0x2ca   : > { %3548 = vmatprep.mubr.msk.bf16.mxu0 %vm1402_vm0, %v2084_v34  ;;  %v1143_v47 = vmax.f32 %v1103_v39, 0.0  ;;  %v3940_v39 = vpack.i.bf16 %v5505_v27, %v5503_v26 }
 0x2cb   : > { %3891 = vrot.lane.b32.xlu1 %v5369_v44, %s4544_s30  ;;  %3906 = vrot.lane.b32.xlu0 %v3905_v42, %s4542_s24  ;;  %v1141_v52 = vmax.f32 %v1101_v43, 0.0  ;;  %v1102_v53 = vadd.f32 %v5128_v35, %v1055_v31 }
 0x2cc   : > { %v1396_v44 = vsel %vm1276_vm11, %v1143_v47, 0.0 }
 0x2cd   : > { %1437 = vst.msk [vmem:[#allocation2 + $0x110] sm:$0xff] %vm1402_vm0, %v1396_v44  ;;  %v1394_v56 = vsel %vm1230_vm12, %v1141_v52, 0.0  ;;  %v1142_v60 = vmax.f32 %v1102_v53, 0.0  ;;  %v3534_v61 = vpop.f32.mrb[36].mxu0 }
 0x2ce   : > { %1435 = vst.msk [vmem:[#allocation2 + $0x100] sm:$0xff] %vm1402_vm0, %v1394_v56  ;;  %v1060_v62 = vmul.f32 %v3534_v61, %v5124_v33  ;;  %v1000_v0 = vpop.f32.mrb[37].mxu0 }
 0x2cf   : > { %3896 = vrot.lane.b32.xlu1 %v3880_v4, %s4543_s17  ;;  %3911 = vrot.lane.b32.xlu0 %v3910_v54, %s4544_s30  ;;  %v1395_v3 = vsel %vm5423_vm10, %v1142_v60, 0.0  ;;  %v1583_v7 = vld [vmem:[#allocation2 + $0xe2] sm:$0xff]  ;;  %v1584_v8 = vld [vmem:[#allocation2 + $0xea] sm:$0xff]  ;;  %v1058_v9 = vmul.f32 %v5124_v33, %v1000_v0  ;;  %v3535_v10 = vpop.f32.mrb[38].mxu0 }
 0x2d0   : > { %1436 = vst.msk [vmem:[#allocation2 + $0x108] sm:$0xff] %vm1402_vm0, %v1395_v3  ;;  %v2087_v4 = vpack.c.bf16 %v1584_v8, %v1583_v7  ;;  %v1107_v11 = vadd.f32 %v5128_v35, %v1060_v62  ;;  %v1003_v13 = vpop.f32.mrb[39].mxu0  ;;  %v5522_v43 = vld [vmem:[#allocation2 + $0xe8] sm:$0xff]  ;;  %v3975_v25 = vpack.i.bf16 %v1584_v8, %v1583_v7 }
 0x2d1   : > { %v1105_v15 = vadd.f32 %v5128_v35, %v1058_v9  ;;  %v1059_v16 = vmul.f32 %v5124_v33, %v1003_v13  ;;  %v5528_v44 = vld [vmem:[#allocation2 + $0xe1] sm:$0xff] }
 0x2d2   : > { %3549 = vmatmul.mubr.msk.bf16.gmra.mrb[48].mxu0 %vm1402_vm0, %v2087_v4  ;;  %v1147_v18 = vmax.f32 %v1107_v11, 0.0 }
 0x2d3   : > { %3901 = vrot.lane.b32.xlu1 %v5413_v14, %s4542_s24  ;;  %3916 = vrot.lane.b32.xlu0 %v3915_v12, %s4543_s17  ;;  %v1145_v32 = vmax.f32 %v1105_v15, 0.0  ;;  %v1106_v33 = vadd.f32 %v5128_v35, %v1059_v16 }
 0x2d4   : > { %v1400_v57 = vsel %vm1280_vm2, %v1147_v18, 0.0 }
 0x2d5   : > { %1441 = vst.msk [vmem:[#allocation2 + $0x130] sm:$0xff] %vm1402_vm0, %v1400_v57  ;;  %v1398_v14 = vsel %vm1234_vm3, %v1145_v32, 0.0  ;;  %v1146_v19 = vmax.f32 %v1106_v33, 0.0  ;;  %v1553_v56 = vld [vmem:[#allocation2 + $0x100] sm:$0xff] }
 0x2d6   : > { %1439 = vst.msk [vmem:[#allocation2 + $0x120] sm:$0xff] %vm1402_vm0, %v1398_v14 }
 0x2d7   : > { %3921 = vrot.lane.b32.xlu1 %v3905_v42, %s4544_s30  ;;  %3936 = vrot.lane.b32.xlu0 %v3935_v59, %s4542_s24  ;;  %v1399_v35 = vsel %vm5468_vm15, %v1146_v19, 0.0  ;;  %v1585_v29 = vld [vmem:[#allocation2 + $0x102] sm:$0xff]  ;;  %v1586_v30 = vld [vmem:[#allocation2 + $0x10a] sm:$0xff] }
 0x2d8   : > { %1440 = vst.msk [vmem:[#allocation2 + $0x128] sm:$0xff] %vm1402_vm0, %v1399_v35  ;;  %v2090_v34 = vpack.c.bf16 %v1586_v30, %v1585_v29  ;;  %v5520_v42 = vld [vmem:[#allocation2 + $0xe0] sm:$0xff]  ;;  %v1554_v60 = vld [vmem:[#allocation2 + $0x108] sm:$0xff]  ;;  %v4005_v3 = vpack.i.bf16 %v1586_v30, %v1585_v29 }
 0x2d9   : > { %v3965_v53 = vpack.i.bf16 %v5522_v43, %v5520_v42  ;;  %v3995_v61 = vpack.i.bf16 %v1554_v60, %v1553_v56  ;;  %v5541_v62 = vld [vmem:[#allocation2 + $0x101] sm:$0xff]  ;;  %v5543_v63 = vld [vmem:[#allocation2 + $0x109] sm:$0xff] }
 0x2da   : > { %3552 = vmatprep.mubr.msk.bf16.mxu0 %vm1402_vm0, %v2090_v34  ;;  %v4000_v0 = vpack.i.bf16 %v5543_v63, %v5541_v62  ;;  %v1443_v19 = vld [vmem:[#allocation2] sm:$0xff]  ;;  %v1444_v35 = vld [vmem:[#allocation2 + $0x8] sm:$0xff] }
 0x2db   : > { %3926 = vrot.lane.b32.xlu1 %v3910_v54, %s4543_s17  ;;  %3941 = vrot.lane.b32.xlu0 %v3940_v39, %s4544_s30  ;;  %v5530_v54 = vld [vmem:[#allocation2 + $0xe9] sm:$0xff] }
 0x2dc   : > { %v3970_v24 = vpack.i.bf16 %v5530_v54, %v5528_v44 }
 0x2dd   : > { %v1555_v7 = vld [vmem:[#allocation2 + $0x120] sm:$0xff] }
 0x2df   : > { %3931 = vrot.lane.b32.xlu1 %v3915_v12, %s4542_s24  ;;  %3946 = vrot.lane.b32.xlu0 %v3945_v41, %s4543_s17  ;;  %v1587_v31 = vld [vmem:[#allocation2 + $0x122] sm:$0xff]  ;;  %v1588_v47 = vld [vmem:[#allocation2 + $0x12a] sm:$0xff] }
 0x2e0   : > { %v2093_v52 = vpack.c.bf16 %v1588_v47, %v1587_v31  ;;  %v1556_v8 = vld [vmem:[#allocation2 + $0x128] sm:$0xff] }
 0x2e1   : > { %v4010_v9 = vpack.i.bf16 %v1556_v8, %v1555_v7  ;;  %v1571_v10 = vld [vmem:[#allocation2 + $0x121] sm:$0xff]  ;;  %v1572_v4 = vld [vmem:[#allocation2 + $0x129] sm:$0xff] }
 0x2e2   : > { %3553 = vmatmul.mubr.msk.bf16.gmra.mrb[52].mxu0 %vm1402_vm0, %v2093_v52  ;;  %v4015_v11 = vpack.i.bf16 %v1572_v4, %v1571_v10 }
 0x2e3   : > { %3951 = vrot.lane.b32.xlu1 %v3935_v59, %s4544_s30  ;;  %3966 = vrot.lane.b32.xlu0 %v3965_v53, %s4542_s24 }
 0x2e7   : > { %3956 = vrot.lane.b32.xlu1 %v3940_v39, %s4543_s17  ;;  %3971 = vrot.lane.b32.xlu0 %v3970_v24, %s4544_s30 }
 0x2eb   : > { %3961 = vrot.lane.b32.xlu1 %v3945_v41, %s4542_s24  ;;  %3976 = vrot.lane.b32.xlu0 %v3975_v25, %s4543_s17 }
 0x2ef   : > { %3981 = vrot.lane.b32.xlu1 %v3965_v53, %s4544_s30  ;;  %3996 = vrot.lane.b32.xlu0 %v3995_v61, %s4542_s24 }
 0x2f3   : > { %3986 = vrot.lane.b32.xlu1 %v3970_v24, %s4543_s17  ;;  %4001 = vrot.lane.b32.xlu0 %v4000_v0, %s4544_s30 }
 0x2f7   : > { %3991 = vrot.lane.b32.xlu1 %v3975_v25, %s4542_s24  ;;  %4006 = vrot.lane.b32.xlu0 %v4005_v3, %s4543_s17 }
 0x2fb   : > { %4021 = vrot.lane.b32.xlu1 %v3995_v61, %s4544_s30  ;;  %4011 = vrot.lane.b32.xlu0 %v4010_v9, %s4542_s24 }
 0x2ff   : > { %4016 = vrot.lane.b32.xlu0 %v4015_v11, %s4544_s30 }
 0x30c   : > { %v3792_v13 = vpop.permute.xlu1 %3791 }
 0x30d   : > { %v3787_v15 = vpop.permute.xlu0 %3786  ;;  %v3794_v59 = vunpack.i.h.bf16 %v3792_v13  ;;  %v3793_v14 = vunpack.i.l.bf16 %v3792_v13 }
 0x30e   : > { %v3789_v32 = vunpack.i.h.bf16 %v3787_v15  ;;  %v3788_v33 = vunpack.i.l.bf16 %v3787_v15 }
 0x310   : > { %v1973_v30 = vsel %vm1402_vm0, %v1443_v19, %v3788_v33  ;;  %v1974_v34 = vsel %vm1402_vm0, %v1444_v35, %v3789_v32 }
 0x311   : > { %v1989_v56 = vsel %vm761_vm1, %v1973_v30, %v3793_v14  ;;  %v1990_v60 = vsel %vm761_vm1, %v1974_v34, %v3794_v59 }
 0x314   : > { %v3797_v18 = vpop.permute.xlu0 %3796 }
 0x315   : > { %v3802_v12 = vpop.permute.xlu1 %3801  ;;  %v3799_v39 = vunpack.i.h.bf16 %v3797_v18  ;;  %v3798_v41 = vunpack.i.l.bf16 %v3797_v18 }
 0x316   : > { %v3804_v31 = vunpack.i.h.bf16 %v3802_v12  ;;  %v3803_v47 = vunpack.i.l.bf16 %v3802_v12 }
 0x317   : > { %v2022_v3 = vsel %vm1402_vm0, %v5236_v1, %v3798_v41  ;;  %v2023_v7 = vsel %vm1402_vm0, %v5238_v2, %v3799_v39 }
 0x318   : > { %v2006_v10 = vsel %vm2005_vm5, %v1989_v56, %v3803_v47  ;;  %v2007_v4 = vsel %vm2005_vm5, %v1990_v60, %v3804_v31 }
 0x319   : > { %v3807_v16 = vpop.permute.xlu1 %3806  ;;  %v2070_v19 = vpack.c.bf16 %v2007_v4, %v2006_v10 }
 0x31a   : > { %v3809_v11 = vunpack.i.h.bf16 %v3807_v16  ;;  %v3808_v13 = vunpack.i.l.bf16 %v3807_v16 }
 0x31c   : > { %v1975_v16 = vsel %vm1402_vm0, %v5214_v49, %v3808_v13  ;;  %v1976_v39 = vsel %vm1402_vm0, %v5219_v55, %v3809_v11 }
 0x31d   : > { %v3812_v57 = vpop.permute.xlu1 %3811  ;;  %v3822_v29 = vpop.permute.xlu0 %3821 }
 0x31e   : > { %v3824_v61 = vunpack.i.h.bf16 %v3822_v29  ;;  %v3823_v0 = vunpack.i.l.bf16 %v3822_v29  ;;  %v3814_v32 = vunpack.i.h.bf16 %v3812_v57  ;;  %v3813_v1 = vunpack.i.l.bf16 %v3812_v57 }
 0x320   : > { %v1991_v57 = vsel %vm761_vm1, %v1975_v16, %v3813_v1  ;;  %v1992_v31 = vsel %vm761_vm1, %v1976_v39, %v3814_v32 }
 0x321   : > { %v3817_v52 = vpop.permute.xlu1 %3816  ;;  %v3827_v25 = vpop.permute.xlu0 %3826 }
 0x322   : > { %v3819_v53 = vunpack.i.h.bf16 %v3817_v52  ;;  %v3818_v24 = vunpack.i.l.bf16 %v3817_v52  ;;  %v3829_v2 = vunpack.i.h.bf16 %v3827_v25  ;;  %v3828_v14 = vunpack.i.l.bf16 %v3827_v25 }
 0x324   : > { %v2038_v8 = vsel %vm761_vm1, %v2022_v3, %v3818_v24  ;;  %v2039_v9 = vsel %vm761_vm1, %v2023_v7, %v3819_v53  ;;  %v2024_v52 = vsel %vm1402_vm0, %v5264_v22, %v3828_v14  ;;  %v2025_v53 = vsel %vm1402_vm0, %v5269_v28, %v3829_v2 }
 0x325   : > { %v3832_v12 = vpop.permute.xlu1 %3831  ;;  %v2054_v15 = vsel %vm2005_vm5, %v2038_v8, %v3823_v0  ;;  %v2055_v18 = vsel %vm2005_vm5, %v2039_v9, %v3824_v61  ;;  %v3847_v33 = vpop.permute.xlu0 %3846 }
 0x326   : > { %v2071_v59 = vpack.c.bf16 %v2055_v18, %v2054_v15  ;;  %v3834_v35 = vunpack.i.h.bf16 %v3832_v12  ;;  %v3833_v29 = vunpack.i.l.bf16 %v3832_v12  ;;  %v3849_v30 = vunpack.i.h.bf16 %v3847_v33 }
 0x327   : > { %v3848_v34 = vunpack.i.l.bf16 %v3847_v33 }
 0x328   : > { %2294 = vmatprep.mubr.bf16.mxu1 %v2071_v59  ;;  %v2041_v49 = vsel %vm761_vm1, %v2025_v53, %v3849_v30  ;;  %v2008_v55 = vsel %vm2005_vm5, %v1991_v57, %v3833_v29  ;;  %v2009_v60 = vsel %vm2005_vm5, %v1992_v31, %v3834_v35 }
 0x329   : > { %2295 = vmatmul.mubr.bf16.vlgmr.msra.gmra.mrb[0].mxu1 %v2070_v19  ;;  %v3837_v41 = vpop.permute.xlu1 %3836  ;;  %v3852_v47 = vpop.permute.xlu0 %3851  ;;  %v2040_v56 = vsel %vm761_vm1, %v2024_v52, %v3848_v34  ;;  %v2073_v8 = vpack.c.bf16 %v2009_v60, %v2008_v55 }
 0x32a   : > { %v3854_v24 = vunpack.i.h.bf16 %v3852_v47  ;;  %v3853_v25 = vunpack.i.l.bf16 %v3852_v47  ;;  %v3839_v28 = vunpack.i.h.bf16 %v3837_v41  ;;  %v3838_v9 = vunpack.i.l.bf16 %v3837_v41 }
 0x32c   : > { %v2056_v0 = vsel %vm2005_vm5, %v2040_v56, %v3853_v25  ;;  %v2057_v3 = vsel %vm2005_vm5, %v2041_v49, %v3854_v24  ;;  %v1977_v59 = vsel %vm1402_vm0, %v5289_v40, %v3838_v9  ;;  %v1978_v2 = vsel %vm1402_vm0, %v5279_v36, %v3839_v28 }
 0x32d   : > { %v3842_v61 = vpop.permute.xlu1 %3841  ;;  %v3857_v7 = vpop.permute.xlu0 %3856  ;;  %v2074_v22 = vpack.c.bf16 %v2057_v3, %v2056_v0 }
 0x32e   : > { %v3844_v4 = vunpack.i.h.bf16 %v3842_v61  ;;  %v3843_v11 = vunpack.i.l.bf16 %v3842_v61  ;;  %v3859_v12 = vunpack.i.h.bf16 %v3857_v7  ;;  %v3858_v15 = vunpack.i.l.bf16 %v3857_v7 }
 0x32f   : > { %2302 = vmatprep.mubr.bf16.mxu1 %v2074_v22 }
 0x330   : > { %v1993_v19 = vsel %vm761_vm1, %v1977_v59, %v3843_v11  ;;  %v1994_v35 = vsel %vm761_vm1, %v1978_v2, %v3844_v4  ;;  %v2026_v30 = vsel %vm1402_vm0, %v5326_v5, %v3858_v15  ;;  %v2027_v34 = vsel %vm1402_vm0, %v5328_v6, %v3859_v12 }
 0x331   : > { %2303 = vmatmul.mubr.bf16.gmra.mrb[4].mxu1 %v2073_v8  ;;  %v3862_v10 = vpop.permute.xlu1 %3861  ;;  %v3877_v13 = vpop.permute.xlu0 %3876 }
 0x332   : > { %v3864_v18 = vunpack.i.h.bf16 %v3862_v10  ;;  %v3863_v32 = vunpack.i.l.bf16 %v3862_v10  ;;  %v3879_v1 = vunpack.i.h.bf16 %v3877_v13  ;;  %v3878_v33 = vunpack.i.l.bf16 %v3877_v13 }
 0x334   : > { %v2043_v41 = vsel %vm761_vm1, %v2027_v34, %v3879_v1  ;;  %v2042_v40 = vsel %vm761_vm1, %v2026_v30, %v3878_v33  ;;  %v2010_v36 = vsel %vm2005_vm5, %v1993_v19, %v3863_v32  ;;  %v2011_v57 = vsel %vm2005_vm5, %v1994_v35, %v3864_v18 }
 0x335   : > { %v3867_v14 = vpop.permute.xlu1 %3866  ;;  %v3882_v29 = vpop.permute.xlu0 %3881  ;;  %v2076_v24 = vpack.c.bf16 %v2011_v57, %v2010_v36 }
 0x336   : > { %v3884_v16 = vunpack.i.h.bf16 %v3882_v29  ;;  %v3883_v39 = vunpack.i.l.bf16 %v3882_v29  ;;  %v3869_v6 = vunpack.i.h.bf16 %v3867_v14  ;;  %v3868_v25 = vunpack.i.l.bf16 %v3867_v14 }
 0x338   : > { %v2058_v47 = vsel %vm2005_vm5, %v2042_v40, %v3883_v39  ;;  %v2059_v52 = vsel %vm2005_vm5, %v2043_v41, %v3884_v16  ;;  %v1979_v28 = vsel %vm1402_vm0, %v5301_v51, %v3868_v25  ;;  %v1980_v9 = vsel %vm1402_vm0, %v5307_v58, %v3869_v6 }
 0x339   : > { %v3872_v31 = vpop.permute.xlu1 %3871  ;;  %v3887_v53 = vpop.permute.xlu0 %3886  ;;  %v2077_v5 = vpack.c.bf16 %v2059_v52, %v2058_v47 }
 0x33a   : > { %v3874_v56 = vunpack.i.h.bf16 %v3872_v31  ;;  %v3873_v55 = vunpack.i.l.bf16 %v3872_v31  ;;  %v3889_v61 = vunpack.i.h.bf16 %v3887_v53  ;;  %v3888_v0 = vunpack.i.l.bf16 %v3887_v53 }
 0x33b   : > { %2310 = vmatprep.mubr.bf16.mxu1 %v2077_v5 }
 0x33c   : > { %2311 = vmatmul.mubr.bf16.gmra.mrb[8].mxu1 %v2076_v24  ;;  %v1995_v4 = vsel %vm761_vm1, %v1979_v28, %v3873_v55  ;;  %v1996_v11 = vsel %vm761_vm1, %v1980_v9, %v3874_v56  ;;  %v2028_v12 = vsel %vm1402_vm0, %v5374_v48, %v3888_v0  ;;  %v2029_v15 = vsel %vm1402_vm0, %v5376_v50, %v3889_v61 }
 0x33d   : > { %v3892_v49 = vpop.permute.xlu1 %3891  ;;  %v3907_v60 = vpop.permute.xlu0 %3906 }
 0x33e   : > { %v3894_v3 = vunpack.i.h.bf16 %v3892_v49  ;;  %v3893_v7 = vunpack.i.l.bf16 %v3892_v49  ;;  %v3909_v22 = vunpack.i.h.bf16 %v3907_v60  ;;  %v3908_v8 = vunpack.i.l.bf16 %v3907_v60 }
 0x340   : > { %v2045_v1 = vsel %vm761_vm1, %v2029_v15, %v3909_v22  ;;  %v2044_v51 = vsel %vm761_vm1, %v2028_v12, %v3908_v8  ;;  %v2012_v58 = vsel %vm2005_vm5, %v1995_v4, %v3893_v7  ;;  %v2013_v33 = vsel %vm2005_vm5, %v1996_v11, %v3894_v3 }
 0x341   : > { %v3897_v10 = vpop.permute.xlu1 %3896  ;;  %v3912_v13 = vpop.permute.xlu0 %3911  ;;  %v2079_v35 = vpack.c.bf16 %v2013_v33, %v2012_v58 }
 0x342   : > { %v3914_v18 = vunpack.i.h.bf16 %v3912_v13  ;;  %v3913_v32 = vunpack.i.l.bf16 %v3912_v13  ;;  %v3899_v50 = vunpack.i.h.bf16 %v3897_v10  ;;  %v3898_v29 = vunpack.i.l.bf16 %v3897_v10 }
 0x344   : > { %v2060_v2 = vsel %vm2005_vm5, %v2044_v51, %v3913_v32  ;;  %v2061_v14 = vsel %vm2005_vm5, %v2045_v1, %v3914_v18  ;;  %v1981_v52 = vsel %vm1402_vm0, %v5357_v37, %v3898_v29  ;;  %v1982_v53 = vsel %vm1402_vm0, %v5359_v38, %v3899_v50 }
 0x345   : > { %v3902_v59 = vpop.permute.xlu1 %3901  ;;  %v3917_v19 = vpop.permute.xlu0 %3916  ;;  %v2080_v48 = vpack.c.bf16 %v2061_v14, %v2060_v2 }
 0x346   : > { %v3904_v34 = vunpack.i.h.bf16 %v3902_v59  ;;  %v3903_v16 = vunpack.i.l.bf16 %v3902_v59  ;;  %v3919_v41 = vunpack.i.h.bf16 %v3917_v19  ;;  %v3918_v40 = vunpack.i.l.bf16 %v3917_v19 }
 0x347   : > { %2318 = vmatprep.mubr.bf16.mxu1 %v2080_v48 }
 0x348   : > { %2319 = vmatmul.mubr.bf16.gmra.mrb[12].mxu1 %v2079_v35  ;;  %v1997_v24 = vsel %vm761_vm1, %v1981_v52, %v3903_v16  ;;  %v1998_v6 = vsel %vm761_vm1, %v1982_v53, %v3904_v34  ;;  %v2030_v49 = vsel %vm1402_vm0, %v5451_v45, %v3918_v40  ;;  %v2031_v56 = vsel %vm1402_vm0, %v5453_v46, %v3919_v41 }
 0x349   : > { %v3922_v30 = vpop.permute.xlu1 %3921  ;;  %v3937_v39 = vpop.permute.xlu0 %3936 }
 0x34a   : > { %v3924_v36 = vunpack.i.h.bf16 %v3922_v30  ;;  %v3923_v57 = vunpack.i.l.bf16 %v3922_v30  ;;  %v3939_v31 = vunpack.i.h.bf16 %v3937_v39  ;;  %v3938_v47 = vunpack.i.l.bf16 %v3937_v39 }
 0x34c   : > { %v2047_v61 = vsel %vm761_vm1, %v2031_v56, %v3939_v31  ;;  %v2046_v37 = vsel %vm761_vm1, %v2030_v49, %v3938_v47  ;;  %v2014_v38 = vsel %vm2005_vm5, %v1997_v24, %v3923_v57  ;;  %v2015_v0 = vsel %vm2005_vm5, %v1998_v6, %v3924_v36 }
 0x34d   : > { %v3927_v5 = vpop.permute.xlu1 %3926  ;;  %v3942_v25 = vpop.permute.xlu0 %3941  ;;  %v2082_v28 = vpack.c.bf16 %v2015_v0, %v2014_v38 }
 0x34e   : > { %v3944_v55 = vunpack.i.h.bf16 %v3942_v25  ;;  %v3943_v60 = vunpack.i.l.bf16 %v3942_v25  ;;  %v3929_v46 = vunpack.i.h.bf16 %v3927_v5  ;;  %v3928_v9 = vunpack.i.l.bf16 %v3927_v5 }
 0x350   : > { %v2062_v7 = vsel %vm2005_vm5, %v2046_v37, %v3943_v60  ;;  %v2063_v22 = vsel %vm2005_vm5, %v2047_v61, %v3944_v55  ;;  %v1983_v58 = vsel %vm1402_vm0, %v5418_v17, %v3928_v9  ;;  %v1984_v33 = vsel %vm1402_vm0, %v5420_v20, %v3929_v46 }
 0x351   : > { %v3932_v3 = vpop.permute.xlu1 %3931  ;;  %v3947_v8 = vpop.permute.xlu0 %3946  ;;  %v2083_v45 = vpack.c.bf16 %v2063_v22, %v2062_v7 }
 0x352   : > { %v3934_v4 = vunpack.i.h.bf16 %v3932_v3  ;;  %v3933_v11 = vunpack.i.l.bf16 %v3932_v3  ;;  %v3949_v12 = vunpack.i.h.bf16 %v3947_v8  ;;  %v3948_v15 = vunpack.i.l.bf16 %v3947_v8 }
 0x353   : > { %2326 = vmatprep.mubr.bf16.mxu1 %v2083_v45 }
 0x354   : > { %2327 = vmatmul.mubr.bf16.gmra.mrb[16].mxu1 %v2082_v28  ;;  %v1999_v2 = vsel %vm761_vm1, %v1983_v58, %v3933_v11  ;;  %v2000_v14 = vsel %vm761_vm1, %v1984_v33, %v3934_v4  ;;  %v2032_v48 = vsel %vm1402_vm0, %v5503_v26, %v3948_v15  ;;  %v2033_v35 = vsel %vm1402_vm0, %v5505_v27, %v3949_v12 }
 0x355   : > { %v3952_v10 = vpop.permute.xlu1 %3951  ;;  %v3967_v13 = vpop.permute.xlu0 %3966 }
 0x356   : > { %v3954_v18 = vunpack.i.h.bf16 %v3952_v10  ;;  %v3953_v32 = vunpack.i.l.bf16 %v3952_v10  ;;  %v3969_v1 = vunpack.i.h.bf16 %v3967_v13  ;;  %v3968_v51 = vunpack.i.l.bf16 %v3967_v13 }
 0x358   : > { %v2049_v30 = vsel %vm761_vm1, %v2033_v35, %v3969_v1  ;;  %v2048_v17 = vsel %vm761_vm1, %v2032_v48, %v3968_v51  ;;  %v2016_v20 = vsel %vm2005_vm5, %v1999_v2, %v3953_v32  ;;  %v2017_v34 = vsel %vm2005_vm5, %v2000_v14, %v3954_v18 }
 0x359   : > { %v3957_v59 = vpop.permute.xlu1 %3956  ;;  %v3972_v19 = vpop.permute.xlu0 %3971  ;;  %v2085_v36 = vpack.c.bf16 %v2017_v34, %v2016_v20 }
 0x35a   : > { %v3974_v50 = vunpack.i.h.bf16 %v3972_v19  ;;  %v3973_v29 = vunpack.i.l.bf16 %v3972_v19  ;;  %v3959_v27 = vunpack.i.h.bf16 %v3957_v59  ;;  %v3958_v57 = vunpack.i.l.bf16 %v3957_v59 }
 0x35c   : > { %v2064_v39 = vsel %vm2005_vm5, %v2048_v17, %v3973_v29  ;;  %v2065_v41 = vsel %vm2005_vm5, %v2049_v30, %v3974_v50  ;;  %v1985_v55 = vsel %vm1402_vm0, %v5488_v21, %v3958_v57  ;;  %v1986_v60 = vsel %vm1402_vm0, %v5490_v23, %v3959_v27  ;;  %v4067_v27 = vld [vmem:[#allocation17] sm:$0xff]  }
 0x35d   : > { %v3962_v16 = vpop.permute.xlu1 %3961  ;;  %v3977_v40 = vpop.permute.xlu0 %3976  ;;  %v2086_v26 = vpack.c.bf16 %v2065_v41, %v2064_v39  ;;  %3556 = vmatprep.subr.bf16.mxu1 %v4067_v27 }
 0x35e   : > { %v3964_v47 = vunpack.i.h.bf16 %v3962_v16  ;;  %v3963_v52 = vunpack.i.l.bf16 %v3962_v16  ;;  %v3979_v5 = vunpack.i.h.bf16 %v3977_v40  ;;  %v3978_v24 = vunpack.i.l.bf16 %v3977_v40  ;;  %3557 = vmatpush3.bf16.msra.mxu1 %v4067_v27 }
 0x35f   : > { %2334 = vmatprep.mubr.bf16.mxu1 %v2086_v26 }
 0x360   : > { %2335 = vmatmul.mubr.bf16.gmra.mrb[20].mxu1 %v2085_v36  ;;  %v2001_v37 = vsel %vm761_vm1, %v1985_v55, %v3963_v52  ;;  %v2002_v38 = vsel %vm761_vm1, %v1986_v60, %v3964_v47  ;;  %v2034_v3 = vsel %vm1402_vm0, %v5528_v44, %v3978_v24  ;;  %v2035_v7 = vsel %vm1402_vm0, %v5530_v54, %v3979_v5 }
 0x361   : > { %v3982_v31 = vpop.permute.xlu1 %3981  ;;  %v3997_v53 = vpop.permute.xlu0 %3996 }
 0x362   : > { %v3984_v6 = vunpack.i.h.bf16 %v3982_v31  ;;  %v3983_v25 = vunpack.i.l.bf16 %v3982_v31  ;;  %v3999_v49 = vunpack.i.h.bf16 %v3997_v53  ;;  %v3998_v56 = vunpack.i.l.bf16 %v3997_v53  ;;  %v4068_v31 = vld [vmem:[#allocation17 + $0x8] sm:$0xff]  }
 0x363   : > { %3558 = vmatprep.subr.bf16.mxu1 %v4068_v31 }
 0x364   : > { %v2051_v45 = vsel %vm761_vm1, %v2035_v7, %v3999_v49  ;;  %v2050_v21 = vsel %vm761_vm1, %v2034_v3, %v3998_v56  ;;  %v2018_v23 = vsel %vm2005_vm5, %v2001_v37, %v3983_v25  ;;  %v2019_v28 = vsel %vm2005_vm5, %v2002_v38, %v3984_v6  ;;  %3559 = vmatpush3.bf16.msra.mxu1 %v4068_v31  ;;  %v5701_v7 = vld [vmem:[#allocation14] ss:$0 sm:$0xff] }
 0x365   : > { %v3987_v61 = vpop.permute.xlu1 %3986  ;;  %v4002_v0 = vpop.permute.xlu0 %4001  ;;  %v2088_v11 = vpack.c.bf16 %v2019_v28, %v2018_v23 }
 0x366   : > { %v4004_v22 = vunpack.i.h.bf16 %v4002_v0  ;;  %v4003_v8 = vunpack.i.l.bf16 %v4002_v0  ;;  %v3989_v54 = vunpack.i.h.bf16 %v3987_v61  ;;  %v3988_v13 = vunpack.i.l.bf16 %v3987_v61 }
 0x368   : > { %v2066_v9 = vsel %vm2005_vm5, %v2050_v21, %v4003_v8  ;;  %v2067_v10 = vsel %vm2005_vm5, %v2051_v45, %v4004_v22  ;;  %v1987_v14 = vsel %vm1402_vm0, %v5520_v42, %v3988_v13  ;;  %v1988_v19 = vsel %vm1402_vm0, %v5522_v43, %v3989_v54  ;;  %v5703_v21 = vld [vmem:[#allocation15] ss:$0 sm:$0xff] }
 0x369   : > { %v3992_v46 = vpop.permute.xlu1 %3991  ;;  %v4007_v4 = vpop.permute.xlu0 %4006  ;;  %v2089_v44 = vpack.c.bf16 %v2067_v10, %v2066_v9 }
 0x36a   : > { %v3994_v15 = vunpack.i.h.bf16 %v3992_v46  ;;  %v3993_v18 = vunpack.i.l.bf16 %v3992_v46  ;;  %v4009_v1 = vunpack.i.h.bf16 %v4007_v4  ;;  %v4008_v51 = vunpack.i.l.bf16 %v4007_v4 }
 0x36b   : > { %2342 = vmatprep.mubr.bf16.mxu1 %v2089_v44 }
 0x36c   : > { %2343 = vmatmul.mubr.bf16.gmra.mrb[24].mxu1 %v2088_v11  ;;  %v2003_v48 = vsel %vm761_vm1, %v1987_v14, %v3993_v18  ;;  %v2004_v35 = vsel %vm761_vm1, %v1988_v19, %v3994_v15  ;;  %v2036_v29 = vsel %vm1402_vm0, %v5541_v62, %v4008_v51  ;;  %v2037_v30 = vsel %vm1402_vm0, %v5543_v63, %v4009_v1 }
 0x36d   : > { %v4022_v12 = vpop.permute.xlu1 %4021  ;;  %v4012_v32 = vpop.permute.xlu0 %4011 }
 0x36e   : > { %v4024_v58 = vunpack.i.h.bf16 %v4022_v12  ;;  %v4023_v33 = vunpack.i.l.bf16 %v4022_v12  ;;  %v4014_v59 = vunpack.i.h.bf16 %v4012_v32  ;;  %v4013_v2 = vunpack.i.l.bf16 %v4012_v32 }
 0x370   : > { %v2053_v34 = vsel %vm761_vm1, %v2037_v30, %v4014_v59  ;;  %v2052_v42 = vsel %vm761_vm1, %v2036_v29, %v4013_v2  ;;  %v2020_v16 = vsel %vm2005_vm5, %v2003_v48, %v4023_v33  ;;  %v2021_v43 = vsel %vm2005_vm5, %v2004_v35, %v4024_v58 }
 0x371   : > { %v4017_v50 = vpop.permute.xlu0 %4016  ;;  %v2091_v26 = vpack.c.bf16 %v2021_v43, %v2020_v16 }
 0x372   : > { %v4019_v17 = vunpack.i.h.bf16 %v4017_v50  ;;  %v4018_v20 = vunpack.i.l.bf16 %v4017_v50 }
 0x374   : > { %v2068_v39 = vsel %vm2005_vm5, %v2052_v42, %v4018_v20  ;;  %v2069_v41 = vsel %vm2005_vm5, %v2053_v34, %v4019_v17 }
 0x375   : > { %v2092_v40 = vpack.c.bf16 %v2069_v41, %v2068_v39 }
 0x377   : > { %2350 = vmatprep.mubr.bf16.mxu1 %v2092_v40 }
 0x378   : > { %2351 = vmatmul.mubr.bf16.gmra.mrb[28].mxu1 %v2091_v26 }
 0x385   : > { %v3542_v62 = vpop.f32.mrb[40].mxu0 }
 0x386   : > { %v2393_v63 = vpop.f32.mrb[41].mxu0 }
 0x387   : > { %v3543_v36 = vpop.f32.mrb[42].mxu0 }
 0x388   : > { %v2396_v57 = vpop.f32.mrb[43].mxu0 }
 0x395   : > { %v5681_v47 = vpop.f32.mrb[44].mxu0 }
 0x396   : > { %v2409_v52 = vpop.f32.mrb[45].mxu0 }
 0x397   : > { %v5683_v53 = vpop.f32.mrb[46].mxu0 }
 0x398   : > { %v2412_v5 = vpop.f32.mrb[47].mxu0 }
 0x3a5   : > { %v5685_v24 = vpop.f32.mrb[48].mxu0 }
 0x3a6   : > { %v5687_v6 = vpop.f32.mrb[49].mxu0 }
 0x3a7   : > { %v5689_v25 = vpop.f32.mrb[50].mxu0 }
 0x3a8   : > { %v5691_v49 = vpop.f32.mrb[51].mxu0 }
 0x3b5   : > { %v5693_v56 = vpop.f32.mrb[52].mxu0 }
 0x3b6   : > { %v5695_v55 = vpop.f32.mrb[53].mxu0 }
 0x3b7   : > { %v5697_v60 = vpop.f32.mrb[54].mxu0 }
 0x3b8   : > { %v5699_v61 = vpop.f32.mrb[55].mxu0 }
 0x3fc   : > { %v3420_v37 = vpop.f32.mrb[0].mxu1 }
 0x3fd   : > { %v3421_v38 = vpop.f32.mrb[1].mxu1 }
 0x3fe   : > { %v3422_v0 = vadd.f32 %v3421_v38, %v3420_v37  ;;  %v3423_v3 = vpop.f32.mrb[2].mxu1 }
 0x3ff   : > { %v3424_v22 = vpop.f32.mrb[3].mxu1 }
 0x400   : > { %v2394_v8 = vadd.f32 %v3422_v0, %v2393_v63  ;;  %v3425_v45 = vadd.f32 %v3424_v22, %v3423_v3 }
 0x402   : > { %v2463_v23 = vmul.f32 %v5701_v7, %v2394_v8  ;;  %v2397_v28 = vadd.f32 %v3425_v45, %v2396_v57 }
 0x404   : > { %v2486_v46 = vadd.f32 %v5703_v21, %v2463_v23  ;;  %v2464_v9 = vmul.f32 %v5701_v7, %v2397_v28  ;;  %v3426_v10 = vpop.f32.mrb[4].mxu1 }
 0x405   : > { %v3427_v4 = vpop.f32.mrb[5].mxu1 }
 0x406   : > { %v2487_v44 = vadd.f32 %v5703_v21, %v2464_v9  ;;  %v3428_v11 = vadd.f32 %v3427_v4, %v3426_v10  ;;  %v3429_v54 = vpop.f32.mrb[6].mxu1  ;;  %v2502_v12 = vmax.f32 %v2486_v46, 0.0 }
 0x407   : > { %v3430_v13 = vpop.f32.mrb[7].mxu1 }
 0x408   : > { %v2503_v15 = vmax.f32 %v2487_v44, 0.0  ;;  %v2402_v18 = vadd.f32 %v3542_v62, %v3428_v11  ;;  %v3431_v32 = vadd.f32 %v3430_v13, %v3429_v54 }
 0x40a   : > { %v2465_v1 = vmul.f32 %v5701_v7, %v2402_v18  ;;  %v2405_v51 = vadd.f32 %v3543_v36, %v3431_v32  ;;  %v2518_v58 = vpack.c.bf16 %v2503_v15, %v2502_v12 }
 0x40c   : > { %v2488_v33 = vadd.f32 %v5703_v21, %v2465_v1  ;;  %v2466_v59 = vmul.f32 %v5701_v7, %v2405_v51  ;;  %3560 = vmatprep.mubr.msk.bf16.mxu1 %vm1402_vm0, %v2518_v58 }
 0x40e   : > { %v2489_v2 = vadd.f32 %v5703_v21, %v2466_v59  ;;  %v2504_v14 = vmax.f32 %v2488_v33, 0.0 }
 0x40f   : > { %v3432_v48 = vpop.f32.mrb[8].mxu1 }
 0x410   : > { %v2505_v19 = vmax.f32 %v2489_v2, 0.0  ;;  %v3433_v35 = vpop.f32.mrb[9].mxu1 }
 0x411   : > { %v3434_v29 = vadd.f32 %v3433_v35, %v3432_v48  ;;  %v3435_v30 = vpop.f32.mrb[10].mxu1 }
 0x412   : > { %v2519_v50 = vpack.c.bf16 %v2505_v19, %v2504_v14  ;;  %v3436_v17 = vpop.f32.mrb[11].mxu1 }
 0x413   : > { %v2410_v20 = vadd.f32 %v3434_v29, %v2409_v52  ;;  %v3437_v34 = vadd.f32 %v3436_v17, %v3435_v30 }
 0x414   : > { %3561 = vmatmul.mubr.msk.bf16.vlgmr.msra.gmra.mrb[32].mxu1 %vm1402_vm0, %v2519_v50 }
 0x415   : > { %v2467_v42 = vmul.f32 %v5701_v7, %v2410_v20  ;;  %v2413_v16 = vadd.f32 %v3437_v34, %v2412_v5 }
 0x417   : > { %v2490_v43 = vadd.f32 %v5703_v21, %v2467_v42  ;;  %v2468_v39 = vmul.f32 %v5701_v7, %v2413_v16 }
 0x419   : > { %v2491_v41 = vadd.f32 %v5703_v21, %v2468_v39  ;;  %v2506_v40 = vmax.f32 %v2490_v43, 0.0 }
 0x41b   : > { %v2507_v26 = vmax.f32 %v2491_v41, 0.0  ;;  %v3438_v62 = vpop.f32.mrb[12].mxu1 }
 0x41c   : > { %v3439_v63 = vpop.f32.mrb[13].mxu1 }
 0x41d   : > { %v3440_v36 = vadd.f32 %v3439_v63, %v3438_v62  ;;  %v3441_v27 = vpop.f32.mrb[14].mxu1  ;;  %v2520_v57 = vpack.c.bf16 %v2507_v26, %v2506_v40 }
 0x41e   : > { %v3442_v31 = vpop.f32.mrb[15].mxu1 }
 0x41f   : > { %v2418_v52 = vadd.f32 %v5681_v47, %v3440_v36  ;;  %v3443_v37 = vadd.f32 %v3442_v31, %v3441_v27  ;;  %3564 = vmatprep.mubr.msk.bf16.mxu1 %vm1402_vm0, %v2520_v57 }
 0x421   : > { %v2469_v5 = vmul.f32 %v5701_v7, %v2418_v52  ;;  %v2421_v38 = vadd.f32 %v5683_v53, %v3443_v37 }
 0x423   : > { %v2492_v0 = vadd.f32 %v5703_v21, %v2469_v5  ;;  %v2470_v3 = vmul.f32 %v5701_v7, %v2421_v38 }
 0x425   : > { %v2493_v22 = vadd.f32 %v5703_v21, %v2470_v3  ;;  %v2508_v8 = vmax.f32 %v2492_v0, 0.0 }
 0x427   : > { %v2509_v45 = vmax.f32 %v2493_v22, 0.0  ;;  %v3444_v23 = vpop.f32.mrb[16].mxu1 }
 0x428   : > { %v3445_v28 = vpop.f32.mrb[17].mxu1 }
 0x429   : > { %v3446_v46 = vadd.f32 %v3445_v28, %v3444_v23  ;;  %v3447_v9 = vpop.f32.mrb[18].mxu1  ;;  %v2521_v47 = vpack.c.bf16 %v2509_v45, %v2508_v8  ;;  %v3365_v28 = vld [vmem:[%s5047_s4 + $0x8] sm:$0xff]  }
 0x42a   : > { %v3448_v10 = vpop.f32.mrb[19].mxu1 }
 0x42b   : > { %v2426_v4 = vadd.f32 %v3446_v46, %v5687_v6  ;;  %v3449_v44 = vadd.f32 %v3448_v10, %v3447_v9  ;;  %3565 = vmatmul.mubr.msk.bf16.gmra.mrb[36].mxu1 %vm1402_vm0, %v2521_v47  ;;  %v3372_v46 = vld [vmem:[%s5074_s10 + $0x10] sm:$0xff]   ;;  %v3302_v9 = vld [vmem:[%s5047_s4] sm:$0xff]   ;;  %v3258_v47 = vld [vmem:[%s5074_s10 + $0x28] sm:$0x1] }
 0x42d   : > { %v2471_v53 = vmul.f32 %v5701_v7, %v2426_v4  ;;  %v2429_v11 = vadd.f32 %v3449_v44, %v5691_v49  ;;  %v3255_v44 = vld [vmem:[%s5074_s10 + $0x18] sm:$0x1] }
 0x42f   : > { %v2494_v54 = vadd.f32 %v5703_v21, %v2471_v53  ;;  %v2472_v13 = vmul.f32 %v5701_v7, %v2429_v11  ;;  %v3335_v53 = vunpack.c.l.bf16 %v3372_v46  ;;  %v3336_v11 = vunpack.c.h.bf16 %v3372_v46 }
 0x431   : > { %v2495_v12 = vadd.f32 %v5703_v21, %v2472_v13  ;;  %v2510_v15 = vmax.f32 %v2494_v54, 0.0  ;;  %v3303_v54 = vunpack.c.l.bf16 %v3302_v9  ;;  %v3308_v13 = vunpack.c.h.bf16 %v3365_v28 }
 0x433   : > { %v2511_v18 = vmax.f32 %v2495_v12, 0.0  ;;  %v3450_v32 = vpop.f32.mrb[20].mxu1 }
 0x434   : > { %v3451_v1 = vpop.f32.mrb[21].mxu1 }
 0x435   : > { %v3452_v51 = vadd.f32 %v3451_v1, %v3450_v32  ;;  %v3453_v58 = vpop.f32.mrb[22].mxu1  ;;  %v2522_v6 = vpack.c.bf16 %v2511_v18, %v2510_v15  ;;  %v5761_v32 = vld [vmem:[#allocation18] ss:$0 sm:$0xff]  ;;  %v3304_v1 = vunpack.c.h.bf16 %v3302_v9 }
 0x436   : > { %v3454_v33 = vpop.f32.mrb[23].mxu1 }
 0x437   : > { %v2434_v59 = vadd.f32 %v5685_v24, %v3452_v51  ;;  %v3455_v2 = vadd.f32 %v3454_v33, %v3453_v58  ;;  %3568 = vmatprep.mubr.msk.bf16.mxu1 %vm1402_vm0, %v2522_v6  ;;  %v2639_v58 = vrot.slane %v3335_v53, 1  ;;  %v2640_v6 = vrot.slane %v3336_v11, 1 }
 0x439   : > { %v2473_v49 = vmul.f32 %v5701_v7, %v2434_v59  ;;  %v2437_v14 = vadd.f32 %v5689_v25, %v3455_v2  ;;  %v5763_v59 = vld [vmem:[#allocation20] ss:$0 sm:$0xff] }
 0x43b   : > { %v2496_v19 = vadd.f32 %v5703_v21, %v2473_v49  ;;  %v2474_v48 = vmul.f32 %v5701_v7, %v2437_v14 }
 0x43d   : > { %v2497_v35 = vadd.f32 %v5703_v21, %v2474_v48  ;;  %v2512_v50 = vmax.f32 %v2496_v19, 0.0 }
 0x43f   : > { %v2513_v29 = vmax.f32 %v2497_v35, 0.0  ;;  %v3456_v30 = vpop.f32.mrb[24].mxu1 }
 0x440   : > { %v3457_v17 = vpop.f32.mrb[25].mxu1 }
 0x441   : > { %v3458_v20 = vadd.f32 %v3457_v17, %v3456_v30  ;;  %v3459_v34 = vpop.f32.mrb[26].mxu1  ;;  %v2523_v24 = vpack.c.bf16 %v2513_v29, %v2512_v50 }
 0x442   : > { %v3460_v42 = vpop.f32.mrb[27].mxu1 }
 0x443   : > { %v2442_v16 = vadd.f32 %v3458_v20, %v5695_v55  ;;  %v3461_v43 = vadd.f32 %v3460_v42, %v3459_v34  ;;  %3569 = vmatmul.mubr.msk.bf16.gmra.mrb[40].mxu1 %vm1402_vm0, %v2523_v24 }
 0x445   : > { %v2475_v25 = vmul.f32 %v5701_v7, %v2442_v16  ;;  %v2445_v39 = vadd.f32 %v3461_v43, %v5699_v61 }
 0x447   : > { %v2498_v41 = vadd.f32 %v5703_v21, %v2475_v25  ;;  %v2476_v40 = vmul.f32 %v5701_v7, %v2445_v39 }
 0x449   : > { %v2499_v26 = vadd.f32 %v5703_v21, %v2476_v40  ;;  %v2514_v62 = vmax.f32 %v2498_v41, 0.0 }
 0x44b   : > { %v2515_v63 = vmax.f32 %v2499_v26, 0.0  ;;  %v3462_v36 = vpop.f32.mrb[28].mxu1 }
 0x44c   : > { %v3463_v27 = vpop.f32.mrb[29].mxu1 }
 0x44d   : > { %v3464_v57 = vadd.f32 %v3463_v27, %v3462_v36  ;;  %v3465_v55 = vpop.f32.mrb[30].mxu1  ;;  %v2524_v31 = vpack.c.bf16 %v2515_v63, %v2514_v62 }
 0x44e   : > { %v3466_v52 = vpop.f32.mrb[31].mxu1 }
 0x44f   : > { %v2450_v61 = vadd.f32 %v5693_v56, %v3464_v57  ;;  %v3467_v37 = vadd.f32 %v3466_v52, %v3465_v55  ;;  %3572 = vmatprep.mubr.msk.bf16.mxu1 %vm1402_vm0, %v2524_v31  ;;  %v3373_v56 = vld [vmem:[%s5074_s10 + $0x20] sm:$0xff]   ;;  %v3367_v52 = vld [vmem:[%s5047_s4 + $0x18] sm:$0xff]  }
 0x450   : > { %v3339_v10 = vunpack.c.l.bf16 %v3373_v56  ;;  %v3340_v4 = vunpack.c.h.bf16 %v3373_v56  ;;  %v3375_v31 = vld [vmem:[%s5074_s10 + $0x40] sm:$0xff]  }
 0x451   : > { %v2477_v5 = vmul.f32 %v5701_v7, %v2450_v61  ;;  %v2453_v38 = vadd.f32 %v5697_v60, %v3467_v37  ;;  %v3307_v60 = vunpack.c.l.bf16 %v3365_v28  ;;  %v3374_v61 = vld [vmem:[%s5074_s10 + $0x30] sm:$0xff]   ;;  %v3316_v28 = vunpack.c.h.bf16 %v3367_v52 }
 0x452   : > { %v2644_v12 = vrot.slane %v3339_v10, 1  ;;  %v2645_v15 = vrot.slane %v3340_v4, 1  ;;  %v3366_v37 = vld [vmem:[%s5047_s4 + $0x10] sm:$0xff]  }
 0x453   : > { %v2500_v0 = vadd.f32 %v5703_v21, %v2477_v5  ;;  %v2478_v3 = vmul.f32 %v5701_v7, %v2453_v38  ;;  %v2595_v7 = vunpack.c.l.bf16 %v3258_v47  ;;  %v3264_v5 = vld [vmem:[%s5074_s10 + $0x48] sm:$0x1]  ;;  %v3347_v38 = vunpack.c.l.bf16 %v3375_v31 }
 0x454   : > { %v2601_v56 = vunpack.c.l.bf16 %v3264_v5  ;;  %v3312_v4 = vunpack.c.h.bf16 %v3366_v37 }
 0x455   : > { %v2501_v22 = vadd.f32 %v5703_v21, %v2478_v3  ;;  %v2516_v8 = vmax.f32 %v2500_v0, 0.0  ;;  %v2592_v21 = vunpack.c.l.bf16 %v3255_v44  ;;  %v2647_v49 = vrot.slane %v2595_v7, 1  ;;  %v3261_v3 = vld [vmem:[%s5074_s10 + $0x38] sm:$0x1] }
 0x456   : > { %v3348_v0 = vunpack.c.h.bf16 %v3375_v31  ;;  %v2598_v46 = vunpack.c.l.bf16 %v3261_v3  ;;  %v2654_v9 = vrot.slane %v3347_v38, 1  ;;  %v2657_v7 = vrot.slane %v2601_v56, 1 }
 0x457   : > { %v2517_v45 = vmax.f32 %v2501_v22, 0.0  ;;  %v2642_v35 = vrot.slane %v2592_v21, 1  ;;  %v3315_v22 = vunpack.c.l.bf16 %v3367_v52 }
 0x458   : > { %v2655_v47 = vrot.slane %v3348_v0, 1 }
 0x459   : > { %v2525_v23 = vpack.c.bf16 %v2517_v45, %v2516_v8  ;;  %v3343_v8 = vunpack.c.l.bf16 %v3374_v61  ;;  %v3344_v45 = vunpack.c.h.bf16 %v3374_v61 }
 0x45b   : > { %3573 = vmatmul.mubr.msk.bf16.gmra.mrb[44].mxu1 %vm1402_vm0, %v2525_v23  ;;  %vm2638_vm0 = vcmask 1046528   ;;  %v3311_v23 = vunpack.c.l.bf16 %v3366_v37  ;;  %v2650_v53 = vrot.slane %v3344_v45, 1 }
 0x45c   : > { %v2646_v29 = vsel %vm2638_vm0, %v2644_v12, %v2645_v15  ;;  %v2641_v34 = vsel %vm2638_vm0, %v2639_v58, %v2640_v6  ;;  %v2648_v16 = vsel %vm2638_vm0, %v2645_v15, %v2647_v49  ;;  %v2643_v41 = vsel %vm2638_vm0, %v2640_v6, %v2642_v35 }
 0x45d   : > { %v2652_v15 = vrot.slane %v2598_v46, 1 }
 0x4e7   : > { %v3562_v18 = vpop.f32.mrb[32].mxu1 }
 0x4e8   : > { %v2774_v51 = vadd.f32 %v3562_v18, %v3307_v60  ;;  %v2765_v33 = vpop.f32.mrb[33].mxu1  ;;  %v2649_v60 = vrot.slane %v3343_v8, 1 }
 0x4e9   : > { %v2766_v2 = vadd.f32 %v3303_v54, %v2765_v33  ;;  %v3563_v14 = vpop.f32.mrb[34].mxu1 }
 0x4ea   : > { %v2837_v19 = vmul.f32 %v5761_v32, %v2774_v51  ;;  %v2777_v48 = vadd.f32 %v3563_v14, %v3308_v13  ;;  %v2768_v50 = vpop.f32.mrb[35].mxu1  ;;  %v2651_v33 = vsel %vm2638_vm0, %v2649_v60, %v2650_v53  ;;  %v2658_v14 = vsel %vm2638_vm0, %v2655_v47, %v2657_v7 }
 0x4eb   : > { %v2835_v30 = vmul.f32 %v5761_v32, %v2766_v2  ;;  %v2769_v17 = vadd.f32 %v3304_v1, %v2768_v50  ;;  %v2656_v1 = vsel %vm2638_vm0, %v2654_v9, %v2655_v47  ;;  %v2653_v50 = vsel %vm2638_vm0, %v2650_v53, %v2652_v15 }
 0x4ec   : > { %v2860_v20 = vadd.f32 %v5763_v59, %v2837_v19  ;;  %v2838_v24 = vmul.f32 %v5761_v32, %v2777_v48 }
 0x4ed   : > { %v2858_v42 = vadd.f32 %v5763_v59, %v2835_v30  ;;  %v2836_v43 = vmul.f32 %v5761_v32, %v2769_v17 }
 0x4ee   : > { %v2876_v25 = vadd.f32 %v2860_v20, %v2646_v29  ;;  %v2861_v39 = vadd.f32 %v5763_v59, %v2838_v24 }
 0x4ef   : > { %v2874_v40 = vadd.f32 %v2858_v42, %v2641_v34  ;;  %v2859_v26 = vadd.f32 %v5763_v59, %v2836_v43  ;;  %v3377_v43 = vld [vmem:[%s5074_s10 + $0x60] sm:$0xff]  }
 0x4f0   : > { %v2892_v62 = vmax.f32 %v2876_v25, 0.0  ;;  %v2877_v63 = vadd.f32 %v2861_v39, %v2648_v16  ;;  %v3369_v25 = vld [vmem:[%s5047_s4 + $0x28] sm:$0xff]   ;;  %v3376_v39 = vld [vmem:[%s5074_s10 + $0x50] sm:$0xff]  }
 0x4f1   : > { %v2890_v36 = vmax.f32 %v2874_v40, 0.0  ;;  %v2875_v27 = vadd.f32 %v2859_v26, %v2643_v41  ;;  %v3368_v41 = vld [vmem:[%s5047_s4 + $0x20] sm:$0xff]   ;;  %v3270_v40 = vld [vmem:[%s5074_s10 + $0x68] sm:$0x1]  ;;  %v3355_v26 = vunpack.c.l.bf16 %v3377_v43  ;;  %v3324_v52 = vunpack.c.h.bf16 %v3369_v25 }
 0x4f2   : > { %2908 = vst.msk [vmem:[%s5778_s13 + $0x10] sm:$0xff] %vm761_vm1, %v2892_v62  ;;  %v2893_v57 = vmax.f32 %v2877_v63, 0.0  ;;  %v3356_v62 = vunpack.c.h.bf16 %v3377_v43  ;;  %v3267_v63 = vld [vmem:[%s5074_s10 + $0x58] sm:$0x1]  ;;  %v2607_v31 = vunpack.c.l.bf16 %v3270_v40  ;;  %v3320_v0 = vunpack.c.h.bf16 %v3368_v41 }
 0x4f3   : > { %2906 = vst.msk [vmem:[%s5778_s13] sm:$0xff] %vm761_vm1, %v2890_v36  ;;  %v2891_v55 = vmax.f32 %v2875_v27, 0.0  ;;  %v3323_v36 = vunpack.c.l.bf16 %v3369_v25  ;;  %v3351_v27 = vunpack.c.l.bf16 %v3376_v39  ;;  %v2604_v61 = vunpack.c.l.bf16 %v3267_v63 }
 0x4f4   : > { %2909 = vst.msk [vmem:[%s5778_s13 + $0x18] sm:$0xff] %vm761_vm1, %v2893_v57  ;;  %v3352_v57 = vunpack.c.h.bf16 %v3376_v39  ;;  %v2664_v37 = vrot.slane %v3355_v26, 1  ;;  %v2665_v5 = vrot.slane %v3356_v62, 1  ;;  %v2667_v56 = vrot.slane %v2607_v31, 1 }
 0x4f5   : > { %2907 = vst.msk [vmem:[%s5778_s13 + $0x8] sm:$0xff] %vm761_vm1, %v2891_v55  ;;  %v3319_v55 = vunpack.c.l.bf16 %v3368_v41  ;;  %v2662_v47 = vrot.slane %v2604_v61, 1 }
 0x4f6   : > { %v2660_v8 = vrot.slane %v3352_v57, 1 }
 0x4fe   : > { %v3566_v10 = vpop.f32.mrb[36].mxu1 }
 0x4ff   : > { %v2790_v44 = vadd.f32 %v3566_v10, %v3315_v22  ;;  %v2781_v11 = vpop.f32.mrb[37].mxu1  ;;  %v2659_v22 = vrot.slane %v3351_v27, 1 }
 0x500   : > { %v2782_v54 = vadd.f32 %v3311_v23, %v2781_v11  ;;  %v3567_v13 = vpop.f32.mrb[38].mxu1 }
 0x501   : > { %v2841_v21 = vmul.f32 %v5761_v32, %v2790_v44  ;;  %v2793_v12 = vadd.f32 %v3567_v13, %v3316_v28  ;;  %v2784_v18 = vpop.f32.mrb[39].mxu1  ;;  %v2661_v11 = vsel %vm2638_vm0, %v2659_v22, %v2660_v8  ;;  %v2668_v13 = vsel %vm2638_vm0, %v2665_v5, %v2667_v56 }
 0x502   : > { %v2839_v51 = vmul.f32 %v5761_v32, %v2782_v54  ;;  %v2785_v58 = vadd.f32 %v3312_v4, %v2784_v18  ;;  %v2666_v4 = vsel %vm2638_vm0, %v2664_v37, %v2665_v5  ;;  %v2663_v18 = vsel %vm2638_vm0, %v2660_v8, %v2662_v47 }
 0x503   : > { %v2864_v6 = vadd.f32 %v5763_v59, %v2841_v21  ;;  %v2842_v2 = vmul.f32 %v5761_v32, %v2793_v12 }
 0x504   : > { %v2862_v49 = vadd.f32 %v5763_v59, %v2839_v51  ;;  %v2840_v19 = vmul.f32 %v5761_v32, %v2785_v58 }
 0x505   : > { %v2880_v48 = vadd.f32 %v2864_v6, %v2656_v1  ;;  %v2865_v35 = vadd.f32 %v5763_v59, %v2842_v2 }
 0x506   : > { %v2878_v29 = vadd.f32 %v2862_v49, %v2651_v33  ;;  %v2863_v30 = vadd.f32 %v5763_v59, %v2840_v19  ;;  %v3379_v19 = vld [vmem:[%s5074_s10 + $0x80] sm:$0xff]  }
 0x507   : > { %v2896_v17 = vmax.f32 %v2880_v48, 0.0  ;;  %v2881_v20 = vadd.f32 %v2865_v35, %v2658_v14  ;;  %v3371_v48 = vld [vmem:[%s5047_s4 + $0x38] sm:$0xff]   ;;  %v3378_v35 = vld [vmem:[%s5074_s10 + $0x70] sm:$0xff]  }
 0x508   : > { %v2894_v34 = vmax.f32 %v2878_v29, 0.0  ;;  %v2879_v24 = vadd.f32 %v2863_v30, %v2653_v50  ;;  %v3370_v50 = vld [vmem:[%s5047_s4 + $0x30] sm:$0xff]   ;;  %v3276_v29 = vld [vmem:[%s5074_s10 + $0x88] sm:$0x1]  ;;  %v3363_v30 = vunpack.c.l.bf16 %v3379_v19  ;;  %v3332_v25 = vunpack.c.h.bf16 %v3371_v48  ;;  %s4381_s4 = scalar_lea.vmem %s5868_s5, 2048 }
 0x509   : > { %2912 = vst.msk [vmem:[%s5778_s13 + $0x30] sm:$0xff] %vm761_vm1, %v2896_v17  ;;  %v2897_v42 = vmax.f32 %v2881_v20, 0.0  ;;  %v3364_v17 = vunpack.c.h.bf16 %v3379_v19  ;;  %v3273_v20 = vld [vmem:[%s5074_s10 + $0x78] sm:$0x1]  ;;  %v2613_v43 = vunpack.c.l.bf16 %v3276_v29  ;;  %v3328_v62 = vunpack.c.h.bf16 %v3370_v50  ;;  %p4382_p9 = scmp.ne.s32.totalorder %s5868_s5, %s4381_s4  ;;  %s4387_s10 = scalar_lea.vmem %s4386_s19, 4096 }
 0x50a   : > { %2910 = vst.msk [vmem:[%s5778_s13 + $0x20] sm:$0xff] %vm761_vm1, %v2894_v34  ;;  %v2895_v16 = vmax.f32 %v2879_v24, 0.0  ;;  %v3331_v34 = vunpack.c.l.bf16 %v3371_v48  ;;  %v3359_v24 = vunpack.c.l.bf16 %v3378_v35  ;;  %v2610_v39 = vunpack.c.l.bf16 %v3273_v20  ;;  %p4389_p0 = scmp.lt.s32.totalorder %s4387_s10, %s4381_s4 }
 0x50b   : > { %2913 = vst.msk [vmem:[%s5778_s13 + $0x38] sm:$0xff] %vm761_vm1, %v2897_v42  ;;  %v3360_v42 = vunpack.c.h.bf16 %v3378_v35  ;;  %v2674_v41 = vrot.slane %v3363_v30, 1  ;;  %v2675_v40 = vrot.slane %v3364_v17, 1  ;;  %v2677_v31 = vrot.slane %v2613_v43, 1  ;;  %p4383_p10 = pnand %p4382_p9, %p6063_p7 }
 0x50c   : > { %2911 = vst.msk [vmem:[%s5778_s13 + $0x28] sm:$0xff] %vm761_vm1, %v2895_v16  ;;  %v3327_v16 = vunpack.c.l.bf16 %v3370_v50  ;;  %v2672_v5 = vrot.slane %v2610_v39, 1  ;;  %p4390_p4 = por %p4389_p0, %p4388_p6 }
 0x50d   : > { %v2670_v27 = vrot.slane %v3360_v42, 1  ;;  %p4384_p5 = pneg %p4383_p10 }
 0x50f   : > { %p4391_p2 = pnand %p4390_p4, %p4384_p5 }
 0x516   : > { %v3570_v38 = vpop.f32.mrb[40].mxu1 }
 0x517   : > { %v2806_v3 = vadd.f32 %v3570_v38, %v3323_v36  ;;  %v2797_v45 = vpop.f32.mrb[41].mxu1  ;;  %v2669_v36 = vrot.slane %v3359_v24, 1 }
 0x518   : > { %v2798_v23 = vadd.f32 %v3319_v55, %v2797_v45  ;;  %v3571_v28 = vpop.f32.mrb[42].mxu1 }
 0x519   : > { %v2845_v46 = vmul.f32 %v5761_v32, %v2806_v3  ;;  %v2809_v9 = vadd.f32 %v3571_v28, %v3324_v52  ;;  %v2800_v10 = vpop.f32.mrb[43].mxu1  ;;  %v2671_v45 = vsel %vm2638_vm0, %v2669_v36, %v2670_v27  ;;  %v2678_v28 = vsel %vm2638_vm0, %v2675_v40, %v2677_v31 }
 0x51a   : > { %v2843_v44 = vmul.f32 %v5761_v32, %v2798_v23  ;;  %v2801_v60 = vadd.f32 %v3320_v0, %v2800_v10  ;;  %v2676_v0 = vsel %vm2638_vm0, %v2674_v41, %v2675_v40  ;;  %v2673_v10 = vsel %vm2638_vm0, %v2670_v27, %v2672_v5 }
 0x51b   : > { %v2868_v53 = vadd.f32 %v5763_v59, %v2845_v46  ;;  %v2846_v54 = vmul.f32 %v5761_v32, %v2809_v9 }
 0x51c   : > { %v2866_v7 = vadd.f32 %v5763_v59, %v2843_v44  ;;  %v2844_v21 = vmul.f32 %v5761_v32, %v2801_v60 }
 0x51d   : > { %v2884_v12 = vadd.f32 %v2868_v53, %v2666_v4  ;;  %v2869_v15 = vadd.f32 %v5763_v59, %v2846_v54 }
 0x51e   : > { %v2882_v1 = vadd.f32 %v2866_v7, %v2661_v11  ;;  %v2867_v51 = vadd.f32 %v5763_v59, %v2844_v21 }
 0x51f   : > { %v2900_v58 = vmax.f32 %v2884_v12, 0.0  ;;  %v2885_v6 = vadd.f32 %v2869_v15, %v2668_v13 }
 0x520   : > { %v2898_v33 = vmax.f32 %v2882_v1, 0.0  ;;  %v2883_v2 = vadd.f32 %v2867_v51, %v2663_v18 }
 0x521   : > { %2916 = vst.msk [vmem:[%s5778_s13 + $0x50] sm:$0xff] %vm761_vm1, %v2900_v58  ;;  %v2901_v49 = vmax.f32 %v2885_v6, 0.0 }
 0x522   : > { %2914 = vst.msk [vmem:[%s5778_s13 + $0x40] sm:$0xff] %vm761_vm1, %v2898_v33  ;;  %v2899_v14 = vmax.f32 %v2883_v2, 0.0 }
 0x523   : > { %2917 = vst.msk [vmem:[%s5778_s13 + $0x58] sm:$0xff] %vm761_vm1, %v2901_v49 }
 0x524   : > { %2915 = vst.msk [vmem:[%s5778_s13 + $0x48] sm:$0xff] %vm761_vm1, %v2899_v14 }
 0x52e   : > { %v3574_v26 = vpop.f32.mrb[44].mxu1 }
 0x52f   : > { %v2822_v63 = vadd.f32 %v3574_v26, %v3331_v34  ;;  %v2813_v57 = vpop.f32.mrb[45].mxu1 }
 0x530   : > { %v2814_v55 = vadd.f32 %v3327_v16, %v2813_v57  ;;  %v3575_v52 = vpop.f32.mrb[46].mxu1 }
 0x531   : > { %v2849_v61 = vmul.f32 %v5761_v32, %v2822_v63  ;;  %v2825_v37 = vadd.f32 %v3575_v52, %v3332_v25  ;;  %v2816_v38 = vpop.f32.mrb[47].mxu1 }
 0x532   : > { %v2847_v3 = vmul.f32 %v5761_v32, %v2814_v55  ;;  %v2817_v22 = vadd.f32 %v3328_v62, %v2816_v38 }
 0x533   : > { %v2872_v8 = vadd.f32 %v5763_v59, %v2849_v61  ;;  %v2850_v23 = vmul.f32 %v5761_v32, %v2825_v37 }
 0x534   : > { %v2870_v56 = vadd.f32 %v5763_v59, %v2847_v3  ;;  %v2848_v46 = vmul.f32 %v5761_v32, %v2817_v22 }
 0x535   : > { %v2888_v9 = vadd.f32 %v2872_v8, %v2676_v0  ;;  %v2873_v47 = vadd.f32 %v5763_v59, %v2850_v23 }
 0x536   : > { %v2886_v4 = vadd.f32 %v2870_v56, %v2671_v45  ;;  %v2871_v44 = vadd.f32 %v5763_v59, %v2848_v46 }
 0x537   : > { %v2904_v60 = vmax.f32 %v2888_v9, 0.0  ;;  %v2889_v53 = vadd.f32 %v2873_v47, %v2678_v28 }
 0x538   : > { %v2902_v11 = vmax.f32 %v2886_v4, 0.0  ;;  %v2887_v54 = vadd.f32 %v2871_v44, %v2673_v10 }
 0x539   : > { %2920 = vst.msk [vmem:[%s5778_s13 + $0x70] sm:$0xff] %vm761_vm1, %v2904_v60  ;;  %v2905_v32 = vmax.f32 %v2889_v53, 0.0 }
 0x53a   : > { %2918 = vst.msk [vmem:[%s5778_s13 + $0x60] sm:$0xff] %vm761_vm1, %v2902_v11  ;;  %v2903_v59 = vmax.f32 %v2887_v54, 0.0 }
 0x53b   : > { %2921 = vst.msk [vmem:[%s5778_s13 + $0x78] sm:$0xff] %vm761_vm1, %v2905_v32 }
 0x53c   : > { %2919 = vst.msk [vmem:[%s5778_s13 + $0x68] sm:$0xff] %vm761_vm1, %v2903_v59 }
 0x53d   : > { %4394 = shalt.err (!%p4391_p2)
}
 0x53e   : > { %s4395_s28 = scalar_lea.hbm %s5866_s8, 2048  ;;  %s4399_s30 = scalar_lea.hbm %s6062_s7, 8192 }
 0x53f   : > { %p4396_p13 = scmp.ne.s32.totalorder %s5866_s8, %s4395_s28  ;;  %p4400_p8 = scmp.lt.u32.totalorder %s5866_s8, %s6062_s7 }
 0x540   : > { %p4401_p12 = scmp.lt.u32.totalorder %s4399_s30, %s4395_s28  ;;  %p4403_p9 = scmp.lt.u32.totalorder %s4395_s28, %s5866_s8 }
 0x541   : > { %p4397_p1 = pnand %p4396_p13, %p6063_p7 }
 0x542   : > { %p4402_p3 = por %p4401_p12, %p4400_p8 }
 0x543   : > { %p4398_p11 = pneg %p4397_p1 }
 0x544   : > { %p4404_p10 = por %p4403_p9, %p4402_p3 }
 0x546   : > { %p4405_p5 = pnand %p4404_p10, %p4398_p11 }
 0x548   : > { %4408 = shalt.err (!%p4405_p5)
}
 0x549   : > { %s4546_s20 = smov 128   ;;  %s4547_s14 = smov 8  }
 0x54a   : > { %3619 = dma.vmem_to_hbm [thread:$0]  (%p6063_p7), %s5868_s5, 2048, %s5866_s8, %s2923_s15, %s4546_s20, %s4546_s20, %s4547_s14  }
 0x54b PF: > { %s6064_s11 = sld [smem:[#allocation30_spill]]  ;;  %p3679_p6 = scmp.ge.s32.totalorder %s4527_s27, 2 }
 0x54c   : > { %p6065_p0 = scmp.ne.s32.totalorder %s6014_s2, 0 }
 0x54e   : > { %p3657_p4 = pnand %p3679_p6, %p6065_p0 }
 0x551   : > { %s2954_s18 = sand.u32 1, %s6064_s11  }
 0x552   : > { %s2955_s25 = scalar_lea.sflag [#allocation5], %s2954_s18 }
 0x553   : > { %4482 = dma.done.wait (!%p3657_p4), %s2955_s25, 2048  }
 0x554   : > { %4484 = vsyncadd (!%p3657_p4), %s2955_s25, 4294965248  ;;  %s34_s27 = sadd.s32 1, %s4527_s27   ;;  %s6066_s17 = sld [smem:[#allocation31_spill]] }
 0x555   : > { %p31_p2 = scmp.ge.s32.totalorder %s34_s27, 6   ;;  %s6067_s18 = sld [smem:[#allocation32_spill]] }
 0x556   : > { %s6068_s23 = sld [smem:[#allocation35_spill]]  ;;  %s6069_s25 = sld [smem:[#allocation37_spill]] }
 0x557   : > { %s6070_s1 = sld [smem:[#allocation38_spill]]  ;;  %s6071_s19 = smov %s6084_s29 }
 0x558   : > { %s6072_s20 = smov %s4503_s21  ;;  %s6073_s21 = smov %s4507_s22 }
 0x559   : > { %s6074_s22 = smov %s4982_s3  ;;  %s6075_s24 = smov %s4523_s26 }
 0x55a   :  { %33 = sbr.rel (!%p31_p2) target bundleno = 28 (0x1c), region = 162 }
 0x55d   : > { %s6076_s26 = smov %s6070_s1 }
 0x561   :  { %2960 = vsyncpa [#allocation4], 1 }
 0x562   :  { %2962 = vsyncpa [#allocation4 + $0x1], 1 }
 0x563   :  { %2963 = vsyncpa [#allocation7], 1 }
 0x564   :  { %2965 = vsyncpa [#allocation7 + $0x1], 1 }
 0x565   :  { %2966 = vsyncpa [#allocation10], 1 }
 0x566   :  { %2967 = vsyncpa [#allocation13], 1 }
 0x567   :  { %2968 = vsyncpa [#allocation16], 1 }
 0x568   :  { %2969 = vsyncpa [#allocation19], 1 }
 0x569   :  { %2970 = vsyncpa [#allocation5], 1 }
 0x56a   :  { %2972 = vsyncpa [#allocation5 + $0x1], 1 }

</bundles_post_ra>
